<compile_context>
chip_gen: v6e
topology: v6e:2x2x1
jax: 0.10.0
libtpu: 0.0.40
codegen_flags: <defaults>
</compile_context>

<pallas_src>
import jax
import jax.numpy as jnp
from jax.experimental import pallas as pl
from jax.experimental.pallas import tpu as pltpu


# ------------------------------- Pallas kernel ------------------------------ #

def _lenet_kernel(x_ref, wc1_ref, sel1_ref, wc2_ref, sel2_ref, wfc_ref, b_ref,
                  o_ref):
    """One BB-sample block per grid step: conv1+pool -> conv2+pool -> fc1..fc3."""
    f32, bf16 = jnp.float32, jnp.bfloat16
    BB = x_ref.shape[0]
    R = BB * 32

    x = x_ref[...]                                           # (BB, 40, 32) f32 (rows 32..39 zero)

    # ---- conv1 (1->6, 5x5), KH folded into K ---------------------------------
    # LHS row (b, oh) has columns kh*32 + w = x[b, oh+kh, w]; wc1 rows match.
    lhs1 = jnp.concatenate([x[:, kh:kh + 32, :] for kh in range(5)], axis=-1)    # (BB,32,160)
    lhs1 = lhs1.reshape(R, 160).astype(bf16)
    y1 = jnp.dot(lhs1, wc1_ref[...], preferred_element_type=f32)                 # (R,168) cols=co*28+ow

    # ---- pool1 columns: exact one-hot selectors (bf16) -----------------------
    y1b = y1.astype(bf16)
    ycol = jnp.maximum(jnp.dot(y1b, sel1_ref[0], preferred_element_type=f32),
                       jnp.dot(y1b, sel1_ref[1], preferred_element_type=f32))    # (R,84) cols=ci*14+pw

    # ---- pool1 rows on the VPU; conv1 bias + ReLU hoisted past the pool ------
    ycol3 = jnp.concatenate([ycol.reshape(BB, 32, 84),
                             jnp.zeros((BB, 8, 84), f32)], axis=1)               # (BB,40,84)
    rmax1 = jnp.maximum(ycol3[:, 0:32, :], ycol3[:, 1:33, :])                    # row r <- max(r, r+1)
    h1 = jnp.maximum(rmax1 + b_ref[0:1, 0:84], 0.0)          # valid at even rows 0..26

    # ---- conv2 (6->16, 5x5), KH folded; pooled rows live at even rows --------
    h1p = jnp.concatenate([h1, jnp.zeros((BB, 8, 84), f32)], axis=1)             # (BB,40,84)
    lhs2 = jnp.concatenate([h1p[:, 2 * kh:2 * kh + 32, :] for kh in range(5)],
                           axis=-1)                                              # (BB,32,420)
    lhs2 = lhs2.reshape(R, 420).astype(bf16)
    y2 = jnp.dot(lhs2, wc2_ref[...], preferred_element_type=f32)                 # (R,160) cols=co*10+ow
    y2 = y2.reshape(BB, 32, 160)                              # valid at even rows 0..18

    # ---- pool2 rows (valid conv2 rows are 2 apart -> pairs are 4 apart) ------
    rmax2 = jnp.maximum(y2[:, 0:24, :], y2[:, 2:26, :])                          # (BB,24,160); valid rows {0,4,..,16}

    # ---- pool2 columns via selectors, then conv2 bias + ReLU -----------------
    r2 = rmax2.reshape(BB * 24, 160).astype(bf16)
    h2 = jnp.maximum(jnp.dot(r2, sel2_ref[0], preferred_element_type=f32),
                     jnp.dot(r2, sel2_ref[1], preferred_element_type=f32))       # (BB*24,80) cols=co*5+pw
    h2 = jnp.maximum(h2 + b_ref[1:2, 0:80], 0.0).reshape(BB, 24, 80)

    # ---- fc1: gather the 5 valid pooled rows (phys rows 0,4,8,12,16) ---------
    zl = jnp.concatenate(
        [h2[:, 4 * q:4 * q + 1, :].reshape(BB, 80) for q in range(5)],
        axis=-1).astype(bf16)                                                    # (BB,400)
    z = jnp.dot(zl, wfc_ref[0:400, :], preferred_element_type=f32)
    z = jnp.maximum(z + b_ref[2:3, 0:128], 0.0)               # (BB,128), cols 120.. are 0

    z = jnp.dot(z.astype(bf16), wfc_ref[400:528, :], preferred_element_type=f32)
    z = jnp.maximum(z + b_ref[3:4, 0:128], 0.0)               # (BB,128), cols 84.. are 0

    z = jnp.dot(z.astype(bf16), wfc_ref[528:656, :], preferred_element_type=f32)
    o_ref[...] = z + b_ref[4:5, 0:128]                        # (BB,128) lane-dense logits


# --------------------------- wrapper-side packing --------------------------- #

def _band_conv_matrix(w, w_in, ow):
    """(Cout, Cin, KH, KW) -> (KH*Cin*w_in, Cout*ow) 'banded' (width-unfolded) matrix."""
    cout, cin, kh, kw = w.shape
    wi = jnp.arange(w_in)[:, None]
    owi = jnp.arange(ow)[None, :]
    tap = wi - owi                                            # (w_in, ow)
    valid = (tap >= 0) & (tap < kw)
    tapc = jnp.clip(tap, 0, kw - 1)
    g = w[:, :, :, tapc]                                      # (Cout, Cin, KH, w_in, ow)
    g = jnp.where(valid[None, None, None], g, 0.0)
    g = jnp.transpose(g, (2, 1, 3, 0, 4))                     # (KH, Cin, w_in, Cout, ow)
    return g.reshape(kh * cin * w_in, cout * ow)


def _col_select(nch, win, wout, offset):
    """S[ci*win + 2*pw + offset, ci*wout + pw] = 1 — exact column-pool selector."""
    a = jnp.arange(nch * win)[:, None]
    j = jnp.arange(nch * wout)[None, :]
    return (((a // win) == (j // wout)) &
            ((a % win) == 2 * (j % wout) + offset)).astype(jnp.float32)


def pack_params(params):
    """Pack / pad / permute weights ONCE (hoisted out of the per-call path)."""
    f32, bf16 = jnp.float32, jnp.bfloat16

    wc1 = _band_conv_matrix(params["conv1_w"].astype(f32), 32, 28).astype(bf16)   # (160,168)
    wc2 = _band_conv_matrix(params["conv2_w"].astype(f32), 14, 10).astype(bf16)   # (420,160)

    sel1 = jnp.stack([_col_select(6, 28, 14, 0),
                      _col_select(6, 28, 14, 1)]).astype(bf16)                    # (2,168,84)
    sel2 = jnp.stack([_col_select(16, 10, 5, 0),
                      _col_select(16, 10, 5, 1)]).astype(bf16)                    # (2,160,80)

    # fc1: permute input features from torch's (co, ph, pw) flatten order to the
    # kernel's (ph, co, pw) feature order, then pad outputs 120 -> 128 lanes.
    q = jnp.arange(5)
    co = jnp.arange(16)
    pw = jnp.arange(5)
    perm = (co[None, :, None] * 25 + q[:, None, None] * 5 +
            pw[None, None, :]).reshape(400)
    wf1 = jnp.zeros((400, 128), f32).at[:, :120].set(params["fc1_w"][perm, :])
    wf2 = jnp.zeros((128, 128), f32).at[:120, :84].set(params["fc2_w"])
    wf3 = jnp.zeros((128, 128), f32).at[:84, :10].set(params["fc3_w"])
    wfc = jnp.concatenate([wf1, wf2, wf3], axis=0).astype(bf16)                   # (656,128)

    biases = jnp.zeros((5, 128), f32)
    biases = biases.at[0, :84].set(jnp.repeat(params["conv1_b"].astype(f32), 14))
    biases = biases.at[1, :80].set(jnp.repeat(params["conv2_b"].astype(f32), 5))
    biases = biases.at[2, :120].set(params["fc1_b"].astype(f32))
    biases = biases.at[3, :84].set(params["fc2_b"].astype(f32))
    biases = biases.at[4, :10].set(params["fc3_b"].astype(f32))

    return (wc1, sel1, wc2, sel2, wfc, biases)


# ------------------------------- forward pass ------------------------------- #

def _round_up(a, b):
    return (a + b - 1) // b * b


@jax.jit
def net_forward(packed, x_nchw):
    wc1, sel1, wc2, sel2, wfc, biases = packed
    N, C, H, W = x_nchw.shape
    if (C, H, W) != (1, 32, 32):
        raise ValueError("Net expects (N, 1, 32, 32) input (LeNet-sized).")

    BB = min(64, _round_up(max(N, 1), 8))       # samples per grid step (mult of 8)
    Npad = _round_up(N, BB)

    # Pad batch to a multiple of BB and rows 32 -> 40 (room for the kh/row-pool
    # shifts inside the kernel without any OOB access).
    x = x_nchw[:, 0, :, :].astype(jnp.float32)                    # (N,32,32)
    xp = jnp.zeros((Npad, 40, 32), jnp.float32).at[:N, :32, :].set(x)

    in_specs = [
        pl.BlockSpec((BB, 40, 32), lambda i: (i, 0, 0)),          # per-block input
        pl.BlockSpec(wc1.shape, lambda i: (0, 0)),                # resident constants
        pl.BlockSpec(sel1.shape, lambda i: (0, 0, 0)),
        pl.BlockSpec(wc2.shape, lambda i: (0, 0)),
        pl.BlockSpec(sel2.shape, lambda i: (0, 0, 0)),
        pl.BlockSpec(wfc.shape, lambda i: (0, 0)),
        pl.BlockSpec(biases.shape, lambda i: (0, 0)),
    ]

    logits = pl.pallas_call(
        _lenet_kernel,
        out_shape=jax.ShapeDtypeStruct((Npad, 128), jnp.float32),
        grid=(Npad // BB,),
        in_specs=in_specs,
        out_specs=pl.BlockSpec((BB, 128), lambda i: (i, 0)),
        compiler_params=pltpu.CompilerParams(
            dimension_semantics=("parallel",),
            vmem_limit_bytes=32 * 1024 * 1024),
    )(xp, wc1, sel1, wc2, sel2, wfc, biases)

    # F.softmax(..., dim=0) is a cross-sample reduction over the *batch*; it is a
    # trivial (N,10) op, so it is done in plain XLA on the un-padded logits.
    return jax.nn.softmax(logits[:N, :10], axis=0)


# ------------------------------ reference & init ----------------------------- #

def _reference_forward(params, x_nchw):
    """Plain-JAX f32 reference of the PyTorch forward (for a parity check)."""
    f32 = jnp.float32
    x = x_nchw.astype(f32)

    def conv(a, w, b):
        y = jax.lax.conv_general_dilated(
            a, w.astype(f32), (1, 1), "VALID",
            dimension_numbers=("NCHW", "OIHW", "NCHW"))
        return y + b.astype(f32)[None, :, None, None]

    def pool2(a):
        n, c, h, w = a.shape
        return a.reshape(n, c, h // 2, 2, w // 2, 2).max(axis=(3, 5))

    h = pool2(jax.nn.relu(conv(x, params["conv1_w"], params["conv1_b"])))
    h = pool2(jax.nn.relu(conv(h, params["conv2_w"], params["conv2_b"])))
    h = h.reshape(x.shape[0], -1)                              # torch NCHW flatten order
    h = jax.nn.relu(h @ params["fc1_w"] + params["fc1_b"])
    h = jax.nn.relu(h @ params["fc2_w"] + params["fc2_b"])
    logits = h @ params["fc3_w"] + params["fc3_b"]
    return jax.nn.softmax(logits, axis=0)


def init_params(key):
    ks = jax.random.split(key, 10)

    def u(k, shape, fan_in):
        bound = 1.0 / jnp.sqrt(float(fan_in))
        return jax.random.uniform(k, shape, jnp.float32, -bound, bound)

    return {
        # inferred LeNet convs (see note at top)
        "conv1_w": u(ks[0], (6, 1, 5, 5), 1 * 5 * 5),
        "conv1_b": u(ks[1], (6,), 1 * 5 * 5),
        "conv2_w": u(ks[2], (16, 6, 5, 5), 6 * 5 * 5),
        "conv2_b": u(ks[3], (16,), 6 * 5 * 5),
        # fc weights stored transposed (in, out) relative to torch's (out, in)
        "fc1_w": u(ks[4], (400, 120), 400),
        "fc1_b": u(ks[5], (120,), 400),
        "fc2_w": u(ks[6], (120, 84), 120),
        "fc2_b": u(ks[7], (84,), 120),
        "fc3_w": u(ks[8], (84, 10), 84),
        "fc3_b": u(ks[9], (10,), 84),
    }


if __name__ == "__main__":
    key = jax.random.PRNGKey(0)
    pkey, xkey = jax.random.split(key)
    params = init_params(pkey)

    # Small deterministic input: batch=2, 1 channel, 32x32 (LeNet-sized).
    x = jax.random.normal(xkey, (2, 1, 32, 32), dtype=jnp.float32)

    packed = pack_params(params)            # packed once, reused across calls
    out = jax.block_until_ready(net_forward(packed, x))

    assert out.shape == (2, 10), out.shape
    assert bool(jnp.all(jnp.isfinite(out)))
    # softmax over dim=0 -> each column sums to 1 across the batch
    col_sums = jnp.sum(out, axis=0)
    assert bool(jnp.all(jnp.abs(col_sums - 1.0) < 1e-3)), col_sums
    # parity against an f32 plain-JAX reference (bf16 MXU operands -> loose tol)
    ref = jax.block_until_ready(_reference_forward(params, x))
    assert bool(jnp.max(jnp.abs(out - ref)) < 5e-2), jnp.max(jnp.abs(out - ref))
    print("KERNEL_OK")
</pallas_src>

<mosaic_0001>
module attributes {stable_mosaic.version = 11 : i64} {
  func.func @_lenet_kernel(%arg0: i32, %arg1: memref<8x40x32xf32, #tpu.memory_space<vmem>>, %arg2: memref<160x168xbf16, #tpu.memory_space<vmem>>, %arg3: memref<2x168x84xbf16, #tpu.memory_space<vmem>>, %arg4: memref<420x160xbf16, #tpu.memory_space<vmem>>, %arg5: memref<2x160x80xbf16, #tpu.memory_space<vmem>>, %arg6: memref<656x128xbf16, #tpu.memory_space<vmem>>, %arg7: memref<5x128xf32, #tpu.memory_space<vmem>>, %arg8: memref<8x128xf32, #tpu.memory_space<vmem>>) attributes {dimension_semantics = [#tpu.dimension_semantics<parallel>], iteration_bounds = array<i64: 1>, scalar_prefetch = 0 : i64, scratch_operands = 0 : i64, tpu.core_type = #tpu.core_type<tc>, window_params = [{transform_indices = @transform_0, window_bounds = array<i64: 8, 40, 32>}, {pipeline_mode = #tpu.pipeline_mode<synchronous>, transform_indices = @transform_1, window_bounds = array<i64: 160, 168>}, {pipeline_mode = #tpu.pipeline_mode<synchronous>, transform_indices = @transform_2, window_bounds = array<i64: 2, 168, 84>}, {pipeline_mode = #tpu.pipeline_mode<synchronous>, transform_indices = @transform_3, window_bounds = array<i64: 420, 160>}, {pipeline_mode = #tpu.pipeline_mode<synchronous>, transform_indices = @transform_4, window_bounds = array<i64: 2, 160, 80>}, {pipeline_mode = #tpu.pipeline_mode<synchronous>, transform_indices = @transform_5, window_bounds = array<i64: 656, 128>}, {pipeline_mode = #tpu.pipeline_mode<synchronous>, transform_indices = @transform_6, window_bounds = array<i64: 5, 128>}, {transform_indices = @transform_7, window_bounds = array<i64: 8, 128>}]} {
    %c0 = arith.constant 0 : index
    %c0_0 = arith.constant 0 : index
    %c0_1 = arith.constant 0 : index
    %0 = vector.load %arg1[%c0, %c0_0, %c0_1] : memref<8x40x32xf32, #tpu.memory_space<vmem>>, vector<8x40x32xf32>
    %1 = vector.extract_strided_slice %0 {offsets = [0, 0, 0], sizes = [8, 32, 32], strides = [1, 1, 1]} : vector<8x40x32xf32> to vector<8x32x32xf32>
    %2 = vector.extract_strided_slice %0 {offsets = [0, 1, 0], sizes = [8, 32, 32], strides = [1, 1, 1]} : vector<8x40x32xf32> to vector<8x32x32xf32>
    %3 = vector.extract_strided_slice %0 {offsets = [0, 2, 0], sizes = [8, 32, 32], strides = [1, 1, 1]} : vector<8x40x32xf32> to vector<8x32x32xf32>
    %4 = vector.extract_strided_slice %0 {offsets = [0, 3, 0], sizes = [8, 32, 32], strides = [1, 1, 1]} : vector<8x40x32xf32> to vector<8x32x32xf32>
    %5 = vector.extract_strided_slice %0 {offsets = [0, 4, 0], sizes = [8, 32, 32], strides = [1, 1, 1]} : vector<8x40x32xf32> to vector<8x32x32xf32>
    %6 = tpu.concatenate %1, %2, %3, %4, %5 in 2 : vector<8x32x32xf32>, vector<8x32x32xf32>, vector<8x32x32xf32>, vector<8x32x32xf32>, vector<8x32x32xf32> -> vector<8x32x160xf32>
    %7 = vector.shape_cast %6 : vector<8x32x160xf32> to vector<256x160xf32>
    %8 = arith.truncf %7 : vector<256x160xf32> to vector<256x160xbf16>
    %c0_2 = arith.constant 0 : index
    %c0_3 = arith.constant 0 : index
    %9 = vector.load %arg2[%c0_2, %c0_3] : memref<160x168xbf16, #tpu.memory_space<vmem>>, vector<160x168xbf16>
    %cst = arith.constant dense<0.000000e+00> : vector<256x168xf32>
    %10 = tpu.matmul %8, %9, %cst {dimension_numbers = #tpu.dot_dimension_numbers<[1], [0], [0], [1], [0, 0, 1, 1], [], []>} : vector<256x160xbf16>, vector<160x168xbf16>, vector<256x168xf32> -> vector<256x168xf32>
    %11 = arith.truncf %10 : vector<256x168xf32> to vector<256x168xbf16>
    %c0_4 = arith.constant 0 : index
    %c0_5 = arith.constant 0 : index
    %c0_6 = arith.constant 0 : index
    %12 = vector.load %arg3[%c0_4, %c0_5, %c0_6] : memref<2x168x84xbf16, #tpu.memory_space<vmem>>, vector<1x168x84xbf16>
    %13 = vector.shape_cast %12 : vector<1x168x84xbf16> to vector<168x84xbf16>
    %cst_7 = arith.constant dense<0.000000e+00> : vector<256x84xf32>
    %14 = tpu.matmul %11, %13, %cst_7 {dimension_numbers = #tpu.dot_dimension_numbers<[1], [0], [0], [1], [0, 0, 1, 1], [], []>} : vector<256x168xbf16>, vector<168x84xbf16>, vector<256x84xf32> -> vector<256x84xf32>
    %c1 = arith.constant 1 : index
    %c0_8 = arith.constant 0 : index
    %c0_9 = arith.constant 0 : index
    %15 = vector.load %arg3[%c1, %c0_8, %c0_9] : memref<2x168x84xbf16, #tpu.memory_space<vmem>>, vector<1x168x84xbf16>
    %16 = vector.shape_cast %15 : vector<1x168x84xbf16> to vector<168x84xbf16>
    %cst_10 = arith.constant dense<0.000000e+00> : vector<256x84xf32>
    %17 = tpu.matmul %11, %16, %cst_10 {dimension_numbers = #tpu.dot_dimension_numbers<[1], [0], [0], [1], [0, 0, 1, 1], [], []>} : vector<256x168xbf16>, vector<168x84xbf16>, vector<256x84xf32> -> vector<256x84xf32>
    %18 = arith.maximumf %14, %17 : vector<256x84xf32>
    %19 = vector.shape_cast %18 : vector<256x84xf32> to vector<8x32x84xf32>
    %cst_11 = arith.constant 0.000000e+00 : f32
    %20 = vector.broadcast %cst_11 : f32 to vector<8x8x84xf32>
    %21 = tpu.concatenate %19, %20 in 1 : vector<8x32x84xf32>, vector<8x8x84xf32> -> vector<8x40x84xf32>
    %22 = vector.extract_strided_slice %21 {offsets = [0, 0, 0], sizes = [8, 32, 84], strides = [1, 1, 1]} : vector<8x40x84xf32> to vector<8x32x84xf32>
    %23 = vector.extract_strided_slice %21 {offsets = [0, 1, 0], sizes = [8, 32, 84], strides = [1, 1, 1]} : vector<8x40x84xf32> to vector<8x32x84xf32>
    %24 = arith.maximumf %22, %23 : vector<8x32x84xf32>
    %c0_12 = arith.constant 0 : index
    %c0_13 = arith.constant 0 : index
    %25 = vector.load %arg7[%c0_12, %c0_13] : memref<5x128xf32, #tpu.memory_space<vmem>>, vector<1x84xf32>
    %26 = vector.shape_cast %25 : vector<1x84xf32> to vector<1x1x84xf32>
    %27 = vector.broadcast %26 : vector<1x1x84xf32> to vector<8x32x84xf32>
    %28 = arith.addf %24, %27 : vector<8x32x84xf32>
    %cst_14 = arith.constant 0.000000e+00 : f32
    %29 = vector.broadcast %cst_14 : f32 to vector<8x32x84xf32>
    %30 = arith.maximumf %28, %29 : vector<8x32x84xf32>
    %cst_15 = arith.constant 0.000000e+00 : f32
    %31 = vector.broadcast %cst_15 : f32 to vector<8x8x84xf32>
    %32 = tpu.concatenate %30, %31 in 1 : vector<8x32x84xf32>, vector<8x8x84xf32> -> vector<8x40x84xf32>
    %33 = vector.extract_strided_slice %32 {offsets = [0, 0, 0], sizes = [8, 32, 84], strides = [1, 1, 1]} : vector<8x40x84xf32> to vector<8x32x84xf32>
    %34 = vector.extract_strided_slice %32 {offsets = [0, 2, 0], sizes = [8, 32, 84], strides = [1, 1, 1]} : vector<8x40x84xf32> to vector<8x32x84xf32>
    %35 = vector.extract_strided_slice %32 {offsets = [0, 4, 0], sizes = [8, 32, 84], strides = [1, 1, 1]} : vector<8x40x84xf32> to vector<8x32x84xf32>
    %36 = vector.extract_strided_slice %32 {offsets = [0, 6, 0], sizes = [8, 32, 84], strides = [1, 1, 1]} : vector<8x40x84xf32> to vector<8x32x84xf32>
    %37 = vector.extract_strided_slice %32 {offsets = [0, 8, 0], sizes = [8, 32, 84], strides = [1, 1, 1]} : vector<8x40x84xf32> to vector<8x32x84xf32>
    %38 = tpu.concatenate %33, %34, %35, %36, %37 in 2 : vector<8x32x84xf32>, vector<8x32x84xf32>, vector<8x32x84xf32>, vector<8x32x84xf32>, vector<8x32x84xf32> -> vector<8x32x420xf32>
    %39 = vector.shape_cast %38 : vector<8x32x420xf32> to vector<256x420xf32>
    %40 = arith.truncf %39 : vector<256x420xf32> to vector<256x420xbf16>
    %c0_16 = arith.constant 0 : index
    %c0_17 = arith.constant 0 : index
    %41 = vector.load %arg4[%c0_16, %c0_17] : memref<420x160xbf16, #tpu.memory_space<vmem>>, vector<420x160xbf16>
    %cst_18 = arith.constant dense<0.000000e+00> : vector<256x160xf32>
    %42 = tpu.matmul %40, %41, %cst_18 {dimension_numbers = #tpu.dot_dimension_numbers<[1], [0], [0], [1], [0, 0, 1, 1], [], []>} : vector<256x420xbf16>, vector<420x160xbf16>, vector<256x160xf32> -> vector<256x160xf32>
    %43 = vector.shape_cast %42 : vector<256x160xf32> to vector<8x32x160xf32>
    %44 = vector.extract_strided_slice %43 {offsets = [0, 0, 0], sizes = [8, 24, 160], strides = [1, 1, 1]} : vector<8x32x160xf32> to vector<8x24x160xf32>
    %45 = vector.extract_strided_slice %43 {offsets = [0, 2, 0], sizes = [8, 24, 160], strides = [1, 1, 1]} : vector<8x32x160xf32> to vector<8x24x160xf32>
    %46 = arith.maximumf %44, %45 : vector<8x24x160xf32>
    %47 = vector.shape_cast %46 : vector<8x24x160xf32> to vector<192x160xf32>
    %48 = arith.truncf %47 : vector<192x160xf32> to vector<192x160xbf16>
    %c0_19 = arith.constant 0 : index
    %c0_20 = arith.constant 0 : index
    %c0_21 = arith.constant 0 : index
    %49 = vector.load %arg5[%c0_19, %c0_20, %c0_21] : memref<2x160x80xbf16, #tpu.memory_space<vmem>>, vector<1x160x80xbf16>
    %50 = vector.shape_cast %49 : vector<1x160x80xbf16> to vector<160x80xbf16>
    %cst_22 = arith.constant dense<0.000000e+00> : vector<192x80xf32>
    %51 = tpu.matmul %48, %50, %cst_22 {dimension_numbers = #tpu.dot_dimension_numbers<[1], [0], [0], [1], [0, 0, 1, 1], [], []>} : vector<192x160xbf16>, vector<160x80xbf16>, vector<192x80xf32> -> vector<192x80xf32>
    %c1_23 = arith.constant 1 : index
    %c0_24 = arith.constant 0 : index
    %c0_25 = arith.constant 0 : index
    %52 = vector.load %arg5[%c1_23, %c0_24, %c0_25] : memref<2x160x80xbf16, #tpu.memory_space<vmem>>, vector<1x160x80xbf16>
    %53 = vector.shape_cast %52 : vector<1x160x80xbf16> to vector<160x80xbf16>
    %cst_26 = arith.constant dense<0.000000e+00> : vector<192x80xf32>
    %54 = tpu.matmul %48, %53, %cst_26 {dimension_numbers = #tpu.dot_dimension_numbers<[1], [0], [0], [1], [0, 0, 1, 1], [], []>} : vector<192x160xbf16>, vector<160x80xbf16>, vector<192x80xf32> -> vector<192x80xf32>
    %55 = arith.maximumf %51, %54 : vector<192x80xf32>
    %c1_27 = arith.constant 1 : index
    %c0_28 = arith.constant 0 : index
    %56 = vector.load %arg7[%c1_27, %c0_28] : memref<5x128xf32, #tpu.memory_space<vmem>>, vector<1x80xf32>
    %57 = vector.broadcast %56 : vector<1x80xf32> to vector<192x80xf32>
    %58 = arith.addf %55, %57 : vector<192x80xf32>
    %cst_29 = arith.constant 0.000000e+00 : f32
    %59 = vector.broadcast %cst_29 : f32 to vector<192x80xf32>
    %60 = arith.maximumf %58, %59 : vector<192x80xf32>
    %61 = vector.shape_cast %60 : vector<192x80xf32> to vector<8x24x80xf32>
    %62 = vector.extract_strided_slice %61 {offsets = [0, 0, 0], sizes = [8, 1, 80], strides = [1, 1, 1]} : vector<8x24x80xf32> to vector<8x1x80xf32>
    %63 = vector.shape_cast %62 : vector<8x1x80xf32> to vector<8x80xf32>
    %64 = vector.extract_strided_slice %61 {offsets = [0, 4, 0], sizes = [8, 1, 80], strides = [1, 1, 1]} : vector<8x24x80xf32> to vector<8x1x80xf32>
    %65 = vector.shape_cast %64 : vector<8x1x80xf32> to vector<8x80xf32>
    %66 = vector.extract_strided_slice %61 {offsets = [0, 8, 0], sizes = [8, 1, 80], strides = [1, 1, 1]} : vector<8x24x80xf32> to vector<8x1x80xf32>
    %67 = vector.shape_cast %66 : vector<8x1x80xf32> to vector<8x80xf32>
    %68 = vector.extract_strided_slice %61 {offsets = [0, 12, 0], sizes = [8, 1, 80], strides = [1, 1, 1]} : vector<8x24x80xf32> to vector<8x1x80xf32>
    %69 = vector.shape_cast %68 : vector<8x1x80xf32> to vector<8x80xf32>
    %70 = vector.extract_strided_slice %61 {offsets = [0, 16, 0], sizes = [8, 1, 80], strides = [1, 1, 1]} : vector<8x24x80xf32> to vector<8x1x80xf32>
    %71 = vector.shape_cast %70 : vector<8x1x80xf32> to vector<8x80xf32>
    %72 = tpu.concatenate %63, %65, %67, %69, %71 in 1 : vector<8x80xf32>, vector<8x80xf32>, vector<8x80xf32>, vector<8x80xf32>, vector<8x80xf32> -> vector<8x400xf32>
    %73 = arith.truncf %72 : vector<8x400xf32> to vector<8x400xbf16>
    %c0_30 = arith.constant 0 : index
    %c0_31 = arith.constant 0 : index
    %74 = vector.load %arg6[%c0_30, %c0_31] : memref<656x128xbf16, #tpu.memory_space<vmem>>, vector<400x128xbf16>
    %cst_32 = arith.constant dense<0.000000e+00> : vector<8x128xf32>
    %75 = tpu.matmul %73, %74, %cst_32 {dimension_numbers = #tpu.dot_dimension_numbers<[1], [0], [0], [1], [0, 0, 1, 1], [], []>} : vector<8x400xbf16>, vector<400x128xbf16>, vector<8x128xf32> -> vector<8x128xf32>
    %c2 = arith.constant 2 : index
    %c0_33 = arith.constant 0 : index
    %76 = vector.load %arg7[%c2, %c0_33] : memref<5x128xf32, #tpu.memory_space<vmem>>, vector<1x128xf32>
    %77 = vector.broadcast %76 : vector<1x128xf32> to vector<8x128xf32>
    %78 = arith.addf %75, %77 : vector<8x128xf32>
    %cst_34 = arith.constant 0.000000e+00 : f32
    %79 = vector.broadcast %cst_34 : f32 to vector<8x128xf32>
    %80 = arith.maximumf %78, %79 : vector<8x128xf32>
    %81 = arith.truncf %80 : vector<8x128xf32> to vector<8x128xbf16>
    %c400 = arith.constant 400 : index
    %c0_35 = arith.constant 0 : index
    %82 = vector.load %arg6[%c400, %c0_35] : memref<656x128xbf16, #tpu.memory_space<vmem>>, vector<128x128xbf16>
    %cst_36 = arith.constant dense<0.000000e+00> : vector<8x128xf32>
    %83 = tpu.matmul %81, %82, %cst_36 {dimension_numbers = #tpu.dot_dimension_numbers<[1], [0], [0], [1], [0, 0, 1, 1], [], []>} : vector<8x128xbf16>, vector<128x128xbf16>, vector<8x128xf32> -> vector<8x128xf32>
    %c3 = arith.constant 3 : index
    %c0_37 = arith.constant 0 : index
    %84 = vector.load %arg7[%c3, %c0_37] : memref<5x128xf32, #tpu.memory_space<vmem>>, vector<1x128xf32>
    %85 = vector.broadcast %84 : vector<1x128xf32> to vector<8x128xf32>
    %86 = arith.addf %83, %85 : vector<8x128xf32>
    %cst_38 = arith.constant 0.000000e+00 : f32
    %87 = vector.broadcast %cst_38 : f32 to vector<8x128xf32>
    %88 = arith.maximumf %86, %87 : vector<8x128xf32>
    %89 = arith.truncf %88 : vector<8x128xf32> to vector<8x128xbf16>
    %c528 = arith.constant 528 : index
    %c0_39 = arith.constant 0 : index
    %90 = vector.load %arg6[%c528, %c0_39] : memref<656x128xbf16, #tpu.memory_space<vmem>>, vector<128x128xbf16>
    %cst_40 = arith.constant dense<0.000000e+00> : vector<8x128xf32>
    %91 = tpu.matmul %89, %90, %cst_40 {dimension_numbers = #tpu.dot_dimension_numbers<[1], [0], [0], [1], [0, 0, 1, 1], [], []>} : vector<8x128xbf16>, vector<128x128xbf16>, vector<8x128xf32> -> vector<8x128xf32>
    %c4 = arith.constant 4 : index
    %c0_41 = arith.constant 0 : index
    %92 = vector.load %arg7[%c4, %c0_41] : memref<5x128xf32, #tpu.memory_space<vmem>>, vector<1x128xf32>
    %93 = vector.broadcast %92 : vector<1x128xf32> to vector<8x128xf32>
    %94 = arith.addf %91, %93 : vector<8x128xf32>
    %c0_42 = arith.constant 0 : index
    %c0_43 = arith.constant 0 : index
    %95 = vector.load %arg8[%c0_42, %c0_43] : memref<8x128xf32, #tpu.memory_space<vmem>>, vector<8x128xf32>
    tpu.vector_store %arg8[%c0_42, %c0_43], %94 {strides = array<i32>} : memref<8x128xf32, #tpu.memory_space<vmem>>, vector<8x128xf32>,
    return
  }
  func.func @transform_0(%arg0: i32) -> (i32, i32, i32) {
    %c0_i32 = arith.constant 0 : i32
    %c0_i32_0 = arith.constant 0 : i32
    %c0_i32_1 = arith.constant 0 : i32
    return %arg0, %c0_i32, %c0_i32_0 : i32, i32, i32
  }
  func.func @transform_1(%arg0: i32) -> (i32, i32) {
    %c0_i32 = arith.constant 0 : i32
    %c0_i32_0 = arith.constant 0 : i32
    %c0_i32_1 = arith.constant 0 : i32
    return %c0_i32, %c0_i32_0 : i32, i32
  }
  func.func @transform_2(%arg0: i32) -> (i32, i32, i32) {
    %c0_i32 = arith.constant 0 : i32
    %c0_i32_0 = arith.constant 0 : i32
    %c0_i32_1 = arith.constant 0 : i32
    %c0_i32_2 = arith.constant 0 : i32
    return %c0_i32, %c0_i32_0, %c0_i32_1 : i32, i32, i32
  }
  func.func @transform_3(%arg0: i32) -> (i32, i32) {
    %c0_i32 = arith.constant 0 : i32
    %c0_i32_0 = arith.constant 0 : i32
    %c0_i32_1 = arith.constant 0 : i32
    return %c0_i32, %c0_i32_0 : i32, i32
  }
  func.func @transform_4(%arg0: i32) -> (i32, i32, i32) {
    %c0_i32 = arith.constant 0 : i32
    %c0_i32_0 = arith.constant 0 : i32
    %c0_i32_1 = arith.constant 0 : i32
    %c0_i32_2 = arith.constant 0 : i32
    return %c0_i32, %c0_i32_0, %c0_i32_1 : i32, i32, i32
  }
  func.func @transform_5(%arg0: i32) -> (i32, i32) {
    %c0_i32 = arith.constant 0 : i32
    %c0_i32_0 = arith.constant 0 : i32
    %c0_i32_1 = arith.constant 0 : i32
    return %c0_i32, %c0_i32_0 : i32, i32
  }
  func.func @transform_6(%arg0: i32) -> (i32, i32) {
    %c0_i32 = arith.constant 0 : i32
    %c0_i32_0 = arith.constant 0 : i32
    %c0_i32_1 = arith.constant 0 : i32
    return %c0_i32, %c0_i32_0 : i32, i32
  }
  func.func @transform_7(%arg0: i32) -> (i32, i32) {
    %c0_i32 = arith.constant 0 : i32
    %c0_i32_0 = arith.constant 0 : i32
    return %arg0, %c0_i32 : i32, i32
  }
}

</mosaic_0001>

<bundles_post_ra>
// kernel: net_forward.1
= control target key start
LH: loop header
LB: loop body
LE: loop exit
PB: predicated region body
PF: predicated region fallthrough
CT: control target
= control target key end

     0   :  { %12 = vsyncpa [#allocation3], 0  ;;  %s6241_s24 = smov [#allocation2]   ;;  %s8426_s0 = inlined_call_operand.vmem [shape: f32[8,40,32], index: 0, kind: input, shape index: {}]   ;;  %s8427_s1 = inlined_call_operand.vmem [shape: bf16[160,168], index: 1, kind: input, shape index: {}]   ;;  %s8428_s2 = inlined_call_operand.vmem [shape: bf16[2,168,84], index: 2, kind: input, shape index: {}]   ;;  %s8429_s3 = inlined_call_operand.vmem [shape: bf16[420,160], index: 3, kind: input, shape index: {}]   ;;  %s8430_s4 = inlined_call_operand.hbm [shape: bf16[2,160,80], index: 4, kind: input, shape index: {}]   ;;  %s8431_s5 = inlined_call_operand.vmem [shape: bf16[656,128], index: 5, kind: input, shape index: {}]   ;;  %s8432_s6 = inlined_call_operand.vmem [shape: f32[5,128], index: 6, kind: input, shape index: {}]   ;;  %s8433_s7 = inlined_call_operand.vmem [shape: f32[8,128], index: 7, kind: output, shape index: {}]  }
   0x1   :  { %s26_s25 = sshll.u32 %s6241_s24, 4  ;;  %s27_s25 = int_to_ptr.vmem [resolvable:$true] %s26_s25 }
   0x2   :  { %s6227_s26 = scalar_lea.vmem %s27_s25, 2560  ;;  %p6232_p1 = scmp.lt.s32.totalorder %s27_s25, %s27_s25 }
   0x3   :  { %p6228_p0 = scmp.ne.s32.totalorder %s27_s25, %s6227_s26  ;;  %p6233_p2 = scmp.lt.s32.totalorder %s6227_s26, %s6227_s26 }
   0x5   :  { %p6234_p3 = por %p6233_p2, %p6232_p1 }
   0x7   :  { %p6235_p4 = pnand %p6234_p3, %p6228_p0 }
   0x9   :  { %6238 = shalt.err (!%p6235_p4)
}
   0xa   :  { %s6242_s27 = smov 64   ;;  %s6243_s28 = smov 4  }
   0xb   :  { %32 = dma.hbm_to_vmem [thread:$0]  %s8430_s4, 2560, %s27_s25, [#allocation3], %s6242_s27, %s6242_s27, %s6243_s28  }
   0xc   :  { %6239 = dma.done.wait [#allocation3], 2560  }
   0xd   :  { %6240 = vsyncadd [#allocation3], 4294964736  ;;  %v6302_v0 = vld [vmem:[%s8426_s0] sm:$0xff]  ;;  %v6307_v1 = vld [vmem:[%s8426_s0 + $0x8] sm:$0xff]  ;;  %vm121_vm0 = vcmask 1046528   ;;  %vm459_vm1 = vcmask 1044480  }
   0xe   :  { %v6312_v2 = vld [vmem:[%s8426_s0 + $0x10] sm:$0xff]  ;;  %vm290_vm2 = vcmask 1045504   ;;  %v122_v3 = vrot.slane %v6302_v0, 1  ;;  %v123_v4 = vrot.slane %v6307_v1, 1  ;;  %v460_v6 = vrot.slane %v6302_v0, 3  ;;  %v44_v7 = vld [vmem:[%s8426_s0 + $0x18] sm:$0xff] }
   0xf   :  { %v125_v5 = vrot.slane %v6312_v2, 1  ;;  %v461_v8 = vrot.slane %v6307_v1, 3  ;;  %v463_v9 = vrot.slane %v6312_v2, 3  ;;  %v291_v10 = vrot.slane %v6302_v0, 2  ;;  %v45_v12 = vld [vmem:[%s8426_s0 + $0x20] sm:$0xff]  ;;  %v46_v21 = vld [vmem:[%s8426_s0 + $0x28] sm:$0xff] }
  0x10   :  { %v292_v11 = vrot.slane %v6307_v1, 2  ;;  %v124_v13 = vsel %vm121_vm0, %v122_v3, %v123_v4  ;;  %v294_v15 = vrot.slane %v6312_v2, 2  ;;  %v127_v16 = vrot.slane %v44_v7, 1  ;;  %v47_v22 = vld [vmem:[%s8426_s0 + $0x30] sm:$0xff]  ;;  %s6244_s21 = smov 32   ;;  %v6346_v31 = vld [vmem:[%s8426_s0 + $0x38] sm:$0xff] }
  0x11   :  { %v126_v14 = vsel %vm121_vm0, %v123_v4, %v125_v5  ;;  %v462_v18 = vsel %vm459_vm1, %v460_v6, %v461_v8  ;;  %v464_v19 = vsel %vm459_vm1, %v461_v8, %v463_v9  ;;  %v129_v26 = vrot.slane %v45_v12, 1  ;;  %s6245_s24 = smov 96   ;;  %v49_v44 = vld [vmem:[%s8426_s0 + $0x40] sm:$0xff]  ;;  %v50_v49 = vld [vmem:[%s8426_s0 + $0x48] sm:$0xff]  ;;  %v5985_v54 = vld [vmem:[%s8427_s1 + $0x74] ss:$8 sps:$4 sm:$0xff]  }
  0x12   :  { %v5445_v17 = vpack.i.bf16 %v126_v14, %v124_v13  ;;  %v293_v20 = vsel %vm290_vm2, %v291_v10, %v292_v11  ;;  %v5455_v23 = vpack.i.bf16 %v464_v19, %v462_v18  ;;  %v295_v24 = vsel %vm290_vm2, %v292_v11, %v294_v15  ;;  %v5987_v58 = vld [vmem:[%s8427_s1 + $0x70] ss:$8 sps:$4 sm:$0xff]   ;;  %1032 = vmatprep.subr.bf16.mxu0 %v5985_v54  ;;  %v5988_v61 = vld [vmem:[%s8427_s1 + $0x64] ss:$8 sps:$4 sm:$0xff]   ;;  %s6249_s13 = smov 84   ;;  %s6251_s4 = smov 124  }
  0x13   :  { %v128_v25 = vsel %vm121_vm0, %v125_v5, %v127_v16  ;;  %v5450_v27 = vpack.i.bf16 %v295_v24, %v293_v20  ;;  %v296_v28 = vrot.slane %v44_v7, 2  ;;  %v298_v29 = vrot.slane %v45_v12, 2  ;;  %1033 = vmatpush1.bf16.msra.mxu0 %v5987_v58  ;;  %v5990_v5 = vld [vmem:[%s8427_s1 + $0x60] ss:$8 sps:$4 sm:$0xff]   ;;  %v51_v10 = vld [vmem:[%s8426_s0 + $0x50] sm:$0xff]  ;;  %v52_v11 = vld [vmem:[%s8426_s0 + $0x58] sm:$0xff] }
  0x14   :  { %5446 = vrot.lane.b32.xlu0 %v5445_v17, %s6244_s21  ;;  %v465_v30 = vrot.slane %v44_v7, 3  ;;  %5456 = vrot.lane.b32.xlu1 %v5455_v23, %s6245_s24  ;;  %v130_v32 = vsel %vm121_vm0, %v127_v16, %v129_v26  ;;  %v467_v33 = vrot.slane %v45_v12, 3  ;;  %v131_v34 = vrot.slane %v46_v21, 1  ;;  %v5991_v12 = vld [vmem:[%s8427_s1 + $0x54] ss:$8 sps:$4 sm:$0xff]   ;;  %v6399_v14 = vld [vmem:[%s8426_s0 + $0x60] sm:$0xff] }
  0x15   :  { %v132_v35 = vrot.slane %v47_v22, 1  ;;  %v5460_v36 = vpack.i.bf16 %v130_v32, %v128_v25  ;;  %v297_v37 = vsel %vm290_vm2, %v294_v15, %v296_v28  ;;  %v299_v38 = vsel %vm290_vm2, %v296_v28, %v298_v29  ;;  %1034 = vmatprep.subr.bf16.mxu0 %v5988_v61  ;;  %v5993_v19 = vld [vmem:[%s8427_s1 + $0x50] ss:$8 sps:$4 sm:$0xff]   ;;  %v5994_v24 = vld [vmem:[%s8427_s1 + $0x44] ss:$8 sps:$4 sm:$0xff]  }
  0x16   :  { %v466_v39 = vsel %vm459_vm1, %v463_v9, %v465_v30  ;;  %v5465_v40 = vpack.i.bf16 %v299_v38, %v297_v37  ;;  %v468_v41 = vsel %vm459_vm1, %v465_v30, %v467_v33  ;;  %v134_v43 = vrot.slane %v6346_v31, 1  ;;  %v54_v29 = vld [vmem:[%s8426_s0 + $0x68] sm:$0xff]  ;;  %v55_v30 = vld [vmem:[%s8426_s0 + $0x70] sm:$0xff] }
  0x17   :  { %v133_v42 = vsel %vm121_vm0, %v131_v34, %v132_v35  ;;  %v5470_v45 = vpack.i.bf16 %v468_v41, %v466_v39  ;;  %v300_v46 = vrot.slane %v46_v21, 2  ;;  %v301_v47 = vrot.slane %v47_v22, 2  ;;  %1035 = vmatpush1.bf16.msra.mxu0 %v5990_v5  ;;  %v5997_v39 = vld [vmem:[%s8427_s1 + $0x34] ss:$8 sps:$4 sm:$0xff]  }
  0x18   :  { %5451 = vrot.lane.b32.xlu0 %v5450_v27, %s6242_s27  ;;  %v303_v48 = vrot.slane %v6346_v31, 2  ;;  %5461 = vrot.lane.b32.xlu1 %v5460_v36, %s6244_s21  ;;  %v135_v50 = vsel %vm121_vm0, %v132_v35, %v134_v43  ;;  %v469_v51 = vrot.slane %v46_v21, 3  ;;  %v470_v52 = vrot.slane %v47_v22, 3  ;;  %v5996_v35 = vld [vmem:[%s8427_s1 + $0x40] ss:$8 sps:$4 sm:$0xff]  }
  0x19   :  { %v472_v53 = vrot.slane %v6346_v31, 3  ;;  %v302_v55 = vsel %vm290_vm2, %v300_v46, %v301_v47  ;;  %v136_v57 = vrot.slane %v49_v44, 1  ;;  %v5475_v59 = vpack.i.bf16 %v135_v50, %v133_v42  ;;  %1036 = vmatprep.subr.bf16.mxu0 %v5991_v12  ;;  %v57_v50 = vld [vmem:[%s8426_s0 + $0x80] sm:$0xff] }
  0x1a   :  { %v304_v56 = vsel %vm290_vm2, %v301_v47, %v303_v48  ;;  %v138_v60 = vrot.slane %v50_v49, 1  ;;  %v471_v63 = vsel %vm459_vm1, %v469_v51, %v470_v52  ;;  %v305_v4 = vrot.slane %v49_v44, 2  ;;  %v6446_v51 = vld [vmem:[%s8426_s0 + $0x88] sm:$0xff] }
  0x1b   :  { %v5480_v62 = vpack.i.bf16 %v304_v56, %v302_v55  ;;  %v473_v3 = vsel %vm459_vm1, %v470_v52, %v472_v53  ;;  %v137_v6 = vsel %vm121_vm0, %v134_v43, %v136_v57  ;;  %v307_v8 = vrot.slane %v50_v49, 2  ;;  %1037 = vmatpush1.bf16.msra.mxu0 %v5993_v19  ;;  %v5999_v52 = vld [vmem:[%s8427_s1 + $0x30] ss:$8 sps:$4 sm:$0xff]   ;;  %v6000_v56 = vld [vmem:[%s8427_s1 + $0x24] ss:$8 sps:$4 sm:$0xff]  }
  0x1c   :  { %5466 = vrot.lane.b32.xlu0 %v5465_v40, %s6242_s27  ;;  %5471 = vrot.lane.b32.xlu1 %v5470_v45, %s6245_s24  ;;  %v139_v7 = vsel %vm121_vm0, %v136_v57, %v138_v60  ;;  %v474_v9 = vrot.slane %v49_v44, 3  ;;  %v476_v13 = vrot.slane %v50_v49, 3  ;;  %v5485_v15 = vpack.i.bf16 %v473_v3, %v471_v63  ;;  %v56_v45 = vld [vmem:[%s8426_s0 + $0x78] sm:$0xff] }
  0x1d   :  { %v5490_v16 = vpack.i.bf16 %v139_v7, %v137_v6  ;;  %v306_v17 = vsel %vm290_vm2, %v303_v48, %v305_v4  ;;  %v140_v18 = vrot.slane %v51_v10, 1  ;;  %v308_v20 = vsel %vm290_vm2, %v305_v4, %v307_v8  ;;  %1038 = vmatprep.subr.bf16.mxu0 %v5994_v24  ;;  %v6003_v3 = vld [vmem:[%s8427_s1 + $0x14] ss:$8 sps:$4 sm:$0xff]   ;;  %v6006_v24 = vld [vmem:[%s8427_s1 + $0x4] ss:$8 sps:$4 sm:$0xff]  }
  0x1e   :  { %v475_v21 = vsel %vm459_vm1, %v472_v53, %v474_v9  ;;  %v141_v22 = vrot.slane %v52_v11, 1  ;;  %v143_v23 = vrot.slane %v6399_v14, 1  ;;  %v477_v25 = vsel %vm459_vm1, %v474_v9, %v476_v13  ;;  %v6470_v8 = vld [vmem:[%s8426_s0 + $0x90] sm:$0xff]  ;;  %v6475_v9 = vld [vmem:[%s8426_s0 + $0x98] sm:$0xff] }
  0x1f   :  { %v309_v26 = vrot.slane %v51_v10, 2  ;;  %v310_v27 = vrot.slane %v52_v11, 2  ;;  %v312_v28 = vrot.slane %v6399_v14, 2  ;;  %v5495_v31 = vpack.i.bf16 %v308_v20, %v306_v17  ;;  %1039 = vmatpush1.bf16.msra.mxu0 %v5996_v35  ;;  %v6513_v35 = vld [vmem:[%s8426_s0 + $0xb0] sm:$0xff] }
  0x20   :  { %5476 = vrot.lane.b32.xlu0 %v5475_v59, %s6244_s21  ;;  %5481 = vrot.lane.b32.xlu1 %v5480_v62, %s6242_s27  ;;  %v478_v32 = vrot.slane %v51_v10, 3  ;;  %v479_v33 = vrot.slane %v52_v11, 3  ;;  %v481_v34 = vrot.slane %v6399_v14, 3  ;;  %v5500_v36 = vpack.i.bf16 %v477_v25, %v475_v21  ;;  %v6002_v59 = vld [vmem:[%s8427_s1 + $0x20] ss:$8 sps:$4 sm:$0xff]  }
  0x21   :  { %v142_v37 = vsel %vm121_vm0, %v140_v18, %v141_v22  ;;  %v144_v38 = vsel %vm121_vm0, %v141_v22, %v143_v23  ;;  %v311_v40 = vsel %vm290_vm2, %v309_v26, %v310_v27  ;;  %v313_v41 = vsel %vm290_vm2, %v310_v27, %v312_v28  ;;  %1040 = vmatprep.subr.bf16.mxu0 %v5997_v39  ;;  %v6005_v14 = vld [vmem:[%s8427_s1 + $0x10] ss:$8 sps:$4 sm:$0xff]  }
  0x22   :  { %v145_v42 = vrot.slane %v54_v29, 1  ;;  %v147_v43 = vrot.slane %v55_v30, 1  ;;  %v314_v44 = vrot.slane %v54_v29, 2  ;;  %v5505_v46 = vpack.i.bf16 %v144_v38, %v142_v37 }
  0x23   :  { %v480_v47 = vsel %vm459_vm1, %v478_v32, %v479_v33  ;;  %v482_v48 = vsel %vm459_vm1, %v479_v33, %v481_v34  ;;  %v316_v49 = vrot.slane %v55_v30, 2  ;;  %v5510_v53 = vpack.i.bf16 %v313_v41, %v311_v40  ;;  %1041 = vmatpush1.bf16.msra.mxu0 %v5999_v52  ;;  %v6009_v40 = vld [vmem:[%s8427_s1 + $0x94] ss:$8 sps:$4 sm:$0xff]  }
  0x24   :  { %5486 = vrot.lane.b32.xlu0 %v5485_v15, %s6245_s24  ;;  %5491 = vrot.lane.b32.xlu1 %v5490_v16, %s6244_s21  ;;  %v483_v54 = vrot.slane %v54_v29, 3  ;;  %v485_v55 = vrot.slane %v55_v30, 3  ;;  %v146_v57 = vsel %vm121_vm0, %v143_v23, %v145_v42  ;;  %v148_v58 = vsel %vm121_vm0, %v145_v42, %v147_v43  ;;  %v61_v29 = vld [vmem:[%s8426_s0 + $0xa0] sm:$0xff]  ;;  %v6011_v42 = vld [vmem:[%s8427_s1 + $0x90] ss:$8 sps:$4 sm:$0xff]  }
  0x25   :  { %v5515_v60 = vpack.i.bf16 %v482_v48, %v480_v47  ;;  %v315_v61 = vsel %vm290_vm2, %v312_v28, %v314_v44  ;;  %v149_v62 = vrot.slane %v56_v45, 1  ;;  %v150_v63 = vrot.slane %v57_v50, 1  ;;  %1042 = vmatprep.subr.bf16.mxu0 %v6000_v56  ;;  %v6008_v28 = vld [vmem:[%s8427_s1] ss:$8 sps:$4 sm:$0xff]  }
  0x26   :  { %v317_v4 = vsel %vm290_vm2, %v314_v44, %v316_v49  ;;  %v152_v5 = vrot.slane %v6446_v51, 1  ;;  %v318_v6 = vrot.slane %v56_v45, 2  ;;  %v319_v7 = vrot.slane %v57_v50, 2  ;;  %v6012_v44 = vld [vmem:[%s8427_s1 + $0x84] ss:$8 sps:$4 sm:$0xff]  }
  0x27   :  { %v5520_v10 = vpack.i.bf16 %v148_v58, %v146_v57  ;;  %v484_v11 = vsel %vm459_vm1, %v481_v34, %v483_v54  ;;  %v486_v12 = vsel %vm459_vm1, %v483_v54, %v485_v55  ;;  %v321_v13 = vrot.slane %v6446_v51, 2  ;;  %1043 = vmatpush1.bf16.msra.mxu0 %v6002_v59  ;;  %v62_v34 = vld [vmem:[%s8426_s0 + $0xa8] sm:$0xff]  ;;  %v65_v54 = vld [vmem:[%s8426_s0 + $0xc0] sm:$0xff] }
  0x28   :  { %5496 = vrot.lane.b32.xlu0 %v5495_v31, %s6242_s27  ;;  %5501 = vrot.lane.b32.xlu1 %v5500_v36, %s6245_s24  ;;  %v5525_v15 = vpack.i.bf16 %v317_v4, %v315_v61  ;;  %v5530_v16 = vpack.i.bf16 %v486_v12, %v484_v11  ;;  %v487_v17 = vrot.slane %v56_v45, 3  ;;  %v488_v18 = vrot.slane %v57_v50, 3  ;;  %v6014_v59 = vld [vmem:[%s8427_s1 + $0x80] ss:$8 sps:$4 sm:$0xff]   ;;  %v67_v11 = vld [vmem:[%s8426_s0 + $0xd0] sm:$0xff]  ;;  %s6250_s1 = smov 80  }
  0x29   :  { %v490_v19 = vrot.slane %v6446_v51, 3  ;;  %v151_v20 = vsel %vm121_vm0, %v149_v62, %v150_v63  ;;  %v153_v21 = vsel %vm121_vm0, %v150_v63, %v152_v5  ;;  %v154_v22 = vrot.slane %v6470_v8, 1  ;;  %1044 = vmatprep.subr.bf16.mxu0 %v6003_v3 }
  0x2a   :  { %v156_v23 = vrot.slane %v6475_v9, 1  ;;  %v320_v25 = vsel %vm290_vm2, %v318_v6, %v319_v7  ;;  %v322_v26 = vsel %vm290_vm2, %v319_v7, %v321_v13  ;;  %v323_v27 = vrot.slane %v6470_v8, 2 }
  0x2b   :  { %v5535_v30 = vpack.i.bf16 %v153_v21, %v151_v20  ;;  %v489_v31 = vsel %vm459_vm1, %v487_v17, %v488_v18  ;;  %v491_v32 = vsel %vm459_vm1, %v488_v18, %v490_v19  ;;  %v325_v33 = vrot.slane %v6475_v9, 2  ;;  %1045 = vmatpush1.bf16.msra.mxu0 %v6005_v14  ;;  %v68_v18 = vld [vmem:[%s8426_s0 + $0xd8] sm:$0xff] }
  0x2c   :  { %5506 = vrot.lane.b32.xlu0 %v5505_v46, %s6244_s21  ;;  %5511 = vrot.lane.b32.xlu1 %v5510_v53, %s6242_s27  ;;  %v5540_v36 = vpack.i.bf16 %v322_v26, %v320_v25  ;;  %v155_v37 = vsel %vm121_vm0, %v152_v5, %v154_v22  ;;  %v157_v38 = vsel %vm121_vm0, %v154_v22, %v156_v23  ;;  %v492_v39 = vrot.slane %v6470_v8, 3  ;;  %v64_v53 = vld [vmem:[%s8426_s0 + $0xb8] sm:$0xff]  ;;  %v70_v25 = vld [vmem:[%s8426_s0 + $0xe8] sm:$0xff] }
  0x2d   :  { %1046 = vmatprep.subr.bf16.mxu0 %v6006_v24  ;;  %v494_v41 = vrot.slane %v6475_v9, 3  ;;  %v5545_v43 = vpack.i.bf16 %v491_v32, %v489_v31  ;;  %v5550_v45 = vpack.i.bf16 %v157_v38, %v155_v37  ;;  %v324_v46 = vsel %vm290_vm2, %v321_v13, %v323_v27  ;;  %v66_v9 = vld [vmem:[%s8426_s0 + $0xc8] sm:$0xff]  ;;  %v69_v24 = vld [vmem:[%s8426_s0 + $0xe0] sm:$0xff] }
  0x2e   :  { %v326_v47 = vsel %vm290_vm2, %v323_v27, %v325_v33  ;;  %v158_v48 = vrot.slane %v61_v29, 1  ;;  %v493_v49 = vsel %vm459_vm1, %v490_v19, %v492_v39  ;;  %v159_v50 = vrot.slane %v62_v34, 1 }
  0x2f   :  { %1047 = vmatpush1.bf16.msra.mxu0 %v6008_v28  ;;  %v161_v51 = vrot.slane %v6513_v35, 1  ;;  %v327_v52 = vrot.slane %v61_v29, 2  ;;  %v495_v55 = vsel %vm459_vm1, %v492_v39, %v494_v41  ;;  %v328_v56 = vrot.slane %v62_v34, 2 }
  0x30   :  { %5516 = vrot.lane.b32.xlu0 %v5515_v60, %s6245_s24  ;;  %5521 = vrot.lane.b32.xlu1 %v5520_v10, %s6244_s21  ;;  %v330_v57 = vrot.slane %v6513_v35, 2  ;;  %v496_v58 = vrot.slane %v61_v29, 3  ;;  %v497_v60 = vrot.slane %v62_v34, 3  ;;  %v5555_v61 = vpack.i.bf16 %v326_v47, %v324_v46 }
  0x31   :  { %1060 = vmatprep.subr.bf16.mxu0 %v6009_v40  ;;  %v499_v62 = vrot.slane %v6513_v35, 3  ;;  %v5560_v63 = vpack.i.bf16 %v495_v55, %v493_v49  ;;  %v160_v3 = vsel %vm121_vm0, %v158_v48, %v159_v50  ;;  %v162_v4 = vsel %vm121_vm0, %v159_v50, %v161_v51 }
  0x32   :  { %v329_v5 = vsel %vm290_vm2, %v327_v52, %v328_v56  ;;  %v331_v6 = vsel %vm290_vm2, %v328_v56, %v330_v57  ;;  %v163_v7 = vrot.slane %v64_v53, 1  ;;  %v165_v8 = vrot.slane %v65_v54, 1  ;;  %v6602_v56 = vld [vmem:[%s8426_s0 + $0x100] sm:$0xff] }
  0x33   :  { %1061 = vmatpush2.bf16.msra.mxu0 %v6011_v42  ;;  %v332_v10 = vrot.slane %v64_v53, 2  ;;  %v5565_v12 = vpack.i.bf16 %v162_v4, %v160_v3  ;;  %v498_v13 = vsel %vm459_vm1, %v496_v58, %v497_v60  ;;  %v500_v14 = vsel %vm459_vm1, %v497_v60, %v499_v62 }
  0x34   :  { %5526 = vrot.lane.b32.xlu0 %v5525_v15, %s6242_s27  ;;  %5531 = vrot.lane.b32.xlu1 %v5530_v16, %s6245_s24  ;;  %v334_v15 = vrot.slane %v65_v54, 2  ;;  %v5570_v16 = vpack.i.bf16 %v331_v6, %v329_v5  ;;  %v501_v17 = vrot.slane %v64_v53, 3  ;;  %v164_v19 = vsel %vm121_vm0, %v161_v51, %v163_v7  ;;  %v72_v51 = vld [vmem:[%s8426_s0 + $0xf8] sm:$0xff] }
  0x35   :  { %1062 = vmatprep.subr.bf16.mxu0 %v6012_v44  ;;  %v166_v20 = vsel %vm121_vm0, %v163_v7, %v165_v8  ;;  %v503_v21 = vrot.slane %v65_v54, 3  ;;  %v5575_v22 = vpack.i.bf16 %v500_v14, %v498_v13  ;;  %v167_v23 = vrot.slane %v66_v9, 1  ;;  %v74_v8 = vld [vmem:[%s8426_s0 + $0x108] sm:$0xff]  ;;  %v75_v14 = vld [vmem:[%s8426_s0 + $0x110] sm:$0xff] }
  0x36   :  { %v333_v26 = vsel %vm290_vm2, %v330_v57, %v332_v10  ;;  %v335_v27 = vsel %vm290_vm2, %v332_v10, %v334_v15  ;;  %v168_v28 = vrot.slane %v67_v11, 1  ;;  %v170_v29 = vrot.slane %v68_v18, 1 }
  0x37   :  { %1063 = vmatpush2.bf16.msra.mxu0 %v6014_v59  ;;  %v502_v31 = vsel %vm459_vm1, %v499_v62, %v501_v17  ;;  %v504_v32 = vsel %vm459_vm1, %v501_v17, %v503_v21  ;;  %v336_v33 = vrot.slane %v66_v9, 2  ;;  %v337_v34 = vrot.slane %v67_v11, 2 }
  0x38   :  { %5536 = vrot.lane.b32.xlu0 %v5535_v30, %s6244_s21  ;;  %5541 = vrot.lane.b32.xlu1 %v5540_v36, %s6242_s27  ;;  %v5580_v30 = vpack.i.bf16 %v166_v20, %v164_v19  ;;  %v339_v35 = vrot.slane %v68_v18, 2  ;;  %v5585_v36 = vpack.i.bf16 %v335_v27, %v333_v26  ;;  %v505_v37 = vrot.slane %v66_v9, 3 }
  0x39   :  { %v506_v38 = vrot.slane %v67_v11, 3  ;;  %v508_v39 = vrot.slane %v68_v18, 3  ;;  %v169_v40 = vsel %vm121_vm0, %v167_v23, %v168_v28  ;;  %v171_v41 = vsel %vm121_vm0, %v168_v28, %v170_v29  ;;  %v76_v28 = vld [vmem:[%s8426_s0 + $0x118] sm:$0xff] }
  0x3a   :  { %v172_v42 = vrot.slane %v69_v24, 1  ;;  %v5590_v44 = vpack.i.bf16 %v504_v32, %v502_v31  ;;  %v338_v46 = vsel %vm290_vm2, %v336_v33, %v337_v34  ;;  %v340_v47 = vsel %vm290_vm2, %v337_v34, %v339_v35  ;;  %v77_v31 = vld [vmem:[%s8426_s0 + $0x120] sm:$0xff]  ;;  %v6646_v32 = vld [vmem:[%s8426_s0 + $0x128] sm:$0xff] }
  0x3b   :  { %v5595_v48 = vpack.i.bf16 %v171_v41, %v169_v40  ;;  %v507_v49 = vsel %vm459_vm1, %v505_v37, %v506_v38  ;;  %v509_v50 = vsel %vm459_vm1, %v506_v38, %v508_v39  ;;  %v341_v54 = vrot.slane %v69_v24, 2 }
  0x3c   :  { %5546 = vrot.lane.b32.xlu0 %v5545_v43, %s6245_s24  ;;  %5551 = vrot.lane.b32.xlu1 %v5550_v45, %s6244_s21  ;;  %v174_v43 = vrot.slane %v70_v25, 1  ;;  %v6587_v45 = vld [vmem:[%s8426_s0 + $0xf0] sm:$0xff]  ;;  %v173_v52 = vsel %vm121_vm0, %v170_v29, %v172_v42  ;;  %v343_v55 = vrot.slane %v70_v25, 2  ;;  %v5600_v57 = vpack.i.bf16 %v340_v47, %v338_v46 }
  0x3d   :  { %v510_v58 = vrot.slane %v69_v24, 3  ;;  %vm733_vm3 = vcmask 261120   ;;  %vm628_vm4 = vcmask 1043456   ;;  %v512_v59 = vrot.slane %v70_v25, 3 }
  0x3e   :  { %v175_v53 = vsel %vm121_vm0, %v172_v42, %v174_v43  ;;  %v176_v60 = vrot.slane %v6587_v45, 1  ;;  %v344_v3 = vsel %vm290_vm2, %v341_v54, %v343_v55  ;;  %v177_v4 = vrot.slane %v72_v51, 1  ;;  %v79_v43 = vld [vmem:[%s8426_s0 + $0x130] sm:$0xff] }
  0x3f   :  { %v5610_v62 = vpack.i.bf16 %v175_v53, %v173_v52  ;;  %v629_v5 = vrot.slane %v6302_v0, 4  ;;  %v511_v6 = vsel %vm459_vm1, %v508_v39, %v510_v58  ;;  %v179_v7 = vrot.slane %v6602_v56, 1 }
  0x40   :  { %5556 = vrot.lane.b32.xlu0 %v5555_v61, %s6242_s27  ;;  %5561 = vrot.lane.b32.xlu1 %v5560_v63, %s6245_s24  ;;  %v5605_v61 = vpack.i.bf16 %v509_v50, %v507_v49  ;;  %v342_v63 = vsel %vm290_vm2, %v339_v35, %v341_v54  ;;  %v630_v9 = vrot.slane %v6307_v1, 4  ;;  %v632_v10 = vrot.slane %v6312_v2, 4  ;;  %v6181_v2 = vld [vmem:[%s8426_s0 + $0x8] sm:$0xff] }
  0x41   :  { %v513_v11 = vsel %vm459_vm1, %v510_v58, %v512_v59  ;;  %v346_v13 = vrot.slane %v72_v51, 2  ;;  %v348_v0 = vrot.slane %v6602_v56, 2  ;;  %v514_v15 = vrot.slane %v6587_v45, 3 }
  0x42   :  { %v631_v17 = vsel %vm628_vm4, %v629_v5, %v630_v9  ;;  %v633_v1 = vsel %vm628_vm4, %v630_v9, %v632_v10  ;;  %v5615_v18 = vpack.i.bf16 %v344_v3, %v342_v63  ;;  %v5620_v20 = vpack.i.bf16 %v513_v11, %v511_v6 }
  0x43   :  { %v833_v19 = vpack.c.bf16 %v633_v1, %v631_v17  ;;  %v178_v21 = vsel %vm121_vm0, %v176_v60, %v177_v4  ;;  %v517_v23 = vrot.slane %v6602_v56, 3  ;;  %v349_v25 = vsel %vm290_vm2, %v346_v13, %v348_v0 }
  0x44   :  { %5566 = vrot.lane.b32.xlu0 %v5565_v12, %s6244_s21  ;;  %5571 = vrot.lane.b32.xlu1 %v5570_v16, %s6242_s27  ;;  %v345_v12 = vrot.slane %v6587_v45, 2  ;;  %v515_v16 = vrot.slane %v72_v51, 3  ;;  %v181_v26 = vrot.slane %v74_v8, 1  ;;  %v183_v27 = vrot.slane %v75_v14, 1 }
  0x45   :  { %5099 = vmatprep.mubr.msk.bf16.mxu0 %vm733_vm3, %v833_v19  ;;  %v350_v29 = vrot.slane %v74_v8, 2  ;;  %v519_v37 = vrot.slane %v74_v8, 3  ;;  %v521_v38 = vrot.slane %v75_v14, 3  ;;  %v185_v41 = vrot.slane %v76_v28, 1 }
  0x46   :  { %v347_v24 = vsel %vm290_vm2, %v345_v12, %v346_v13  ;;  %v516_v34 = vsel %vm459_vm1, %v514_v15, %v515_v16  ;;  %v182_v39 = vsel %vm121_vm0, %v179_v7, %v181_v26  ;;  %v184_v40 = vsel %vm121_vm0, %v181_v26, %v183_v27  ;;  %v6179_v26 = vld [vmem:[%s8426_s0 + $0x20] sm:$0xff] }
  0x47   :  { %v5630_v35 = vpack.i.bf16 %v349_v25, %v347_v24  ;;  %v186_v42 = vrot.slane %v77_v31, 1  ;;  %v188_v45 = vrot.slane %v6646_v32, 1  ;;  %v354_v46 = vrot.slane %v76_v28, 2  ;;  %v6178_v24 = vld [vmem:[%s8426_s0 + $0x18] sm:$0xff] }
  0x48   :  { %5576 = vrot.lane.b32.xlu0 %v5575_v22, %s6245_s24  ;;  %5581 = vrot.lane.b32.xlu1 %v5580_v30, %s6244_s21  ;;  %v180_v22 = vsel %vm121_vm0, %v177_v4, %v179_v7  ;;  %v352_v30 = vrot.slane %v75_v14, 2  ;;  %v355_v47 = vrot.slane %v77_v31, 2  ;;  %v351_v50 = vsel %vm290_vm2, %v348_v0, %v350_v29 }
  0x49   :  { %v5625_v33 = vpack.i.bf16 %v180_v22, %v178_v21  ;;  %v523_v51 = vrot.slane %v76_v28, 3  ;;  %v524_v52 = vrot.slane %v77_v31, 3  ;;  %v5640_v53 = vpack.i.bf16 %v184_v40, %v182_v39  ;;  %v6180_v40 = vld [vmem:[%s8426_s0 + $0x28] sm:$0xff] }
  0x4a   :  { %v353_v54 = vsel %vm290_vm2, %v350_v29, %v352_v30  ;;  %v520_v55 = vsel %vm459_vm1, %v517_v23, %v519_v37  ;;  %v522_v56 = vsel %vm459_vm1, %v519_v37, %v521_v38  ;;  %v190_v58 = vrot.slane %v79_v43, 1 }
  0x4b   :  { %v6246_v60 = vmov 0   ;;  %v187_v63 = vsel %vm121_vm0, %v185_v41, %v186_v42  ;;  %v189_v3 = vsel %vm121_vm0, %v186_v42, %v188_v45  ;;  %v359_v4 = vrot.slane %v79_v43, 2  ;;  %v6182_v42 = vld [vmem:[%s8426_s0] sm:$0xff] }
  0x4c   :  { %5586 = vrot.lane.b32.xlu0 %v5585_v36, %s6242_s27  ;;  %5591 = vrot.lane.b32.xlu1 %v5590_v44, %s6245_s24  ;;  %v518_v36 = vsel %vm459_vm1, %v515_v16, %v517_v23  ;;  %v80_v44 = vld [vmem:[%s8426_s0 + $0x138] sm:$0xff]  ;;  %v528_v6 = vrot.slane %v79_v43, 3  ;;  %v356_v8 = vsel %vm290_vm2, %v354_v46, %v355_v47  ;;  %v5655_v11 = vpack.i.bf16 %v189_v3, %v187_v63  ;;  %v6024_v46 = vld [vmem:[%s8428_s2 + $0x30] sm:$0xff]  }
  0x4d   :  { %v5635_v49 = vpack.i.bf16 %v518_v36, %v516_v34  ;;  %v192_v59 = vrot.slane %v80_v44, 1  ;;  %1642 = vmatprep.subr.bf16.mxu0 %v6246_v60  ;;  %1393 = vmatprep.subr.bf16.mxu1 %v6246_v60  ;;  %v361_v5 = vrot.slane %v80_v44, 2  ;;  %v530_v7 = vrot.slane %v80_v44, 3  ;;  %v6023_v36 = vld [vmem:[%s8428_s2 + $0x38] sm:$0xff]  }
  0x4e   :  { %v525_v13 = vsel %vm459_vm1, %v523_v51, %v524_v52  ;;  %v191_v14 = vsel %vm121_vm0, %v188_v45, %v190_v58  ;;  %v634_v25 = vrot.slane %v6178_v24, 4  ;;  %v636_v27 = vrot.slane %v6179_v26, 4  ;;  %1394 = vmatpush1.bf16.msra.mxu1 %v6023_v36  ;;  %v6739_v3 = vld [vmem:[%s8426_s0 + $0x38] sm:$0xff] }
  0x4f   :  { %v193_v15 = vsel %vm121_vm0, %v190_v58, %v192_v59  ;;  %vm766_vm5 = vcmask 523264   ;;  %vm799_vm6 = vcmask 785408   ;;  %v638_v41 = vrot.slane %v6180_v40, 4  ;;  %1395 = vmatprep.subr.bf16.mxu1 %v6246_v60  ;;  %v6015_v58 = vld [vmem:[%s8428_s2 + $0x8c] sm:$0xff]  }
  0x50   :  { %5596 = vrot.lane.b32.xlu0 %v5595_v48, %s6244_s21  ;;  %5601 = vrot.lane.b32.xlu1 %v5600_v57, %s6242_s27  ;;  %v357_v48 = vrot.slane %v6646_v32, 2  ;;  %v526_v57 = vrot.slane %v6646_v32, 3  ;;  %v5670_v17 = vpack.i.bf16 %v193_v15, %v191_v14  ;;  %v635_v34 = vsel %vm628_vm4, %v632_v10, %v634_v25 }
  0x51   :  { %vm1341_vm7 = vcmask 326656   ;;  %vm2420_vm8 = vcmask 1041408   ;;  %vm2657_vm9 = vcmask 687104   ;;  %vm2755_vm10 = vcmask 654336  }
  0x52   :  { %v358_v9 = vsel %vm290_vm2, %v355_v47, %v357_v48  ;;  %v527_v0 = vsel %vm459_vm1, %v524_v52, %v526_v57  ;;  %v360_v1 = vsel %vm290_vm2, %v357_v48, %v359_v4  ;;  %v529_v19 = vsel %vm459_vm1, %v526_v57, %v528_v6  ;;  %1396 = vmatpush1.bf16.msra.mxu1 %v6024_v46 }
  0x53   :  { %v5660_v12 = vpack.i.bf16 %v358_v9, %v356_v8  ;;  %v5665_v16 = vpack.i.bf16 %v527_v0, %v525_v13  ;;  %1397 = vmatprep.subr.bf16.mxu1 %v6246_v60  ;;  %vm2722_vm11 = vcmask 1014784   ;;  %vm3170_vm12 = vcmask 293888  }
  0x54   :  { %5606 = vrot.lane.b32.xlu0 %v5605_v61, %s6245_s24  ;;  %5611 = vrot.lane.b32.xlu1 %v5610_v62, %s6244_s21  ;;  %v5645_v61 = vpack.i.bf16 %v353_v54, %v351_v50  ;;  %v5650_v62 = vpack.i.bf16 %v522_v56, %v520_v55  ;;  %v6183_v50 = vld [vmem:[%s8426_s0 + $0x30] sm:$0xff]  ;;  %vm4448_vm13 = vcmask 1041409   ;;  %vm4451_vm14 = vcmask 1042434  }
  0x55   :  { %v639_v51 = vrot.slane %v6183_v50, 4  ;;  %vm4454_vm15 = vcmask 1043459  }
  0x57   :  { %v640_v15 = vsel %vm628_vm4, %v638_v41, %v639_v51 }
  0x58   :  { %5616 = vrot.lane.b32.xlu0 %v5615_v18, %s6242_s27  ;;  %5621 = vrot.lane.b32.xlu1 %v5620_v20, %s6245_s24  ;;  %v362_v18 = vsel %vm290_vm2, %v359_v4, %v361_v5  ;;  %v531_v20 = vsel %vm459_vm1, %v528_v6, %v530_v7  ;;  %v641_v4 = vrot.slane %v6739_v3, 4  ;;  %v6025_v7 = vld [vmem:[%s8428_s2 + $0x28] sm:$0xff]   ;;  %vm4460_vm1 = vcmask 1045509  }
  0x59   :  { %v5675_v21 = vpack.i.bf16 %v362_v18, %v360_v1  ;;  %v5680_v22 = vpack.i.bf16 %v531_v20, %v529_v19  ;;  %1398 = vmatpush1.bf16.msra.mxu1 %v6025_v7  ;;  %v6027_v18 = vld [vmem:[%s8428_s2 + $0x20] sm:$0xff]  }
  0x5a   :  { %1399 = vmatprep.subr.bf16.mxu1 %v6246_v60  ;;  %v6020_v7 = vld [vmem:[%s8428_s2 + $0x64] sm:$0xff]  }
  0x5c   :  { %5626 = vrot.lane.b32.xlu0 %v5625_v33, %s6244_s21  ;;  %5631 = vrot.lane.b32.xlu1 %v5630_v35, %s6242_s27  ;;  %v637_v35 = vsel %vm628_vm4, %v634_v25, %v636_v27  ;;  %v6017_v25 = vld [vmem:[%s8428_s2 + $0x7c] sm:$0xff]  }
  0x5d   :  { %1400 = vmatpush1.bf16.msra.mxu1 %v6027_v18 }
  0x5e   :  { %1401 = vmatprep.subr.bf16.mxu1 %v6246_v60 }
  0x60   :  { %5636 = vrot.lane.b32.xlu0 %v5635_v49, %s6245_s24  ;;  %5641 = vrot.lane.b32.xlu1 %v5640_v53, %s6244_s21  ;;  %v835_v49 = vpack.c.bf16 %v637_v35, %v635_v34  ;;  %v6184_v53 = vld [vmem:[%s8426_s0 + $0x10] sm:$0xff]  ;;  %v6028_v34 = vld [vmem:[%s8428_s2 + $0x18] sm:$0xff]  }
  0x61   :  { %1402 = vmatpush1.bf16.msra.mxu1 %v6028_v34  ;;  %v6022_v34 = vld [vmem:[%s8428_s2 + $0x54] sm:$0xff]  }
  0x62   :  { %1403 = vmatprep.subr.bf16.mxu1 %v6246_v60 }
  0x64   :  { %5646 = vrot.lane.b32.xlu0 %v5645_v61, %s6242_s27  ;;  %5651 = vrot.lane.b32.xlu1 %v5650_v62, %s6245_s24 }
  0x68   :  { %5656 = vrot.lane.b32.xlu0 %v5655_v11, %s6244_s21  ;;  %5661 = vrot.lane.b32.xlu1 %v5660_v12, %s6242_s27  ;;  %v6016_v12 = vld [vmem:[%s8428_s2 + $0x84] sm:$0xff]  }
  0x6c   :  { %5666 = vrot.lane.b32.xlu0 %v5665_v16, %s6245_s24  ;;  %5671 = vrot.lane.b32.xlu1 %v5670_v17, %s6244_s21  ;;  %v642_v16 = vsel %vm628_vm4, %v639_v51, %v641_v4 }
  0x70   :  { %5676 = vrot.lane.b32.xlu0 %v5675_v21, %s6242_s27  ;;  %5681 = vrot.lane.b32.xlu1 %v5680_v22, %s6245_s24 }
  0x86   :  { %v5447_v23 = vpop.permute.xlu0 %5446  ;;  %v5457_v28 = vpop.permute.xlu1 %5456 }
  0x87   :  { %v5449_v29 = vunpack.i.h.bf16 %v5447_v23  ;;  %v5448_v30 = vunpack.i.l.bf16 %v5447_v23  ;;  %v5459_v31 = vunpack.i.h.bf16 %v5457_v28  ;;  %v5458_v32 = vunpack.i.l.bf16 %v5457_v28  ;;  %v6186_v28 = vld [vmem:[%s8426_s0 + $0x40] sm:$0xff] }
  0x89   :  { %v735_v10 = vsel %vm733_vm3, %v6181_v2, %v5449_v29  ;;  %v734_v43 = vsel %vm733_vm3, %v6182_v42, %v5448_v30  ;;  %v643_v29 = vrot.slane %v6186_v28, 4  ;;  %v6187_v30 = vld [vmem:[%s8426_s0 + $0x48] sm:$0xff] }
  0x8a   :  { %v5452_v33 = vpop.permute.xlu0 %5451  ;;  %v5462_v39 = vpop.permute.xlu1 %5461 }
  0x8b   :  { %v5454_v37 = vunpack.i.h.bf16 %v5452_v33  ;;  %v5453_v38 = vunpack.i.l.bf16 %v5452_v33  ;;  %v5464_v44 = vunpack.i.h.bf16 %v5462_v39  ;;  %v5463_v45 = vunpack.i.l.bf16 %v5462_v39 }
  0x8c   :  { %v644_v41 = vsel %vm628_vm4, %v641_v4, %v643_v29 }
  0x8d   :  { %v767_v47 = vsel %vm766_vm5, %v734_v43, %v5453_v38  ;;  %v768_v48 = vsel %vm766_vm5, %v735_v10, %v5454_v37  ;;  %v737_v52 = vsel %vm733_vm3, %v6178_v24, %v5464_v44  ;;  %v736_v54 = vsel %vm733_vm3, %v6184_v53, %v5463_v45  ;;  %v6029_v43 = vld [vmem:[%s8428_s2 + $0x10] sm:$0xff]  }
  0x8e   :  { %v5467_v55 = vpop.permute.xlu0 %5466  ;;  %v800_v56 = vsel %vm799_vm6, %v767_v47, %v5458_v32  ;;  %v801_v57 = vsel %vm799_vm6, %v768_v48, %v5459_v31  ;;  %v5472_v62 = vpop.permute.xlu1 %5471  ;;  %v837_v24 = vpack.c.bf16 %v642_v16, %v640_v15  ;;  %v645_v31 = vrot.slane %v6187_v30, 4  ;;  %v6188_v53 = vld [vmem:[%s8426_s0 + $0x50] sm:$0xff]  ;;  %1404 = vmatpush1.bf16.msra.mxu1 %v6029_v43 }
  0x8f   :  { %v5469_v59 = vunpack.i.h.bf16 %v5467_v55  ;;  %v5468_v61 = vunpack.i.l.bf16 %v5467_v55  ;;  %v832_v63 = vpack.c.bf16 %v801_v57, %v800_v56  ;;  %v5474_v5 = vunpack.i.h.bf16 %v5472_v62  ;;  %v6189_v55 = vld [vmem:[%s8426_s0 + $0x58] sm:$0xff]  ;;  %v6807_v57 = vld [vmem:[%s8426_s0 + $0x60] sm:$0xff]  ;;  %1405 = vmatprep.subr.bf16.mxu1 %v6246_v60  ;;  %v6033_v16 = vld [vmem:[%s8428_s2 + $0x50] ss:$0 sps:$4 sm:$0xff]  }
  0x90   :  { %v5473_v6 = vunpack.i.l.bf16 %v5472_v62  ;;  %v646_v2 = vsel %vm628_vm4, %v643_v29, %v645_v31  ;;  %v648_v56 = vrot.slane %v6189_v55, 4  ;;  %v6031_v62 = vld [vmem:[%s8428_s2 + $0x8] sm:$0xff]   ;;  %v1391_v31 = vsel %vm628_vm4, %v6033_v16, 0  ;;  %v6197_v16 = vld [vmem:[%s8426_s0 + $0x98] sm:$0xff] }
  0x91   :  { %1065 = vmatmul.mubr.bf16.vlgmr.msra.gmra.mxu0 %v832_v63  ;;  %v769_v8 = vsel %vm766_vm5, %v736_v54, %v5468_v61  ;;  %v770_v9 = vsel %vm766_vm5, %v737_v52, %v5469_v59  ;;  %v647_v54 = vrot.slane %v6188_v53, 4 }
  0x92   :  { %v5477_v11 = vpop.permute.xlu0 %5476  ;;  %5100 = vmatprep.mubr.msk.bf16.mxu0 %vm733_vm3, %v835_v49  ;;  %1643 = vmatpush1.bf16.msra.mxu0 %v6015_v58  ;;  %v5482_v14 = vpop.permute.xlu1 %5481  ;;  %v802_v17 = vsel %vm799_vm6, %v769_v8, %v5473_v6  ;;  %v803_v1 = vsel %vm799_vm6, %v770_v9, %v5474_v5  ;;  %v839_v49 = vpack.c.bf16 %v646_v2, %v644_v41  ;;  %v650_v58 = vrot.slane %v6807_v57, 4 }
  0x93   :  { %v5479_v13 = vunpack.i.h.bf16 %v5477_v11  ;;  %v5478_v0 = vunpack.i.l.bf16 %v5477_v11  ;;  %1644 = vmatprep.subr.bf16.mxu0 %v6246_v60  ;;  %v5484_v19 = vunpack.i.h.bf16 %v5482_v14  ;;  %v5483_v20 = vunpack.i.l.bf16 %v5482_v14  ;;  %1406 = vmatpush1.bf16.msra.mxu1 %v6031_v62 }
  0x94   :  { %v834_v26 = vpack.c.bf16 %v803_v1, %v802_v17  ;;  %v649_v8 = vsel %vm628_vm4, %v647_v54, %v648_v56  ;;  %v651_v9 = vsel %vm628_vm4, %v648_v56, %v650_v58  ;;  %1407 = vmatprep.subr.bf16.mxu1 %v6246_v60 }
  0x95   :  { %v739_v21 = vsel %vm733_vm3, %v6183_v50, %v5479_v13  ;;  %v738_v22 = vsel %vm733_vm3, %v6180_v40, %v5478_v0  ;;  %v6018_v40 = vld [vmem:[%s8428_s2 + $0x74] sm:$0xff]   ;;  %v6019_v50 = vld [vmem:[%s8428_s2 + $0x6c] sm:$0xff]   ;;  %v6032_v13 = vld [vmem:[%s8428_s2] sm:$0xff]   ;;  %v841_v18 = vpack.c.bf16 %v651_v9, %v649_v8 }
  0x96   :  { %v5487_v23 = vpop.permute.xlu0 %5486  ;;  %1645 = vmatpush1.bf16.msra.mxu0 %v6016_v12  ;;  %v5492_v27 = vpop.permute.xlu1 %5491  ;;  %v771_v35 = vsel %vm766_vm5, %v738_v22, %v5483_v20  ;;  %v772_v36 = vsel %vm766_vm5, %v739_v21, %v5484_v19  ;;  %v6021_v19 = vld [vmem:[%s8428_s2 + $0x5c] sm:$0xff]   ;;  %v6191_v22 = vld [vmem:[%s8426_s0 + $0x68] sm:$0xff] }
  0x97   :  { %1646 = vmatprep.subr.bf16.mxu0 %v6246_v60  ;;  %v5489_v32 = vunpack.i.h.bf16 %v5487_v23  ;;  %v5488_v33 = vunpack.i.l.bf16 %v5487_v23  ;;  %v5494_v37 = vunpack.i.h.bf16 %v5492_v27  ;;  %v5493_v38 = vunpack.i.l.bf16 %v5492_v27  ;;  %1408 = vmatpush1.bf16.msra.mxu1 %v6032_v13 }
  0x98   :  { %v652_v23 = vrot.slane %v6191_v22, 4  ;;  %1419 = vmatprep.subr.bf16.mxu1 %v6246_v60 }
  0x99   :  { %1075 = vmatmul.mubr.bf16.gmra.mxu0 %v834_v26  ;;  %v804_v10 = vsel %vm799_vm6, %v771_v35, %v5488_v33  ;;  %v805_v42 = vsel %vm799_vm6, %v772_v36, %v5489_v32  ;;  %v741_v47 = vsel %vm733_vm3, %v6186_v28, %v5494_v37  ;;  %v740_v48 = vsel %vm733_vm3, %v6739_v3, %v5493_v38  ;;  %v6026_v37 = vld [vmem:[%s8428_s2 + $0xa4] ss:$0 sps:$4 sm:$0xff]  }
  0x9a   :  { %v5497_v39 = vpop.permute.xlu0 %5496  ;;  %5101 = vmatprep.mubr.msk.bf16.mxu0 %vm733_vm3, %v837_v24  ;;  %1647 = vmatpush1.bf16.msra.mxu0 %v6017_v25  ;;  %v5502_v46 = vpop.permute.xlu1 %5501  ;;  %v836_v51 = vpack.c.bf16 %v805_v42, %v804_v10  ;;  %v6192_v24 = vld [vmem:[%s8426_s0 + $0x70] sm:$0xff]  ;;  %v653_v35 = vsel %vm628_vm4, %v650_v58, %v652_v23 }
  0x9b   :  { %1648 = vmatprep.subr.bf16.mxu0 %v6246_v60  ;;  %v5499_v44 = vunpack.i.h.bf16 %v5497_v39  ;;  %v5498_v45 = vunpack.i.l.bf16 %v5497_v39  ;;  %v5504_v59 = vunpack.i.h.bf16 %v5502_v46  ;;  %v5503_v61 = vunpack.i.l.bf16 %v5502_v46  ;;  %1420 = vmatpush2.bf16.msra.mxu1 %v1391_v31 }
  0x9c   :  { %v654_v25 = vrot.slane %v6192_v24, 4  ;;  %1421 = vmatprep.subr.bf16.mxu1 %v6246_v60 }
  0x9d   :  { %v773_v3 = vsel %vm766_vm5, %v740_v48, %v5498_v45  ;;  %v774_v4 = vsel %vm766_vm5, %v741_v47, %v5499_v44  ;;  %v6193_v44 = vld [vmem:[%s8426_s0 + $0x78] sm:$0xff]  ;;  %v6194_v48 = vld [vmem:[%s8426_s0 + $0x80] sm:$0xff] }
  0x9e   :  { %1649 = vmatpush1.bf16.msra.mxu0 %v6018_v40  ;;  %v5507_v52 = vpop.permute.xlu0 %5506  ;;  %v5512_v63 = vpop.permute.xlu1 %5511  ;;  %v806_v11 = vsel %vm799_vm6, %v773_v3, %v5503_v61  ;;  %v807_v12 = vsel %vm799_vm6, %v774_v4, %v5504_v59  ;;  %v655_v36 = vsel %vm628_vm4, %v652_v23, %v654_v25  ;;  %v656_v45 = vrot.slane %v6193_v44, 4  ;;  %v6030_v61 = vld [vmem:[%s8428_s2 + $0x9c] sm:$0xff]  }
  0x9f   :  { %1650 = vmatprep.subr.bf16.mxu0 %v6246_v60  ;;  %v5509_v5 = vunpack.i.h.bf16 %v5507_v52  ;;  %v5508_v6 = vunpack.i.l.bf16 %v5507_v52  ;;  %v5514_v0 = vunpack.i.h.bf16 %v5512_v63  ;;  %v5513_v14 = vunpack.i.l.bf16 %v5512_v63 }
  0xa0   :  { %v838_v20 = vpack.c.bf16 %v807_v12, %v806_v11  ;;  %v843_v43 = vpack.c.bf16 %v655_v36, %v653_v35  ;;  %v1640_v52 = vsel %vm628_vm4, %v6026_v37, 0  ;;  %v6034_v12 = vld [vmem:[%s8428_s2 + $0x94] sm:$0xff]   ;;  %v6198_v36 = vld [vmem:[%s8426_s0 + $0xa0] sm:$0xff] }
  0xa1   :  { %1085 = vmatmul.mubr.bf16.gmra.mxu0 %v836_v51  ;;  %v743_v17 = vsel %vm733_vm3, %v6189_v55, %v5509_v5  ;;  %v742_v1 = vsel %vm733_vm3, %v6188_v53, %v5508_v6  ;;  %v665_v37 = vrot.slane %v6198_v36, 4 }
  0xa2   :  { %5102 = vmatprep.mubr.msk.bf16.mxu0 %vm733_vm3, %v839_v49  ;;  %1651 = vmatpush1.bf16.msra.mxu0 %v6019_v50  ;;  %v5517_v15 = vpop.permute.xlu0 %5516  ;;  %v5522_v21 = vpop.permute.xlu1 %5521  ;;  %v775_v29 = vsel %vm766_vm5, %v742_v1, %v5513_v14  ;;  %v776_v30 = vsel %vm766_vm5, %v743_v17, %v5514_v0  ;;  %v657_v49 = vrot.slane %v6194_v48, 4  ;;  %v6195_v50 = vld [vmem:[%s8426_s0 + $0x88] sm:$0xff]  ;;  %v6196_v14 = vld [vmem:[%s8426_s0 + $0x90] sm:$0xff]  ;;  %v663_v17 = vrot.slane %v6197_v16, 4 }
  0xa3   :  { %1652 = vmatprep.subr.bf16.mxu0 %v6246_v60  ;;  %v5519_v26 = vunpack.i.h.bf16 %v5517_v15  ;;  %v5518_v27 = vunpack.i.l.bf16 %v5517_v15  ;;  %v5524_v32 = vunpack.i.h.bf16 %v5522_v21  ;;  %v5523_v33 = vunpack.i.l.bf16 %v5522_v21 }
  0xa4   :  { %v659_v51 = vrot.slane %v6195_v50, 4  ;;  %v658_v62 = vsel %vm628_vm4, %v656_v45, %v657_v49  ;;  %v661_v15 = vrot.slane %v6196_v14, 4 }
  0xa5   :  { %v808_v38 = vsel %vm799_vm6, %v775_v29, %v5518_v27  ;;  %v809_v39 = vsel %vm799_vm6, %v776_v30, %v5519_v26  ;;  %v745_v10 = vsel %vm733_vm3, %v6191_v22, %v5524_v32  ;;  %v744_v42 = vsel %vm733_vm3, %v6807_v57, %v5523_v33 }
  0xa6   :  { %1653 = vmatpush1.bf16.msra.mxu0 %v6020_v7  ;;  %v5527_v28 = vpop.permute.xlu0 %5526  ;;  %v5532_v2 = vpop.permute.xlu1 %5531  ;;  %v840_v46 = vpack.c.bf16 %v809_v39, %v808_v38  ;;  %v660_v63 = vsel %vm628_vm4, %v657_v49, %v659_v51  ;;  %v662_v24 = vsel %vm628_vm4, %v659_v51, %v661_v15  ;;  %v664_v25 = vsel %vm628_vm4, %v661_v15, %v663_v17  ;;  %v6199_v38 = vld [vmem:[%s8426_s0 + $0xa8] sm:$0xff] }
  0xa7   :  { %1654 = vmatprep.subr.bf16.mxu0 %v6246_v60  ;;  %v5529_v40 = vunpack.i.h.bf16 %v5527_v28  ;;  %v5528_v41 = vunpack.i.l.bf16 %v5527_v28  ;;  %v5534_v53 = vunpack.i.h.bf16 %v5532_v2  ;;  %v5533_v54 = vunpack.i.l.bf16 %v5532_v2 }
  0xa8   :  { %v845_v11 = vpack.c.bf16 %v660_v63, %v658_v62  ;;  %v847_v33 = vpack.c.bf16 %v664_v25, %v662_v24  ;;  %v666_v39 = vrot.slane %v6199_v38, 4  ;;  %v6202_v62 = vld [vmem:[%s8426_s0 + $0xc0] sm:$0xff]  ;;  %v6205_v25 = vld [vmem:[%s8426_s0 + $0xd8] sm:$0xff] }
  0xa9   :  { %1095 = vmatmul.mubr.bf16.gmra.mxu0 %v838_v20  ;;  %v778_v55 = vsel %vm766_vm5, %v745_v10, %v5529_v40  ;;  %v777_v56 = vsel %vm766_vm5, %v744_v42, %v5528_v41  ;;  %v6200_v40 = vld [vmem:[%s8426_s0 + $0xb0] sm:$0xff]  ;;  %v672_v63 = vrot.slane %v6202_v62, 4 }
  0xaa   :  { %5103 = vmatprep.mubr.msk.bf16.mxu0 %vm733_vm3, %v841_v18  ;;  %1655 = vmatpush1.bf16.msra.mxu0 %v6021_v19  ;;  %v5537_v47 = vpop.permute.xlu0 %5536  ;;  %v5542_v57 = vpop.permute.xlu1 %5541  ;;  %v810_v3 = vsel %vm799_vm6, %v777_v56, %v5533_v54  ;;  %v811_v4 = vsel %vm799_vm6, %v778_v55, %v5534_v53  ;;  %v668_v41 = vrot.slane %v6200_v40, 4 }
  0xab   :  { %1656 = vmatprep.subr.bf16.mxu0 %v6246_v60  ;;  %v5539_v58 = vunpack.i.h.bf16 %v5537_v47  ;;  %v5538_v59 = vunpack.i.l.bf16 %v5537_v47  ;;  %v5544_v5 = vunpack.i.h.bf16 %v5542_v57  ;;  %v5543_v6 = vunpack.i.l.bf16 %v5542_v57 }
  0xac   :  { %v842_v13 = vpack.c.bf16 %v811_v4, %v810_v3  ;;  %v667_v47 = vsel %vm628_vm4, %v665_v37, %v666_v39 }
  0xad   :  { %v747_v8 = vsel %vm733_vm3, %v6194_v48, %v5539_v58  ;;  %v746_v9 = vsel %vm733_vm3, %v6193_v44, %v5538_v59  ;;  %v669_v48 = vsel %vm628_vm4, %v666_v39, %v668_v41  ;;  %v6201_v59 = vld [vmem:[%s8426_s0 + $0xb8] sm:$0xff] }
  0xae   :  { %1657 = vmatpush1.bf16.msra.mxu0 %v6022_v34  ;;  %v5547_v7 = vpop.permute.xlu0 %5546  ;;  %v5552_v0 = vpop.permute.xlu1 %5551  ;;  %v779_v19 = vsel %vm766_vm5, %v746_v9, %v5543_v6  ;;  %v780_v20 = vsel %vm766_vm5, %v747_v8, %v5544_v5  ;;  %v849_v56 = vpack.c.bf16 %v669_v48, %v667_v47  ;;  %v6207_v48 = vld [vmem:[%s8426_s0 + $0xe8] sm:$0xff] }
  0xaf   :  { %1668 = vmatprep.subr.bf16.mxu0 %v6246_v60  ;;  %v5549_v1 = vunpack.i.h.bf16 %v5547_v7  ;;  %v5548_v18 = vunpack.i.l.bf16 %v5547_v7  ;;  %v5554_v22 = vunpack.i.h.bf16 %v5552_v0  ;;  %v5553_v23 = vunpack.i.l.bf16 %v5552_v0 }
  0xb1   :  { %1105 = vmatmul.mubr.bf16.gmra.mxu0 %v840_v46  ;;  %v812_v26 = vsel %vm799_vm6, %v779_v19, %v5548_v18  ;;  %v813_v27 = vsel %vm799_vm6, %v780_v20, %v5549_v1  ;;  %v749_v31 = vsel %vm733_vm3, %v6196_v14, %v5554_v22  ;;  %v748_v32 = vsel %vm733_vm3, %v6195_v50, %v5553_v23  ;;  %v6204_v23 = vld [vmem:[%s8426_s0 + $0xd0] sm:$0xff] }
  0xb2   :  { %5104 = vmatprep.mubr.msk.bf16.mxu0 %vm733_vm3, %v843_v43  ;;  %1669 = vmatpush2.bf16.msra.mxu0 %v1640_v52  ;;  %v5557_v21 = vpop.permute.xlu0 %5556  ;;  %v5562_v30 = vpop.permute.xlu1 %5561  ;;  %v844_v34 = vpack.c.bf16 %v813_v27, %v812_v26  ;;  %v675_v24 = vrot.slane %v6204_v23, 4  ;;  %v677_v26 = vrot.slane %v6205_v25, 4 }
  0xb3   :  { %1670 = vmatprep.subr.bf16.mxu0 %v6246_v60  ;;  %v5559_v28 = vunpack.i.h.bf16 %v5557_v21  ;;  %v5558_v29 = vunpack.i.l.bf16 %v5557_v21  ;;  %v5564_v2 = vunpack.i.h.bf16 %v5562_v30  ;;  %v5563_v10 = vunpack.i.l.bf16 %v5562_v30  ;;  %v6203_v21 = vld [vmem:[%s8426_s0 + $0xc8] sm:$0xff] }
  0xb4   :  { %v674_v22 = vrot.slane %v6203_v21, 4 }
  0xb5   :  { %v782_v42 = vsel %vm766_vm5, %v749_v31, %v5559_v28  ;;  %v781_v43 = vsel %vm766_vm5, %v748_v32, %v5558_v29 }
  0xb6   :  { %1671 = vmatpush2.bf16.msra.mxu0 %v6030_v61  ;;  %v5567_v35 = vpop.permute.xlu0 %5566  ;;  %v5572_v44 = vpop.permute.xlu1 %5571  ;;  %v814_v49 = vsel %vm799_vm6, %v781_v43, %v5563_v10  ;;  %v815_v50 = vsel %vm799_vm6, %v782_v42, %v5564_v2  ;;  %v670_v61 = vrot.slane %v6201_v59, 4  ;;  %v6036_v43 = vld [vmem:[%s8428_s2 + $0x40] sm:$0xff]  }
  0xb7   :  { %1672 = vmatprep.subr.bf16.mxu0 %v6246_v60  ;;  %v5569_v45 = vunpack.i.h.bf16 %v5567_v35  ;;  %v5568_v46 = vunpack.i.l.bf16 %v5567_v35  ;;  %v5574_v51 = vunpack.i.h.bf16 %v5572_v44  ;;  %v5573_v52 = vunpack.i.l.bf16 %v5572_v44 }
  0xb8   :  { %v846_v57 = vpack.c.bf16 %v815_v50, %v814_v49  ;;  %v676_v35 = vsel %vm628_vm4, %v674_v22, %v675_v24  ;;  %v681_v49 = vrot.slane %v6207_v48, 4 }
  0xb9   :  { %1115 = vmatmul.mubr.bf16.gmra.mxu0 %v842_v13  ;;  %v751_v54 = vsel %vm733_vm3, %v6199_v38, %v5569_v45  ;;  %v750_v55 = vsel %vm733_vm3, %v6198_v36, %v5568_v46  ;;  %v678_v36 = vsel %vm628_vm4, %v675_v24, %v677_v26  ;;  %v6206_v46 = vld [vmem:[%s8426_s0 + $0xe0] sm:$0xff] }
  0xba   :  { %5105 = vmatprep.mubr.msk.bf16.mxu0 %vm733_vm3, %v845_v11  ;;  %1673 = vmatpush2.bf16.msra.mxu0 %v6034_v12  ;;  %v5577_v53 = vpop.permute.xlu0 %5576  ;;  %v5582_v58 = vpop.permute.xlu1 %5581  ;;  %v783_v5 = vsel %vm766_vm5, %v750_v55, %v5573_v52  ;;  %v784_v6 = vsel %vm766_vm5, %v751_v54, %v5574_v51  ;;  %v671_v11 = vsel %vm628_vm4, %v668_v41, %v670_v61  ;;  %v679_v47 = vrot.slane %v6206_v46, 4 }
  0xbb   :  { %v5579_v3 = vunpack.i.h.bf16 %v5577_v53  ;;  %v5578_v4 = vunpack.i.l.bf16 %v5577_v53  ;;  %v5584_v8 = vunpack.i.h.bf16 %v5582_v58  ;;  %v5583_v9 = vunpack.i.l.bf16 %v5582_v58 }
  0xbc   :  { %v673_v12 = vsel %vm628_vm4, %v670_v61, %v672_v63  ;;  %v853_v42 = vpack.c.bf16 %v678_v36, %v676_v35  ;;  %v682_v58 = vsel %vm628_vm4, %v679_v47, %v681_v49  ;;  %v6212_v35 = vld [vmem:[%s8426_s0 + $0x110] sm:$0xff] }
  0xbd   :  { %v816_v13 = vsel %vm799_vm6, %v783_v5, %v5578_v4  ;;  %v817_v0 = vsel %vm799_vm6, %v784_v6, %v5579_v3  ;;  %v753_v17 = vsel %vm733_vm3, %v6201_v59, %v5584_v8  ;;  %v752_v1 = vsel %vm733_vm3, %v6200_v40, %v5583_v9  ;;  %v6208_v9 = vld [vmem:[%s8426_s0 + $0xf0] sm:$0xff] }
  0xbe   :  { %v5587_v7 = vpop.permute.xlu0 %5586  ;;  %v5592_v16 = vpop.permute.xlu1 %5591  ;;  %v851_v18 = vpack.c.bf16 %v673_v12, %v671_v11  ;;  %v848_v19 = vpack.c.bf16 %v817_v0, %v816_v13  ;;  %v683_v11 = vrot.slane %v6208_v9, 4  ;;  %v6209_v12 = vld [vmem:[%s8426_s0 + $0xf8] sm:$0xff]  ;;  %v6210_v0 = vld [vmem:[%s8426_s0 + $0x100] sm:$0xff]  ;;  %v690_v36 = vrot.slane %v6212_v35, 4 }
  0xbf   :  { %v5589_v14 = vunpack.i.h.bf16 %v5587_v7  ;;  %v5588_v15 = vunpack.i.l.bf16 %v5587_v7  ;;  %v5594_v27 = vunpack.i.h.bf16 %v5592_v16  ;;  %v5593_v28 = vunpack.i.l.bf16 %v5592_v16 }
  0xc0   :  { %v684_v13 = vrot.slane %v6209_v12, 4 }
  0xc1   :  { %1125 = vmatmul.mubr.bf16.gmra.mxu0 %v844_v34  ;;  %v786_v29 = vsel %vm766_vm5, %v753_v17, %v5589_v14  ;;  %v785_v30 = vsel %vm766_vm5, %v752_v1, %v5588_v15  ;;  %v6035_v34 = vld [vmem:[%s8428_s2 + $0x48] sm:$0xff]   ;;  %v686_v14 = vrot.slane %v6210_v0, 4 }
  0xc2   :  { %5106 = vmatprep.mubr.msk.bf16.mxu0 %vm733_vm3, %v847_v33  ;;  %v5597_v20 = vpop.permute.xlu0 %5596  ;;  %v5602_v31 = vpop.permute.xlu1 %5601  ;;  %v818_v37 = vsel %vm799_vm6, %v785_v30, %v5593_v28  ;;  %v819_v38 = vsel %vm799_vm6, %v786_v29, %v5594_v27  ;;  %1422 = vmatpush2.bf16.msra.mxu1 %v6035_v34 }
  0xc3   :  { %v5599_v32 = vunpack.i.h.bf16 %v5597_v20  ;;  %v5598_v33 = vunpack.i.l.bf16 %v5597_v20  ;;  %v5604_v39 = vunpack.i.h.bf16 %v5602_v31  ;;  %v5603_v40 = vunpack.i.l.bf16 %v5602_v31  ;;  %1423 = vmatprep.subr.bf16.mxu1 %v6246_v60 }
  0xc4   :  { %v850_v44 = vpack.c.bf16 %v819_v38, %v818_v37  ;;  %v687_v22 = vsel %vm628_vm4, %v684_v13, %v686_v14 }
  0xc5   :  { %v755_v2 = vsel %vm733_vm3, %v6204_v23, %v5599_v32  ;;  %v754_v10 = vsel %vm733_vm3, %v6203_v21, %v5598_v33  ;;  %v685_v21 = vsel %vm628_vm4, %v683_v11, %v684_v13  ;;  %v6211_v33 = vld [vmem:[%s8426_s0 + $0x108] sm:$0xff] }
  0xc6   :  { %v5607_v41 = vpop.permute.xlu0 %5606  ;;  %v5612_v45 = vpop.permute.xlu1 %5611  ;;  %1424 = vmatpush2.bf16.msra.mxu1 %v6036_v43  ;;  %v787_v52 = vsel %vm766_vm5, %v754_v10, %v5603_v40  ;;  %v788_v53 = vsel %vm766_vm5, %v755_v2, %v5604_v39  ;;  %v857_v30 = vpack.c.bf16 %v687_v22, %v685_v21  ;;  %v688_v34 = vrot.slane %v6211_v33, 4 }
  0xc7   :  { %v5609_v50 = vunpack.i.h.bf16 %v5607_v41  ;;  %v5608_v51 = vunpack.i.l.bf16 %v5607_v41  ;;  %v5614_v55 = vunpack.i.h.bf16 %v5612_v45 }
  0xc8   :  { %v691_v43 = vsel %vm628_vm4, %v688_v34, %v690_v36 }
  0xc9   :  { %1135 = vmatmul.mubr.bf16.gmra.mxu0 %v846_v57  ;;  %v680_v57 = vsel %vm628_vm4, %v677_v26, %v679_v47  ;;  %v820_v59 = vsel %vm799_vm6, %v787_v52, %v5608_v51  ;;  %v821_v61 = vsel %vm799_vm6, %v788_v53, %v5609_v50  ;;  %v757_v4 = vsel %vm733_vm3, %v6206_v46, %v5614_v55 }
  0xca   :  { %5107 = vmatprep.mubr.msk.bf16.mxu0 %vm733_vm3, %v849_v56  ;;  %v5617_v54 = vpop.permute.xlu0 %5616  ;;  %v5613_v56 = vunpack.i.l.bf16 %v5612_v45  ;;  %v5622_v3 = vpop.permute.xlu1 %5621  ;;  %v855_v6 = vpack.c.bf16 %v682_v58, %v680_v57  ;;  %v852_v7 = vpack.c.bf16 %v821_v61, %v820_v59  ;;  %v6215_v58 = vld [vmem:[%s8426_s0 + $0x128] sm:$0xff] }
  0xcb   :  { %v5619_v62 = vunpack.i.h.bf16 %v5617_v54  ;;  %v5618_v63 = vunpack.i.l.bf16 %v5617_v54  ;;  %v5624_v15 = vunpack.i.h.bf16 %v5622_v3  ;;  %v5623_v16 = vunpack.i.l.bf16 %v5622_v3  ;;  %v6213_v54 = vld [vmem:[%s8426_s0 + $0x118] sm:$0xff] }
  0xcc   :  { %v756_v5 = vsel %vm733_vm3, %v6205_v25, %v5613_v56  ;;  %v692_v55 = vrot.slane %v6213_v54, 4  ;;  %v6214_v56 = vld [vmem:[%s8426_s0 + $0x120] sm:$0xff]  ;;  %v695_v59 = vrot.slane %v6215_v58, 4 }
  0xcd   :  { %v790_v17 = vsel %vm766_vm5, %v757_v4, %v5619_v62  ;;  %v789_v1 = vsel %vm766_vm5, %v756_v5, %v5618_v63  ;;  %v693_v57 = vrot.slane %v6214_v56, 4 }
  0xce   :  { %v5627_v8 = vpop.permute.xlu0 %5626  ;;  %v822_v23 = vsel %vm799_vm6, %v789_v1, %v5623_v16  ;;  %v823_v24 = vsel %vm799_vm6, %v790_v17, %v5624_v15 }
  0xcf   :  { %v5628_v20 = vunpack.i.l.bf16 %v5627_v8  ;;  %v854_v31 = vpack.c.bf16 %v823_v24, %v822_v23 }
  0xd1   :  { %1145 = vmatmul.mubr.bf16.gmra.mxu0 %v848_v19  ;;  %v5629_v19 = vunpack.i.h.bf16 %v5627_v8  ;;  %v758_v29 = vsel %vm733_vm3, %v6208_v9, %v5628_v20  ;;  %v696_v8 = vsel %vm628_vm4, %v693_v57, %v695_v59  ;;  %v6217_v20 = vld [vmem:[%s8426_s0 + $0x138] sm:$0xff] }
  0xd2   :  { %5108 = vmatprep.mubr.msk.bf16.mxu0 %vm733_vm3, %v851_v18  ;;  %v5632_v18 = vpop.permute.xlu1 %5631  ;;  %v5637_v27 = vpop.permute.xlu0 %5636  ;;  %v699_v21 = vrot.slane %v6217_v20, 4 }
  0xd3   :  { %v5634_v25 = vunpack.i.h.bf16 %v5632_v18  ;;  %v5633_v26 = vunpack.i.l.bf16 %v5632_v18  ;;  %v759_v28 = vsel %vm733_vm3, %v6209_v12, %v5629_v19  ;;  %v5639_v37 = vunpack.i.h.bf16 %v5637_v27  ;;  %v6216_v18 = vld [vmem:[%s8426_s0 + $0x130] sm:$0xff] }
  0xd4   :  { %v5638_v38 = vunpack.i.l.bf16 %v5637_v27  ;;  %v697_v19 = vrot.slane %v6216_v18, 4 }
  0xd5   :  { %v791_v39 = vsel %vm766_vm5, %v758_v29, %v5633_v26  ;;  %v792_v40 = vsel %vm766_vm5, %v759_v28, %v5634_v25 }
  0xd6   :  { %v5642_v32 = vpop.permute.xlu1 %5641  ;;  %v5647_v41 = vpop.permute.xlu0 %5646  ;;  %v825_v45 = vsel %vm799_vm6, %v792_v40, %v5639_v37  ;;  %v698_v29 = vsel %vm628_vm4, %v695_v59, %v697_v19 }
  0xd7   :  { %v5644_v2 = vunpack.i.h.bf16 %v5642_v32  ;;  %v5643_v10 = vunpack.i.l.bf16 %v5642_v32  ;;  %v5649_v46 = vunpack.i.h.bf16 %v5647_v41  ;;  %v5648_v47 = vunpack.i.l.bf16 %v5647_v41 }
  0xd9   :  { %1155 = vmatmul.mubr.bf16.gmra.mxu0 %v850_v44  ;;  %v824_v44 = vsel %vm799_vm6, %v791_v39, %v5638_v38  ;;  %v761_v49 = vsel %vm733_vm3, %v6211_v33, %v5644_v2  ;;  %v760_v50 = vsel %vm733_vm3, %v6210_v0, %v5643_v10 }
  0xda   :  { %5109 = vmatprep.mubr.msk.bf16.mxu0 %vm733_vm3, %v853_v42  ;;  %v689_v42 = vsel %vm628_vm4, %v686_v14, %v688_v34  ;;  %v5652_v48 = vpop.permute.xlu1 %5651  ;;  %v856_v52 = vpack.c.bf16 %v825_v45, %v824_v44  ;;  %v5657_v53 = vpop.permute.xlu0 %5656  ;;  %v794_v63 = vsel %vm766_vm5, %v761_v49, %v5649_v46  ;;  %v793_v3 = vsel %vm766_vm5, %v760_v50, %v5648_v47 }
  0xdb   :  { %v859_v51 = vpack.c.bf16 %v691_v43, %v689_v42  ;;  %v5654_v61 = vunpack.i.h.bf16 %v5652_v48  ;;  %v5653_v62 = vunpack.i.l.bf16 %v5652_v48  ;;  %v5659_v5 = vunpack.i.h.bf16 %v5657_v53 }
  0xdd   :  { %v826_v9 = vsel %vm799_vm6, %v793_v3, %v5653_v62  ;;  %v827_v11 = vsel %vm799_vm6, %v794_v63, %v5654_v61  ;;  %v763_v14 = vsel %vm733_vm3, %v6214_v56, %v5659_v5 }
  0xde   :  { %v5662_v4 = vpop.permute.xlu1 %5661  ;;  %v5667_v0 = vpop.permute.xlu0 %5666  ;;  %v858_v17 = vpack.c.bf16 %v827_v11, %v826_v9 }
  0xdf   :  { %v5664_v12 = vunpack.i.h.bf16 %v5662_v4  ;;  %v5663_v13 = vunpack.i.l.bf16 %v5662_v4  ;;  %v5669_v22 = vunpack.i.h.bf16 %v5667_v0  ;;  %v5668_v23 = vunpack.i.l.bf16 %v5667_v0 }
  0xe1   :  { %1165 = vmatmul.mubr.bf16.gmra.mxu0 %v852_v7  ;;  %v694_v7 = vsel %vm628_vm4, %v692_v55, %v693_v57  ;;  %v796_v25 = vsel %vm766_vm5, %v763_v14, %v5664_v12 }
  0xe2   :  { %5110 = vmatprep.mubr.msk.bf16.mxu0 %vm733_vm3, %v855_v6  ;;  %v5658_v6 = vunpack.i.l.bf16 %v5657_v53  ;;  %v861_v16 = vpack.c.bf16 %v696_v8, %v694_v7  ;;  %v5672_v1 = vpop.permute.xlu1 %5671  ;;  %v5677_v28 = vpop.permute.xlu0 %5676  ;;  %v829_v32 = vsel %vm799_vm6, %v796_v25, %v5669_v22 }
  0xe3   :  { %v5674_v26 = vunpack.i.h.bf16 %v5672_v1  ;;  %v5673_v27 = vunpack.i.l.bf16 %v5672_v1  ;;  %v5679_v33 = vunpack.i.h.bf16 %v5677_v28  ;;  %v5678_v34 = vunpack.i.l.bf16 %v5677_v28 }
  0xe4   :  { %v762_v15 = vsel %vm733_vm3, %v6213_v54, %v5658_v6 }
  0xe5   :  { %v795_v24 = vsel %vm766_vm5, %v762_v15, %v5663_v13  ;;  %v765_v36 = vsel %vm733_vm3, %v6216_v18, %v5674_v26  ;;  %v764_v37 = vsel %vm733_vm3, %v6215_v58, %v5673_v27 }
  0xe6   :  { %v5682_v35 = vpop.permute.xlu1 %5681  ;;  %v798_v2 = vsel %vm766_vm5, %v765_v36, %v5679_v33  ;;  %v797_v10 = vsel %vm766_vm5, %v764_v37, %v5678_v34 }
  0xe7   :  { %v5684_v40 = vunpack.i.h.bf16 %v5682_v35  ;;  %v5683_v41 = vunpack.i.l.bf16 %v5682_v35 }
  0xe9   :  { %1175 = vmatmul.mubr.bf16.gmra.mxu0 %v854_v31  ;;  %v828_v31 = vsel %vm799_vm6, %v795_v24, %v5668_v23  ;;  %v830_v42 = vsel %vm799_vm6, %v797_v10, %v5683_v41  ;;  %v831_v43 = vsel %vm799_vm6, %v798_v2, %v5684_v40  ;;  %vm4555_vm6 = vcmask 916480  }
  0xea   :  { %5111 = vmatprep.mubr.msk.bf16.mxu0 %vm733_vm3, %v857_v30  ;;  %v700_v30 = vsel %vm628_vm4, %v697_v19, %v699_v21  ;;  %v860_v39 = vpack.c.bf16 %v829_v32, %v828_v31  ;;  %v862_v44 = vpack.c.bf16 %v831_v43, %v830_v42 }
  0xeb   :  { %v863_v38 = vpack.c.bf16 %v700_v30, %v698_v29 }
  0xf1   :  { %1185 = vmatmul.mubr.bf16.gmra.mxu0 %v856_v52 }
  0xf2   :  { %5112 = vmatprep.mubr.msk.bf16.mxu0 %vm733_vm3, %v859_v51 }
  0xf9   :  { %1195 = vmatmul.mubr.bf16.gmra.mxu0 %v858_v17 }
  0xfa   :  { %5113 = vmatprep.mubr.msk.bf16.mxu0 %vm733_vm3, %v861_v16 }
 0x101   :  { %1205 = vmatmul.mubr.bf16.gmra.mxu0 %v860_v39 }
 0x102   :  { %5114 = vmatprep.mubr.msk.bf16.mxu0 %vm733_vm3, %v863_v38 }
 0x109   :  { %1215 = vmatmul.mubr.bf16.gmra.mxu0 %v862_v44 }
 0x151   :  { %v1066_v45 = vpop.f32.mrf.mxu0 }
 0x153   :  { %v1068_v46 = vpop.f32.mrf.mxu0 }
 0x155   :  { %v1070_v47 = vpop.f32.mrf.mxu0 }
 0x156   :  { %v1225_v50 = vpack.c.bf16 %v1070_v47, %v1066_v45 }
 0x157   :  { %v1072_v48 = vpop.f32.mrf.mxu0 }
 0x158   :  { %v1226_v49 = vpack.c.bf16 %v1072_v48, %v1068_v46 }
 0x159   :  { %v1076_v51 = vpop.f32.mrf.mxu0 }
 0x15a   :  { %5126 = vmatprep.mubr.msk.bf16.mxu1 %vm1341_vm7, %v1226_v49  ;;  %5174 = vmatprep.mubr.msk.bf16.mxu0 %vm1341_vm7, %v1226_v49 }
 0x15b   :  { %v1078_v52 = vpop.f32.mrf.mxu0  ;;  %1426 = vmatmul.mubr.bf16.vlgmr.msra.gmra.mxu1 %v1225_v50  ;;  %1675 = vmatmul.mubr.bf16.vlgmr.msra.gmra.mxu0 %v1225_v50 }
 0x15d   :  { %v1080_v53 = vpop.f32.mrf.mxu0 }
 0x15e   :  { %v1227_v56 = vpack.c.bf16 %v1080_v53, %v1076_v51 }
 0x15f   :  { %v1082_v54 = vpop.f32.mrf.mxu0 }
 0x160   :  { %v1228_v55 = vpack.c.bf16 %v1082_v54, %v1078_v52 }
 0x161   :  { %v1086_v57 = vpop.f32.mrf.mxu0 }
 0x162   :  { %5127 = vmatprep.mubr.msk.bf16.mxu1 %vm1341_vm7, %v1228_v55  ;;  %5175 = vmatprep.mubr.msk.bf16.mxu0 %vm1341_vm7, %v1228_v55 }
 0x163   :  { %v1088_v58 = vpop.f32.mrf.mxu0  ;;  %1434 = vmatmul.mubr.bf16.gmra.mxu1 %v1227_v56  ;;  %1683 = vmatmul.mubr.bf16.gmra.mxu0 %v1227_v56 }
 0x165   :  { %v1090_v59 = vpop.f32.mrf.mxu0 }
 0x166   :  { %v1229_v63 = vpack.c.bf16 %v1090_v59, %v1086_v57 }
 0x167   :  { %v1092_v61 = vpop.f32.mrf.mxu0 }
 0x168   :  { %v1230_v62 = vpack.c.bf16 %v1092_v61, %v1088_v58 }
 0x169   :  { %v1096_v3 = vpop.f32.mrf.mxu0 }
 0x16a   :  { %5128 = vmatprep.mubr.msk.bf16.mxu1 %vm1341_vm7, %v1230_v62  ;;  %5176 = vmatprep.mubr.msk.bf16.mxu0 %vm1341_vm7, %v1230_v62 }
 0x16b   :  { %v1098_v4 = vpop.f32.mrf.mxu0  ;;  %1442 = vmatmul.mubr.bf16.gmra.mxu1 %v1229_v63  ;;  %1691 = vmatmul.mubr.bf16.gmra.mxu0 %v1229_v63 }
 0x16d   :  { %v1100_v5 = vpop.f32.mrf.mxu0 }
 0x16e   :  { %v1231_v8 = vpack.c.bf16 %v1100_v5, %v1096_v3  ;;  %v6037_v3 = vld [vmem:[%s8429_s3 + $0x70] ss:$8 sps:$4 sm:$0xff]  }
 0x16f   :  { %v1102_v6 = vpop.f32.mrf.mxu0  ;;  %v6040_v5 = vld [vmem:[%s8429_s3 + $0x170] ss:$8 sps:$4 sm:$0xff]  }
 0x170   :  { %v1232_v7 = vpack.c.bf16 %v1102_v6, %v1098_v4  ;;  %v6039_v4 = vld [vmem:[%s8429_s3 + $0x74] ss:$8 sps:$4 sm:$0xff]  }
 0x171   :  { %v1106_v9 = vpop.f32.mrf.mxu0  ;;  %v6042_v6 = vld [vmem:[%s8429_s3 + $0x174] ss:$8 sps:$4 sm:$0xff]   ;;  %3225 = vmatprep.subr.bf16.mxu1 %v6039_v4 }
 0x172   :  { %5129 = vmatprep.mubr.msk.bf16.mxu1 %vm1341_vm7, %v1232_v7  ;;  %5177 = vmatprep.mubr.msk.bf16.mxu0 %vm1341_vm7, %v1232_v7 }
 0x173   :  { %v1108_v11 = vpop.f32.mrf.mxu0  ;;  %1450 = vmatmul.mubr.bf16.gmra.mxu1 %v1231_v8  ;;  %1699 = vmatmul.mubr.bf16.gmra.mxu0 %v1231_v8 }
 0x174   :  { %3418 = vmatprep.subr.bf16.mxu0 %v6042_v6  ;;  %3226 = vmatpush1.bf16.msra.mxu1 %v6037_v3  ;;  %v6101_v3 = vld [vmem:[%s8429_s3 + $0xb4] ss:$8 sps:$4 sm:$0xff]  }
 0x175   :  { %v1110_v12 = vpop.f32.mrf.mxu0  ;;  %3419 = vmatpush1.bf16.msra.mxu0 %v6040_v5 }
 0x176   :  { %v1233_v14 = vpack.c.bf16 %v1110_v12, %v1106_v9  ;;  %v6043_v12 = vld [vmem:[%s8429_s3 + $0x60] ss:$8 sps:$4 sm:$0xff]  }
 0x177   :  { %v1112_v13 = vpop.f32.mrf.mxu0 }
 0x178   :  { %v1234_v0 = vpack.c.bf16 %v1112_v13, %v1108_v11  ;;  %v6045_v13 = vld [vmem:[%s8429_s3 + $0x64] ss:$8 sps:$4 sm:$0xff]  }
 0x179   :  { %v1116_v15 = vpop.f32.mrf.mxu0  ;;  %3227 = vmatprep.subr.bf16.mxu1 %v6045_v13  ;;  %v6104_v13 = vld [vmem:[%s8429_s3 + $0xa4] ss:$8 sps:$4 sm:$0xff]  }
 0x17a   :  { %5130 = vmatprep.mubr.msk.bf16.mxu1 %vm1341_vm7, %v1234_v0  ;;  %5178 = vmatprep.mubr.msk.bf16.mxu0 %vm1341_vm7, %v1234_v0 }
 0x17b   :  { %v1118_v16 = vpop.f32.mrf.mxu0  ;;  %1458 = vmatmul.mubr.bf16.gmra.mxu1 %v1233_v14  ;;  %1707 = vmatmul.mubr.bf16.gmra.mxu0 %v1233_v14 }
 0x17c   :  { %3228 = vmatpush1.bf16.msra.mxu1 %v6043_v12  ;;  %v6102_v12 = vld [vmem:[%s8429_s3 + $0xa0] ss:$8 sps:$4 sm:$0xff]  }
 0x17d   :  { %v1120_v17 = vpop.f32.mrf.mxu0 }
 0x17e   :  { %v1235_v19 = vpack.c.bf16 %v1120_v17, %v1116_v15 }
 0x17f   :  { %v1122_v1 = vpop.f32.mrf.mxu0 }
 0x180   :  { %v1236_v18 = vpack.c.bf16 %v1122_v1, %v1118_v16 }
 0x181   :  { %v1126_v20 = vpop.f32.mrf.mxu0 }
 0x182   :  { %5131 = vmatprep.mubr.msk.bf16.mxu1 %vm1341_vm7, %v1236_v18  ;;  %5179 = vmatprep.mubr.msk.bf16.mxu0 %vm1341_vm7, %v1236_v18  ;;  %v6046_v18 = vld [vmem:[%s8429_s3 + $0x160] ss:$8 sps:$4 sm:$0xff]  }
 0x183   :  { %v1128_v21 = vpop.f32.mrf.mxu0  ;;  %1466 = vmatmul.mubr.bf16.gmra.mxu1 %v1235_v19  ;;  %1715 = vmatmul.mubr.bf16.gmra.mxu0 %v1235_v19  ;;  %v6048_v19 = vld [vmem:[%s8429_s3 + $0x164] ss:$8 sps:$4 sm:$0xff]  }
 0x184   :  { %3420 = vmatprep.subr.bf16.mxu0 %v6048_v19 }
 0x185   :  { %v1130_v22 = vpop.f32.mrf.mxu0  ;;  %3421 = vmatpush1.bf16.msra.mxu0 %v6046_v18  ;;  %v6110_v18 = vld [vmem:[%s8429_s3 + $0x94] ss:$8 sps:$4 sm:$0xff]  }
 0x186   :  { %v1237_v25 = vpack.c.bf16 %v1130_v22, %v1126_v20  ;;  %v6049_v22 = vld [vmem:[%s8429_s3 + $0x50] ss:$8 sps:$4 sm:$0xff]  }
 0x187   :  { %v1132_v23 = vpop.f32.mrf.mxu0 }
 0x188   :  { %v1238_v24 = vpack.c.bf16 %v1132_v23, %v1128_v21  ;;  %v6051_v23 = vld [vmem:[%s8429_s3 + $0x54] ss:$8 sps:$4 sm:$0xff]  }
 0x189   :  { %v1136_v26 = vpop.f32.mrf.mxu0  ;;  %3229 = vmatprep.subr.bf16.mxu1 %v6051_v23 }
 0x18a   :  { %5132 = vmatprep.mubr.msk.bf16.mxu1 %vm1341_vm7, %v1238_v24  ;;  %5180 = vmatprep.mubr.msk.bf16.mxu0 %vm1341_vm7, %v1238_v24 }
 0x18b   :  { %v1138_v27 = vpop.f32.mrf.mxu0  ;;  %1474 = vmatmul.mubr.bf16.gmra.mxu1 %v1237_v25  ;;  %1723 = vmatmul.mubr.bf16.gmra.mxu0 %v1237_v25 }
 0x18c   :  { %3230 = vmatpush1.bf16.msra.mxu1 %v6049_v22 }
 0x18d   :  { %v1140_v28 = vpop.f32.mrf.mxu0 }
 0x18e   :  { %v1239_v31 = vpack.c.bf16 %v1140_v28, %v1136_v26  ;;  %v6054_v28 = vld [vmem:[%s8429_s3 + $0x44] ss:$8 sps:$4 sm:$0xff]  }
 0x18f   :  { %v1142_v29 = vpop.f32.mrf.mxu0  ;;  %3231 = vmatprep.subr.bf16.mxu1 %v6054_v28 }
 0x190   :  { %v1240_v30 = vpack.c.bf16 %v1142_v29, %v1138_v27  ;;  %v6052_v27 = vld [vmem:[%s8429_s3 + $0x40] ss:$8 sps:$4 sm:$0xff]   ;;  %v6055_v29 = vld [vmem:[%s8429_s3 + $0x150] ss:$8 sps:$4 sm:$0xff]  }
 0x191   :  { %v1146_v32 = vpop.f32.mrf.mxu0  ;;  %3232 = vmatpush1.bf16.msra.mxu1 %v6052_v27 }
 0x192   :  { %5133 = vmatprep.mubr.msk.bf16.mxu1 %vm1341_vm7, %v1240_v30  ;;  %5181 = vmatprep.mubr.msk.bf16.mxu0 %vm1341_vm7, %v1240_v30  ;;  %v6057_v30 = vld [vmem:[%s8429_s3 + $0x154] ss:$8 sps:$4 sm:$0xff]  }
 0x193   :  { %v1148_v33 = vpop.f32.mrf.mxu0  ;;  %1482 = vmatmul.mubr.bf16.gmra.mxu1 %v1239_v31  ;;  %1731 = vmatmul.mubr.bf16.gmra.mxu0 %v1239_v31  ;;  %v6058_v31 = vld [vmem:[%s8429_s3 + $0x30] ss:$8 sps:$4 sm:$0xff]  }
 0x194   :  { %3422 = vmatprep.subr.bf16.mxu0 %v6057_v30 }
 0x195   :  { %v1150_v34 = vpop.f32.mrf.mxu0  ;;  %3423 = vmatpush1.bf16.msra.mxu0 %v6055_v29 }
 0x196   :  { %v1241_v37 = vpack.c.bf16 %v1150_v34, %v1146_v32  ;;  %v6060_v32 = vld [vmem:[%s8429_s3 + $0x34] ss:$8 sps:$4 sm:$0xff]   ;;  %v6063_v34 = vld [vmem:[%s8429_s3 + $0x144] ss:$8 sps:$4 sm:$0xff]  }
 0x197   :  { %v1152_v35 = vpop.f32.mrf.mxu0  ;;  %3233 = vmatprep.subr.bf16.mxu1 %v6060_v32  ;;  %3424 = vmatprep.subr.bf16.mxu0 %v6063_v34  ;;  %v6113_v34 = vld [vmem:[%s8429_s3 + $0x184] ss:$8 sps:$4 sm:$0xff]  }
 0x198   :  { %v1242_v36 = vpack.c.bf16 %v1152_v35, %v1148_v33  ;;  %3234 = vmatpush1.bf16.msra.mxu1 %v6058_v31  ;;  %v6061_v33 = vld [vmem:[%s8429_s3 + $0x140] ss:$8 sps:$4 sm:$0xff]   ;;  %v6247_v31 = vmov 0.0  }
 0x199   :  { %v1156_v38 = vpop.f32.mrf.mxu0  ;;  %v6064_v35 = vld [vmem:[%s8429_s3 + $0x20] ss:$8 sps:$4 sm:$0xff]   ;;  %3425 = vmatpush1.bf16.msra.mxu0 %v6061_v33  ;;  %v7241_v32 = vrot.slane %v6247_v31, 1 }
 0x19a   :  { %5134 = vmatprep.mubr.msk.bf16.mxu1 %vm1341_vm7, %v1242_v36  ;;  %5182 = vmatprep.mubr.msk.bf16.mxu0 %vm1341_vm7, %v1242_v36  ;;  %v6066_v36 = vld [vmem:[%s8429_s3 + $0x24] ss:$8 sps:$4 sm:$0xff]   ;;  %v6111_v33 = vld [vmem:[%s8429_s3 + $0x180] ss:$8 sps:$4 sm:$0xff]  }
 0x19b   :  { %v1158_v39 = vpop.f32.mrf.mxu0  ;;  %1490 = vmatmul.mubr.bf16.gmra.mxu1 %v1241_v37  ;;  %1739 = vmatmul.mubr.bf16.gmra.mxu0 %v1241_v37  ;;  %v6067_v37 = vld [vmem:[%s8429_s3 + $0x130] ss:$8 sps:$4 sm:$0xff]  }
 0x19c   :  { %3235 = vmatprep.subr.bf16.mxu1 %v6066_v36 }
 0x19d   :  { %v1160_v40 = vpop.f32.mrf.mxu0  ;;  %3236 = vmatpush1.bf16.msra.mxu1 %v6064_v35 }
 0x19e   :  { %v1243_v10 = vpack.c.bf16 %v1160_v40, %v1156_v38  ;;  %v6069_v38 = vld [vmem:[%s8429_s3 + $0x134] ss:$8 sps:$4 sm:$0xff]  }
 0x19f   :  { %v1162_v41 = vpop.f32.mrf.mxu0  ;;  %v6072_v40 = vld [vmem:[%s8429_s3 + $0x14] ss:$8 sps:$4 sm:$0xff]   ;;  %3426 = vmatprep.subr.bf16.mxu0 %v6069_v38 }
 0x1a0   :  { %v1244_v2 = vpack.c.bf16 %v1162_v41, %v1158_v39  ;;  %v6070_v39 = vld [vmem:[%s8429_s3 + $0x10] ss:$8 sps:$4 sm:$0xff]   ;;  %3237 = vmatprep.subr.bf16.mxu1 %v6072_v40  ;;  %3427 = vmatpush1.bf16.msra.mxu0 %v6067_v37  ;;  %v6073_v41 = vld [vmem:[%s8429_s3] ss:$8 sps:$4 sm:$0xff]  }
 0x1a1   :  { %v1166_v42 = vpop.f32.mrf.mxu0  ;;  %3238 = vmatpush1.bf16.msra.mxu1 %v6070_v39 }
 0x1a2   :  { %5135 = vmatprep.mubr.msk.bf16.mxu1 %vm1341_vm7, %v1244_v2  ;;  %5183 = vmatprep.mubr.msk.bf16.mxu0 %vm1341_vm7, %v1244_v2  ;;  %v6075_v2 = vld [vmem:[%s8429_s3 + $0x4] ss:$8 sps:$4 sm:$0xff]  }
 0x1a3   :  { %v1168_v43 = vpop.f32.mrf.mxu0  ;;  %1498 = vmatmul.mubr.bf16.gmra.mxu1 %v1243_v10  ;;  %1747 = vmatmul.mubr.bf16.gmra.mxu0 %v1243_v10  ;;  %v6076_v10 = vld [vmem:[%s8429_s3 + $0x120] ss:$8 sps:$4 sm:$0xff]  }
 0x1a4   :  { %3239 = vmatprep.subr.bf16.mxu1 %v6075_v2 }
 0x1a5   :  { %v1170_v44 = vpop.f32.mrf.mxu0  ;;  %3240 = vmatpush1.bf16.msra.mxu1 %v6073_v41 }
 0x1a6   :  { %v1245_v47 = vpack.c.bf16 %v1170_v44, %v1166_v42  ;;  %v6078_v42 = vld [vmem:[%s8429_s3 + $0x124] ss:$8 sps:$4 sm:$0xff]   ;;  %v6081_v44 = vld [vmem:[%s8429_s3 + $0xf4] ss:$8 sps:$4 sm:$0xff]  }
 0x1a7   :  { %v1172_v45 = vpop.f32.mrf.mxu0  ;;  %3428 = vmatprep.subr.bf16.mxu0 %v6078_v42  ;;  %3241 = vmatprep.subr.bf16.mxu1 %v6081_v44 }
 0x1a8   :  { %v1246_v46 = vpack.c.bf16 %v1172_v45, %v1168_v43  ;;  %3429 = vmatpush1.bf16.msra.mxu0 %v6076_v10  ;;  %v6079_v43 = vld [vmem:[%s8429_s3 + $0xf0] ss:$8 sps:$4 sm:$0xff]  }
 0x1a9   :  { %v1176_v48 = vpop.f32.mrf.mxu0  ;;  %3242 = vmatpush2.bf16.msra.mxu1 %v6079_v43  ;;  %v6082_v45 = vld [vmem:[%s8429_s3 + $0x110] ss:$8 sps:$4 sm:$0xff]  }
 0x1aa   :  { %5136 = vmatprep.mubr.msk.bf16.mxu1 %vm1341_vm7, %v1246_v46  ;;  %5184 = vmatprep.mubr.msk.bf16.mxu0 %vm1341_vm7, %v1246_v46  ;;  %v6084_v46 = vld [vmem:[%s8429_s3 + $0x114] ss:$8 sps:$4 sm:$0xff]  }
 0x1ab   :  { %v1178_v49 = vpop.f32.mrf.mxu0  ;;  %1506 = vmatmul.mubr.bf16.gmra.mxu1 %v1245_v47  ;;  %1755 = vmatmul.mubr.bf16.gmra.mxu0 %v1245_v47  ;;  %v6085_v47 = vld [vmem:[%s8429_s3 + $0xe0] ss:$8 sps:$4 sm:$0xff]  }
 0x1ac   :  { %3430 = vmatprep.subr.bf16.mxu0 %v6084_v46 }
 0x1ad   :  { %v1180_v50 = vpop.f32.mrf.mxu0  ;;  %3431 = vmatpush1.bf16.msra.mxu0 %v6082_v45 }
 0x1ae   :  { %v1247_v53 = vpack.c.bf16 %v1180_v50, %v1176_v48  ;;  %v6087_v48 = vld [vmem:[%s8429_s3 + $0xe4] ss:$8 sps:$4 sm:$0xff]   ;;  %v6090_v50 = vld [vmem:[%s8429_s3 + $0xd4] ss:$8 sps:$4 sm:$0xff]  }
 0x1af   :  { %v1182_v51 = vpop.f32.mrf.mxu0  ;;  %3243 = vmatprep.subr.bf16.mxu1 %v6087_v48 }
 0x1b0   :  { %v1248_v52 = vpack.c.bf16 %v1182_v51, %v1178_v49  ;;  %3244 = vmatpush2.bf16.msra.mxu1 %v6085_v47  ;;  %v6088_v49 = vld [vmem:[%s8429_s3 + $0xd0] ss:$8 sps:$4 sm:$0xff]   ;;  %v6091_v51 = vld [vmem:[%s8429_s3 + $0x100] ss:$8 sps:$4 sm:$0xff]  }
 0x1b1   :  { %v1186_v54 = vpop.f32.mrf.mxu0  ;;  %3245 = vmatprep.subr.bf16.mxu1 %v6090_v50  ;;  %v6114_v50 = vld [vmem:[%s8429_s3 + $0x80] ss:$8 sps:$4 sm:$0xff]  }
 0x1b2   :  { %5137 = vmatprep.mubr.msk.bf16.mxu1 %vm1341_vm7, %v1248_v52  ;;  %5185 = vmatprep.mubr.msk.bf16.mxu0 %vm1341_vm7, %v1248_v52  ;;  %v6093_v52 = vld [vmem:[%s8429_s3 + $0x104] ss:$8 sps:$4 sm:$0xff]  }
 0x1b3   :  { %v1188_v55 = vpop.f32.mrf.mxu0  ;;  %1514 = vmatmul.mubr.bf16.gmra.mxu1 %v1247_v53  ;;  %1763 = vmatmul.mubr.bf16.gmra.mxu0 %v1247_v53  ;;  %v6094_v53 = vld [vmem:[%s8429_s3 + $0xc0] ss:$8 sps:$4 sm:$0xff]  }
 0x1b4   :  { %3246 = vmatpush2.bf16.msra.mxu1 %v6088_v49  ;;  %3432 = vmatprep.subr.bf16.mxu0 %v6093_v52 }
 0x1b5   :  { %v1190_v56 = vpop.f32.mrf.mxu0  ;;  %3433 = vmatpush1.bf16.msra.mxu0 %v6091_v51  ;;  %v6116_v51 = vld [vmem:[%s8429_s3 + $0x84] ss:$8 sps:$4 sm:$0xff]  }
 0x1b6   :  { %v1249_v59 = vpack.c.bf16 %v1190_v56, %v1186_v54  ;;  %v6096_v54 = vld [vmem:[%s8429_s3 + $0xc4] ss:$8 sps:$4 sm:$0xff]  }
 0x1b7   :  { %v1192_v57 = vpop.f32.mrf.mxu0  ;;  %3247 = vmatprep.subr.bf16.mxu1 %v6096_v54 }
 0x1b8   :  { %v1250_v58 = vpack.c.bf16 %v1192_v57, %v1188_v55  ;;  %3248 = vmatpush2.bf16.msra.mxu1 %v6094_v53  ;;  %v2904_v55 = vld [vmem:[%s8429_s3 + $0x1a0] sm:$0x33] }
 0x1b9   :  { %v1196_v61 = vpop.f32.mrf.mxu0  ;;  %v5244_v56 = vcombine.high %v2904_v55, %v2904_v55  ;;  %3249 = vmatprep.subr.bf16.mxu1 %v6101_v3 }
 0x1ba   :  { %5138 = vmatprep.mubr.msk.bf16.mxu1 %vm1341_vm7, %v1250_v58  ;;  %5186 = vmatprep.mubr.msk.bf16.mxu0 %vm1341_vm7, %v1250_v58 }
 0x1bb   :  { %v1198_v62 = vpop.f32.mrf.mxu0  ;;  %1522 = vmatmul.mubr.bf16.gmra.mxu1 %v1249_v59  ;;  %1771 = vmatmul.mubr.bf16.gmra.mxu0 %v1249_v59 }
 0x1bc   :  { %5245 = vmatprep.subr.msk.bf16.mxu0 %vm2420_vm8, %v5244_v56 }
 0x1bd   :  { %v1200_v63 = vpop.f32.mrf.mxu0 }
 0x1be   :  { %v1251_v9 = vpack.c.bf16 %v1200_v63, %v1196_v61  ;;  %v6099_v63 = vld [vmem:[%s8429_s3 + $0xb0] ss:$8 sps:$4 sm:$0xff]  }
 0x1bf   :  { %v1202_v7 = vpop.f32.mrf.mxu0  ;;  %3250 = vmatpush2.bf16.msra.mxu1 %v6099_v63  ;;  %v7271_v63 = vrot.slane %v6247_v31, 4 }
 0x1c0   :  { %v1252_v8 = vpack.c.bf16 %v1202_v7, %v1198_v62  ;;  %v5243_v62 = vcombine.low %v2904_v55, %v2904_v55  ;;  %3251 = vmatprep.subr.bf16.mxu1 %v6104_v13 }
 0x1c1   :  { %v1206_v11 = vpop.f32.mrf.mxu0 }
 0x1c2   :  { %5139 = vmatprep.mubr.msk.bf16.mxu1 %vm1341_vm7, %v1252_v8  ;;  %5187 = vmatprep.mubr.msk.bf16.mxu0 %vm1341_vm7, %v1252_v8  ;;  %v3220_v7 = vsel %vm2420_vm8, %v5243_v62, 0 }
 0x1c3   :  { %v1208_v0 = vpop.f32.mrf.mxu0  ;;  %1530 = vmatmul.mubr.bf16.gmra.mxu1 %v1251_v9  ;;  %1779 = vmatmul.mubr.bf16.gmra.mxu0 %v1251_v9 }
 0x1c4   :  { %3445 = vmatpush2.bf16.msra.mxu0 %v3220_v7  ;;  %3252 = vmatpush2.bf16.msra.mxu1 %v6102_v12 }
 0x1c5   :  { %v1210_v14 = vpop.f32.mrf.mxu0  ;;  %3253 = vmatprep.subr.bf16.mxu1 %v6110_v18 }
 0x1c6   :  { %v1253_v17 = vpack.c.bf16 %v1210_v14, %v1206_v11 }
 0x1c7   :  { %v1212_v15 = vpop.f32.mrf.mxu0 }
 0x1c8   :  { %v1254_v16 = vpack.c.bf16 %v1212_v15, %v1208_v0  ;;  %v6105_v0 = vld [vmem:[%s8429_s3 + $0x190] ss:$8 sps:$4 sm:$0xff]  }
 0x1c9   :  { %v1216_v1 = vpop.f32.mrf.mxu0 }
 0x1ca   :  { %5140 = vmatprep.mubr.msk.bf16.mxu1 %vm1341_vm7, %v1254_v16  ;;  %5188 = vmatprep.mubr.msk.bf16.mxu0 %vm1341_vm7, %v1254_v16  ;;  %v6107_v16 = vld [vmem:[%s8429_s3 + $0x194] ss:$8 sps:$4 sm:$0xff]  }
 0x1cb   :  { %v1218_v20 = vpop.f32.mrf.mxu0  ;;  %1538 = vmatmul.mubr.bf16.gmra.mxu1 %v1253_v17  ;;  %1787 = vmatmul.mubr.bf16.gmra.mxu0 %v1253_v17 }
 0x1cc   :  { %3446 = vmatprep.subr.bf16.mxu0 %v6107_v16 }
 0x1cd   :  { %v1220_v21 = vpop.f32.mrf.mxu0  ;;  %3447 = vmatpush2.bf16.msra.mxu0 %v6105_v0 }
 0x1ce   :  { %v1255_v26 = vpack.c.bf16 %v1220_v21, %v1216_v1  ;;  %v6108_v21 = vld [vmem:[%s8429_s3 + $0x90] ss:$8 sps:$4 sm:$0xff]   ;;  %3448 = vmatprep.subr.bf16.mxu0 %v6113_v34  ;;  %v7292_v34 = vrot.slane %v6247_v31, 2  ;;  %s6248_s3 = smov 40  }
 0x1cf   :  { %v1222_v24 = vpop.f32.mrf.mxu0  ;;  %3254 = vmatpush2.bf16.msra.mxu1 %v6108_v21 }
 0x1d0   :  { %v1256_v25 = vpack.c.bf16 %v1222_v24, %v1218_v20  ;;  %3255 = vmatprep.subr.bf16.mxu1 %v6116_v51 }
 0x1d1   :  { %3449 = vmatpush2.bf16.msra.mxu0 %v6111_v33 }
 0x1d2   :  { %5141 = vmatprep.mubr.msk.bf16.mxu1 %vm1341_vm7, %v1256_v25  ;;  %5189 = vmatprep.mubr.msk.bf16.mxu0 %vm1341_vm7, %v1256_v25 }
 0x1d3   :  { %1546 = vmatmul.mubr.bf16.gmra.mxu1 %v1255_v26  ;;  %1795 = vmatmul.mubr.bf16.gmra.mxu0 %v1255_v26  ;;  %v7237_v26 = vld [vmem:[%s8432_s6] ss:$0 sm:$0xff] }
 0x1d4   :  { %3256 = vmatpush2.bf16.msra.mxu1 %v6114_v50 }
 0x1d5   :  { %4023 = vmatprep.subr.bf16.mxu1 %v6246_v60 }
 0x21b   :  { %v1427_v57 = vpop.f32.mrf.mxu1  ;;  %v1676_v58 = vpop.f32.mrf.mxu0 }
 0x21c   :  { %v1803_v4 = vmax.f32 %v1427_v57, %v1676_v58 }
 0x21d   :  { %v1429_v59 = vpop.f32.mrf.mxu1  ;;  %v1678_v61 = vpop.f32.mrf.mxu0 }
 0x21e   :  { %v1868_v14 = vrot.slane %v1803_v4, 1 }
 0x21f   :  { %v1430_v5 = vpop.f32.mrf.mxu1  ;;  %v1679_v6 = vpop.f32.mrf.mxu0 }
 0x220   :  { %v1804_v8 = vmax.f32 %v1430_v5, %v1679_v6 }
 0x221   :  { %v1432_v9 = vpop.f32.mrf.mxu1  ;;  %v1681_v11 = vpop.f32.mrf.mxu0 }
 0x222   :  { %v1869_v15 = vrot.slane %v1804_v8, 1 }
 0x223   :  { %v1435_v17 = vpop.f32.mrf.mxu1  ;;  %v1684_v1 = vpop.f32.mrf.mxu0 }
 0x224   :  { %v1870_v19 = vsel %vm121_vm0, %v1868_v14, %v1869_v15  ;;  %v1805_v20 = vmax.f32 %v1435_v17, %v1684_v1 }
 0x225   :  { %v1437_v22 = vpop.f32.mrf.mxu1  ;;  %v1686_v23 = vpop.f32.mrf.mxu0  ;;  %v1965_v24 = vmax.f32 %v1803_v4, %v1870_v19 }
 0x226   :  { %v1871_v25 = vrot.slane %v1805_v20, 1 }
 0x227   :  { %v1438_v27 = vpop.f32.mrf.mxu1  ;;  %v1687_v28 = vpop.f32.mrf.mxu0  ;;  %v2002_v38 = vadd.f32 %v7237_v26, %v1965_v24 }
 0x228   :  { %v1872_v29 = vsel %vm121_vm0, %v1869_v15, %v1871_v25  ;;  %v1806_v30 = vmax.f32 %v1438_v27, %v1687_v28 }
 0x229   :  { %v1966_v35 = vmax.f32 %v1804_v8, %v1872_v29  ;;  %v1440_v36 = vpop.f32.mrf.mxu1  ;;  %v1689_v37 = vpop.f32.mrf.mxu0  ;;  %v7256_v48 = vmax.f32 %v2002_v38, 0.0 }
 0x22a   :  { %v1873_v39 = vrot.slane %v1806_v30, 1  ;;  %v7298_v37 = vrot.slane %v6247_v31, 6 }
 0x22b   :  { %v2003_v40 = vadd.f32 %v7237_v26, %v1966_v35  ;;  %v1443_v41 = vpop.f32.mrf.mxu1  ;;  %v1692_v2 = vpop.f32.mrf.mxu0  ;;  %v2259_v6 = vrot.slane %v7256_v48, 4  ;;  %v2098_v11 = vrot.slane %v7256_v48, 2  ;;  %v2421_v29 = vrot.slane %v7256_v48, 6 }
 0x22c   :  { %v1874_v10 = vsel %vm121_vm0, %v1871_v25, %v1873_v39  ;;  %v1876_v42 = vsel %vm121_vm0, %v1873_v39, %v7241_v32  ;;  %v1807_v49 = vmax.f32 %v1443_v41, %v1692_v2 }
 0x22d   :  { %v7254_v43 = vmax.f32 %v2003_v40, 0.0  ;;  %v1967_v44 = vmax.f32 %v1805_v20, %v1874_v10  ;;  %v1968_v45 = vmax.f32 %v1806_v30, %v1876_v42  ;;  %v1445_v46 = vpop.f32.mrf.mxu1  ;;  %v1694_v47 = vpop.f32.mrf.mxu0 }
 0x22e   :  { %v1877_v4 = vrot.slane %v1807_v49, 1 }
 0x22f   :  { %v2004_v52 = vadd.f32 %v7237_v26, %v1967_v44  ;;  %v2005_v53 = vadd.f32 %v7237_v26, %v1968_v45  ;;  %v1446_v54 = vpop.f32.mrf.mxu1  ;;  %v1695_v55 = vpop.f32.mrf.mxu0  ;;  %v2260_v57 = vrot.slane %v7254_v43, 4  ;;  %v2099_v62 = vrot.slane %v7254_v43, 2 }
 0x230   :  { %v1808_v56 = vmax.f32 %v1446_v54, %v1695_v55  ;;  %v2422_v16 = vrot.slane %v7254_v43, 6 }
 0x231   :  { %v7267_v58 = vmax.f32 %v2004_v52, 0.0  ;;  %v1448_v59 = vpop.f32.mrf.mxu1  ;;  %v1697_v61 = vpop.f32.mrf.mxu0  ;;  %v7273_v3 = vmax.f32 %v2005_v53, 0.0  ;;  %v2261_v15 = vsel %vm628_vm4, %v2259_v6, %v2260_v57  ;;  %v2100_v20 = vsel %vm290_vm2, %v2098_v11, %v2099_v62 }
 0x232   :  { %v1878_v5 = vrot.slane %v1808_v56, 1  ;;  %v2423_v10 = vsel %vm2420_vm8, %v2421_v29, %v2422_v16 }
 0x233   :  { %v1451_v7 = vpop.f32.mrf.mxu1  ;;  %v1700_v8 = vpop.f32.mrf.mxu0  ;;  %v2262_v9 = vrot.slane %v7267_v58, 4  ;;  %v2101_v12 = vrot.slane %v7267_v58, 2  ;;  %v2424_v13 = vrot.slane %v7267_v58, 6  ;;  %v2264_v25 = vrot.slane %v7273_v3, 4 }
 0x234   :  { %v1879_v0 = vsel %vm121_vm0, %v1877_v4, %v1878_v5  ;;  %v1809_v14 = vmax.f32 %v1451_v7, %v1700_v8  ;;  %v2103_v33 = vrot.slane %v7273_v3, 2  ;;  %v5695_v2 = vpack.i.bf16 %v7267_v58, %v7254_v43 }
 0x235   :  { %v1969_v17 = vmax.f32 %v1807_v49, %v1879_v0  ;;  %v1453_v1 = vpop.f32.mrf.mxu1  ;;  %v1702_v18 = vpop.f32.mrf.mxu0  ;;  %v2263_v19 = vsel %vm628_vm4, %v2260_v57, %v2262_v9  ;;  %v2102_v21 = vsel %vm290_vm2, %v2099_v62, %v2101_v12  ;;  %v2425_v30 = vsel %vm2420_vm8, %v2422_v16, %v2424_v13 }
 0x236   :  { %v1880_v22 = vrot.slane %v1809_v14, 1  ;;  %v5690_v23 = vpack.i.bf16 %v2263_v19, %v2261_v15  ;;  %v5685_v24 = vpack.i.bf16 %v2102_v21, %v2100_v20  ;;  %v5700_v44 = vpack.i.bf16 %v2425_v30, %v2423_v10 }
 0x237   :  { %v1454_v27 = vpop.f32.mrf.mxu1  ;;  %v1703_v28 = vpop.f32.mrf.mxu0  ;;  %v2006_v38 = vadd.f32 %v7237_v26, %v1969_v17  ;;  %v2265_v45 = vsel %vm628_vm4, %v2262_v9, %v2264_v25  ;;  %v2426_v46 = vrot.slane %v7273_v3, 6  ;;  %v2267_v51 = vsel %vm628_vm4, %v2264_v25, %v7271_v63 }
 0x238   :  { %v1881_v35 = vsel %vm121_vm0, %v1878_v5, %v1880_v22  ;;  %v1810_v36 = vmax.f32 %v1454_v27, %v1703_v28  ;;  %5691 = vrot.lane.b32.xlu1 %v5690_v23, %s6248_s3  ;;  %5686 = vrot.lane.b32.xlu0 %v5685_v24, %s6249_s13  ;;  %v2104_v52 = vsel %vm290_vm2, %v2101_v12, %v2103_v33 }
 0x239   :  { %v1970_v39 = vmax.f32 %v1808_v56, %v1881_v35  ;;  %v1456_v40 = vpop.f32.mrf.mxu1  ;;  %v1705_v41 = vpop.f32.mrf.mxu0  ;;  %v2106_v53 = vsel %vm290_vm2, %v2103_v33, %v7292_v34  ;;  %v7317_v56 = vmax.f32 %v2006_v38, 0.0  ;;  %v5710_v6 = vpack.i.bf16 %v2267_v51, %v2265_v45 }
 0x23a   :  { %v1882_v42 = vrot.slane %v1810_v36, 1  ;;  %v5705_v7 = vpack.i.bf16 %v2106_v53, %v2104_v52  ;;  %v2427_v8 = vsel %vm2420_vm8, %v2424_v13, %v2426_v46  ;;  %v2429_v15 = vsel %vm2420_vm8, %v2426_v46, %v7298_v37 }
 0x23b   :  { %v2007_v47 = vadd.f32 %v7237_v26, %v1970_v39  ;;  %v1459_v49 = vpop.f32.mrf.mxu1  ;;  %v1708_v50 = vpop.f32.mrf.mxu0  ;;  %v5715_v20 = vpack.i.bf16 %v6247_v31, %v7273_v3  ;;  %v2268_v21 = vrot.slane %v7317_v56, 4  ;;  %v5720_v24 = vpack.i.bf16 %v2429_v15, %v2427_v8 }
 0x23c   :  { %v1883_v54 = vsel %vm121_vm0, %v1880_v22, %v1882_v42  ;;  %v1884_v55 = vsel %vm121_vm0, %v1882_v42, %v7241_v32  ;;  %5696 = vrot.lane.b32.xlu1 %v5695_v2, %s6250_s1  ;;  %5701 = vrot.lane.b32.xlu0 %v5700_v44, %s6251_s4  ;;  %v1811_v5 = vmax.f32 %v1459_v49, %v1708_v50  ;;  %v2107_v25 = vrot.slane %v7317_v56, 2 }
 0x23d   :  { %v7319_v57 = vmax.f32 %v2007_v47, 0.0  ;;  %v1971_v59 = vmax.f32 %v1809_v14, %v1883_v54  ;;  %v1972_v61 = vmax.f32 %v1810_v36, %v1884_v55  ;;  %v1461_v62 = vpop.f32.mrf.mxu1  ;;  %v1710_v4 = vpop.f32.mrf.mxu0  ;;  %v2430_v50 = vrot.slane %v7317_v56, 6 }
 0x23e   :  { %v1885_v22 = vrot.slane %v1811_v5, 1 }
 0x23f   :  { %v2008_v9 = vadd.f32 %v7237_v26, %v1971_v59  ;;  %v2009_v11 = vadd.f32 %v7237_v26, %v1972_v61  ;;  %v1462_v12 = vpop.f32.mrf.mxu1  ;;  %v1711_v0 = vpop.f32.mrf.mxu0  ;;  %v2269_v16 = vrot.slane %v7319_v57, 4  ;;  %v2108_v17 = vrot.slane %v7319_v57, 2 }
 0x240   :  { %v1812_v14 = vmax.f32 %v1462_v12, %v1711_v0  ;;  %5711 = vrot.lane.b32.xlu1 %v5710_v6, %s6248_s3  ;;  %5706 = vrot.lane.b32.xlu0 %v5705_v7, %s6249_s13  ;;  %v2431_v40 = vrot.slane %v7319_v57, 6 }
 0x241   :  { %v7330_v1 = vmax.f32 %v2008_v9, 0.0  ;;  %v7332_v13 = vmax.f32 %v2009_v11, 0.0  ;;  %v1464_v18 = vpop.f32.mrf.mxu1  ;;  %v1713_v19 = vpop.f32.mrf.mxu0  ;;  %v2270_v29 = vsel %vm628_vm4, %v2268_v21, %v2269_v16  ;;  %v2109_v39 = vsel %vm290_vm2, %v2107_v25, %v2108_v17 }
 0x242   :  { %v1886_v23 = vrot.slane %v1812_v14, 1  ;;  %v2432_v61 = vsel %vm2420_vm8, %v2430_v50, %v2431_v40 }
 0x243   :  { %v1467_v27 = vpop.f32.mrf.mxu1  ;;  %v1716_v28 = vpop.f32.mrf.mxu0  ;;  %v2271_v30 = vrot.slane %v7330_v1, 4  ;;  %v2110_v33 = vrot.slane %v7330_v1, 2  ;;  %v2433_v35 = vrot.slane %v7330_v1, 6  ;;  %v2273_v45 = vrot.slane %v7332_v13, 4 }
 0x244   :  { %v1887_v36 = vsel %vm121_vm0, %v1885_v22, %v1886_v23  ;;  %v1813_v38 = vmax.f32 %v1467_v27, %v1716_v28  ;;  %5716 = vrot.lane.b32.xlu1 %v5715_v20, %s6250_s1  ;;  %5721 = vrot.lane.b32.xlu0 %v5720_v24, %s6251_s4  ;;  %v2112_v54 = vrot.slane %v7332_v13, 2  ;;  %v5735_v11 = vpack.i.bf16 %v7330_v1, %v7319_v57 }
 0x245   :  { %v1973_v41 = vmax.f32 %v1811_v5, %v1887_v36  ;;  %v1469_v2 = vpop.f32.mrf.mxu1  ;;  %v1718_v10 = vpop.f32.mrf.mxu0  ;;  %v2272_v42 = vsel %vm628_vm4, %v2269_v16, %v2271_v30  ;;  %v2111_v44 = vsel %vm290_vm2, %v2108_v17, %v2110_v33  ;;  %v2434_v53 = vsel %vm2420_vm8, %v2431_v40, %v2433_v35 }
 0x246   :  { %v1888_v46 = vrot.slane %v1813_v38, 1  ;;  %v5730_v47 = vpack.i.bf16 %v2272_v42, %v2270_v29  ;;  %v5725_v49 = vpack.i.bf16 %v2111_v44, %v2109_v39  ;;  %v2274_v7 = vsel %vm628_vm4, %v2271_v30, %v2273_v45 }
 0x247   :  { %v1470_v51 = vpop.f32.mrf.mxu1  ;;  %v1719_v52 = vpop.f32.mrf.mxu0  ;;  %v2010_v62 = vadd.f32 %v7237_v26, %v1973_v41  ;;  %v2275_v8 = vsel %vm628_vm4, %v2273_v45, %v7271_v63  ;;  %v5740_v12 = vpack.i.bf16 %v2434_v53, %v2432_v61  ;;  %v2435_v0 = vrot.slane %v7332_v13, 6 }
 0x248   :  { %v1889_v55 = vsel %vm121_vm0, %v1886_v23, %v1888_v46  ;;  %v1814_v59 = vmax.f32 %v1470_v51, %v1719_v52  ;;  %5731 = vrot.lane.b32.xlu1 %v5730_v47, %s6248_s3  ;;  %5726 = vrot.lane.b32.xlu0 %v5725_v49, %s6249_s13  ;;  %v2114_v18 = vsel %vm290_vm2, %v2112_v54, %v7292_v34 }
 0x249   :  { %v1974_v4 = vmax.f32 %v1812_v14, %v1889_v55  ;;  %v1472_v5 = vpop.f32.mrf.mxu1  ;;  %v1721_v6 = vpop.f32.mrf.mxu0  ;;  %v2113_v14 = vsel %vm290_vm2, %v2110_v33, %v2112_v54  ;;  %v5750_v21 = vpack.i.bf16 %v2275_v8, %v2274_v7  ;;  %v7373_v22 = vmax.f32 %v2010_v62, 0.0 }
 0x24a   :  { %v1890_v9 = vrot.slane %v1814_v59, 1  ;;  %v5745_v30 = vpack.i.bf16 %v2114_v18, %v2113_v14  ;;  %v2436_v33 = vsel %vm2420_vm8, %v2433_v35, %v2435_v0  ;;  %v2437_v36 = vsel %vm2420_vm8, %v2435_v0, %v7298_v37 }
 0x24b   :  { %v2011_v15 = vadd.f32 %v7237_v26, %v1974_v4  ;;  %v1475_v16 = vpop.f32.mrf.mxu1  ;;  %v1724_v17 = vpop.f32.mrf.mxu0  ;;  %v5755_v47 = vpack.i.bf16 %v2437_v36, %v2436_v33  ;;  %v2276_v49 = vrot.slane %v7373_v22, 4  ;;  %v2115_v53 = vrot.slane %v7373_v22, 2 }
 0x24c   :  { %v1891_v19 = vsel %vm121_vm0, %v1888_v46, %v1890_v9  ;;  %v1892_v20 = vsel %vm121_vm0, %v1890_v9, %v7241_v32  ;;  %5736 = vrot.lane.b32.xlu1 %v5735_v11, %s6250_s1  ;;  %5741 = vrot.lane.b32.xlu0 %v5740_v12, %s6251_s4  ;;  %v1815_v29 = vmax.f32 %v1475_v16, %v1724_v17 }
 0x24d   :  { %v7375_v23 = vmax.f32 %v2011_v15, 0.0  ;;  %v1975_v24 = vmax.f32 %v1813_v38, %v1891_v19  ;;  %v1976_v25 = vmax.f32 %v1814_v59, %v1892_v20  ;;  %v1477_v27 = vpop.f32.mrf.mxu1  ;;  %v1726_v28 = vpop.f32.mrf.mxu0  ;;  %v2438_v19 = vrot.slane %v7373_v22, 6 }
 0x24e   :  { %v1893_v50 = vrot.slane %v1815_v29, 1 }
 0x24f   :  { %v2012_v39 = vadd.f32 %v7237_v26, %v1975_v24  ;;  %v2013_v40 = vadd.f32 %v7237_v26, %v1976_v25  ;;  %v1478_v41 = vpop.f32.mrf.mxu1  ;;  %v1727_v2 = vpop.f32.mrf.mxu0  ;;  %v2277_v10 = vrot.slane %v7375_v23, 4  ;;  %v2116_v38 = vrot.slane %v7375_v23, 2 }
 0x250   :  { %v1816_v42 = vmax.f32 %v1478_v41, %v1727_v2  ;;  %5751 = vrot.lane.b32.xlu1 %v5750_v21, %s6248_s3  ;;  %5746 = vrot.lane.b32.xlu0 %v5745_v30, %s6249_s13  ;;  %v5760_v52 = vpack.i.bf16 %v7375_v23, %v7332_v13  ;;  %v2439_v8 = vrot.slane %v7375_v23, 6 }
 0x251   :  { %v7386_v44 = vmax.f32 %v2012_v39, 0.0  ;;  %v7388_v35 = vmax.f32 %v2013_v40, 0.0  ;;  %v1480_v45 = vpop.f32.mrf.mxu1  ;;  %v1729_v46 = vpop.f32.mrf.mxu0  ;;  %v2278_v59 = vsel %vm628_vm4, %v2276_v49, %v2277_v10  ;;  %v2117_v7 = vsel %vm290_vm2, %v2115_v53, %v2116_v38 }
 0x252   :  { %v1894_v51 = vrot.slane %v1816_v42, 1 }
 0x253   :  { %v1483_v54 = vpop.f32.mrf.mxu1  ;;  %v1732_v55 = vpop.f32.mrf.mxu0  ;;  %v2279_v61 = vrot.slane %v7386_v44, 4  ;;  %v2118_v62 = vrot.slane %v7386_v44, 2  ;;  %v2441_v4 = vrot.slane %v7386_v44, 6  ;;  %v2281_v16 = vrot.slane %v7388_v35, 4 }
 0x254   :  { %v1895_v5 = vsel %vm121_vm0, %v1893_v50, %v1894_v51  ;;  %v1817_v6 = vmax.f32 %v1483_v54, %v1732_v55  ;;  %5756 = vrot.lane.b32.xlu0 %v5755_v47, %s6251_s4  ;;  %5761 = vrot.lane.b32.xlu1 %v5760_v52, %s6250_s1  ;;  %v2120_v25 = vrot.slane %v7388_v35, 2  ;;  %v2443_v45 = vrot.slane %v7388_v35, 6 }
 0x255   :  { %v1977_v9 = vmax.f32 %v1815_v29, %v1895_v5  ;;  %v1485_v11 = vpop.f32.mrf.mxu1  ;;  %v1734_v12 = vpop.f32.mrf.mxu0  ;;  %v2280_v0 = vsel %vm628_vm4, %v2277_v10, %v2279_v61  ;;  %v2119_v15 = vsel %vm290_vm2, %v2116_v38, %v2118_v62  ;;  %v2442_v24 = vsel %vm2420_vm8, %v2439_v8, %v2441_v4 }
 0x256   :  { %v1896_v17 = vrot.slane %v1817_v6, 1  ;;  %v5770_v14 = vpack.i.bf16 %v2280_v0, %v2278_v59  ;;  %v5765_v18 = vpack.i.bf16 %v2119_v15, %v2117_v7  ;;  %v2440_v29 = vsel %vm2420_vm8, %v2438_v19, %v2439_v8 }
 0x257   :  { %v1486_v20 = vpop.f32.mrf.mxu1  ;;  %v1735_v21 = vpop.f32.mrf.mxu0  ;;  %v2014_v30 = vadd.f32 %v7237_v26, %v1977_v9  ;;  %v2282_v40 = vsel %vm628_vm4, %v2279_v61, %v2281_v16  ;;  %v2283_v41 = vsel %vm628_vm4, %v2281_v16, %v7271_v63  ;;  %v5775_v10 = vpack.i.bf16 %v7388_v35, %v7386_v44 }
 0x258   :  { %v1897_v27 = vsel %vm121_vm0, %v1894_v51, %v1896_v17  ;;  %v1818_v28 = vmax.f32 %v1486_v20, %v1735_v21  ;;  %5771 = vrot.lane.b32.xlu1 %v5770_v14, %s6248_s3  ;;  %5766 = vrot.lane.b32.xlu0 %v5765_v18, %s6249_s13  ;;  %v5780_v38 = vpack.i.bf16 %v2442_v24, %v2440_v29 }
 0x259   :  { %v1978_v33 = vmax.f32 %v1816_v42, %v1897_v27  ;;  %v1488_v36 = vpop.f32.mrf.mxu1  ;;  %v1737_v39 = vpop.f32.mrf.mxu0  ;;  %v2121_v42 = vsel %vm290_vm2, %v2118_v62, %v2120_v25  ;;  %v2122_v50 = vsel %vm290_vm2, %v2120_v25, %v7292_v34  ;;  %v5790_v53 = vpack.i.bf16 %v2283_v41, %v2282_v40 }
 0x25a   :  { %v1898_v2 = vrot.slane %v1818_v28, 1  ;;  %v7429_v54 = vmax.f32 %v2014_v30, 0.0  ;;  %v5785_v8 = vpack.i.bf16 %v2122_v50, %v2121_v42  ;;  %v2444_v9 = vsel %vm2420_vm8, %v2441_v4, %v2443_v45 }
 0x25b   :  { %v2015_v46 = vadd.f32 %v7237_v26, %v1978_v33  ;;  %v1491_v47 = vpop.f32.mrf.mxu1  ;;  %v1740_v49 = vpop.f32.mrf.mxu0  ;;  %v2445_v11 = vsel %vm2420_vm8, %v2443_v45, %v7298_v37 }
 0x25c   :  { %v1899_v51 = vsel %vm121_vm0, %v1896_v17, %v1898_v2  ;;  %v1900_v52 = vsel %vm121_vm0, %v1898_v2, %v7241_v32  ;;  %5776 = vrot.lane.b32.xlu1 %v5775_v10, %s6250_s1  ;;  %5781 = vrot.lane.b32.xlu0 %v5780_v38, %s6251_s4  ;;  %v1819_v7 = vmax.f32 %v1491_v47, %v1740_v49  ;;  %v2284_v27 = vrot.slane %v7429_v54, 4 }
 0x25d   :  { %v7431_v55 = vmax.f32 %v2015_v46, 0.0  ;;  %v1979_v59 = vmax.f32 %v1817_v6, %v1899_v51  ;;  %v1980_v61 = vmax.f32 %v1818_v28, %v1900_v52  ;;  %v1493_v62 = vpop.f32.mrf.mxu1  ;;  %v1742_v5 = vpop.f32.mrf.mxu0  ;;  %v5795_v21 = vpack.i.bf16 %v2445_v11, %v2444_v9 }
 0x25e   :  { %v1901_v24 = vrot.slane %v1819_v7, 1  ;;  %v2123_v28 = vrot.slane %v7429_v54, 2 }
 0x25f   :  { %v2016_v12 = vadd.f32 %v7237_v26, %v1979_v59  ;;  %v2017_v0 = vadd.f32 %v7237_v26, %v1980_v61  ;;  %v1494_v15 = vpop.f32.mrf.mxu1  ;;  %v1743_v16 = vpop.f32.mrf.mxu0  ;;  %v2285_v6 = vrot.slane %v7431_v55, 4  ;;  %v2124_v14 = vrot.slane %v7431_v55, 2 }
 0x260   :  { %v1820_v17 = vmax.f32 %v1494_v15, %v1743_v16  ;;  %5791 = vrot.lane.b32.xlu1 %v5790_v53, %s6248_s3  ;;  %5786 = vrot.lane.b32.xlu0 %v5785_v8, %s6249_s13  ;;  %v2447_v39 = vrot.slane %v7431_v55, 6  ;;  %v2446_v59 = vrot.slane %v7429_v54, 6 }
 0x261   :  { %v7442_v18 = vmax.f32 %v2016_v12, 0.0  ;;  %v7444_v4 = vmax.f32 %v2017_v0, 0.0  ;;  %v1496_v19 = vpop.f32.mrf.mxu1  ;;  %v1745_v20 = vpop.f32.mrf.mxu0  ;;  %v2286_v10 = vsel %vm628_vm4, %v2284_v27, %v2285_v6  ;;  %v2125_v38 = vsel %vm290_vm2, %v2123_v28, %v2124_v14 }
 0x262   :  { %v1902_v25 = vrot.slane %v1820_v17, 1  ;;  %v2448_v11 = vsel %vm2420_vm8, %v2446_v59, %v2447_v39 }
 0x263   :  { %v1499_v29 = vpop.f32.mrf.mxu1  ;;  %v1748_v30 = vpop.f32.mrf.mxu0  ;;  %v2287_v33 = vrot.slane %v7442_v18, 4  ;;  %v2126_v36 = vrot.slane %v7442_v18, 2  ;;  %v2449_v40 = vrot.slane %v7442_v18, 6  ;;  %v2289_v50 = vrot.slane %v7444_v4, 4 }
 0x264   :  { %v1903_v41 = vsel %vm121_vm0, %v1901_v24, %v1902_v25  ;;  %v1821_v2 = vmax.f32 %v1499_v29, %v1748_v30  ;;  %5796 = vrot.lane.b32.xlu0 %v5795_v21, %s6251_s4  ;;  %v2128_v8 = vrot.slane %v7444_v4, 2  ;;  %v5810_v20 = vpack.i.bf16 %v7442_v18, %v7431_v55 }
 0x265   :  { %v1981_v45 = vmax.f32 %v1819_v7, %v1903_v41  ;;  %v1501_v46 = vpop.f32.mrf.mxu1  ;;  %v1750_v47 = vpop.f32.mrf.mxu0  ;;  %v2288_v49 = vsel %vm628_vm4, %v2285_v6, %v2287_v33  ;;  %v2127_v42 = vsel %vm290_vm2, %v2124_v14, %v2126_v36  ;;  %v2450_v5 = vsel %vm2420_vm8, %v2447_v39, %v2449_v40 }
 0x266   :  { %v1904_v51 = vrot.slane %v1821_v2, 1  ;;  %v5805_v52 = vpack.i.bf16 %v2288_v49, %v2286_v10  ;;  %v5800_v53 = vpack.i.bf16 %v2127_v42, %v2125_v38  ;;  %v2290_v6 = vsel %vm628_vm4, %v2287_v33, %v2289_v50 }
 0x267   :  { %v1502_v61 = vpop.f32.mrf.mxu1  ;;  %v1751_v62 = vpop.f32.mrf.mxu0  ;;  %v2018_v12 = vadd.f32 %v7237_v26, %v1981_v45  ;;  %v2291_v14 = vsel %vm628_vm4, %v2289_v50, %v7271_v63  ;;  %v5815_v21 = vpack.i.bf16 %v2450_v5, %v2448_v11  ;;  %v2451_v24 = vrot.slane %v7444_v4, 6 }
 0x268   :  { %v1905_v7 = vsel %vm121_vm0, %v1902_v25, %v1904_v51  ;;  %v1822_v9 = vmax.f32 %v1502_v61, %v1751_v62  ;;  %5806 = vrot.lane.b32.xlu0 %v5805_v52, %s6248_s3  ;;  %5801 = vrot.lane.b32.xlu1 %v5800_v53, %s6249_s13  ;;  %v2130_v29 = vsel %vm290_vm2, %v2128_v8, %v7292_v34 }
 0x269   :  { %v1982_v0 = vmax.f32 %v1820_v17, %v1905_v7  ;;  %v1504_v15 = vpop.f32.mrf.mxu1  ;;  %v1753_v16 = vpop.f32.mrf.mxu0  ;;  %v2129_v17 = vsel %vm290_vm2, %v2126_v36, %v2128_v8  ;;  %v5825_v39 = vpack.i.bf16 %v2291_v14, %v2290_v6  ;;  %v7482_v41 = vmax.f32 %v2018_v12, 0.0 }
 0x26a   :  { %v1906_v19 = vrot.slane %v1822_v9, 1  ;;  %v5820_v49 = vpack.i.bf16 %v2130_v29, %v2129_v17  ;;  %v2452_v42 = vsel %vm2420_vm8, %v2449_v40, %v2451_v24  ;;  %v2453_v50 = vsel %vm2420_vm8, %v2451_v24, %v7298_v37 }
 0x26b   :  { %v2019_v25 = vadd.f32 %v7237_v26, %v1982_v0  ;;  %v1507_v27 = vpop.f32.mrf.mxu1  ;;  %v1756_v28 = vpop.f32.mrf.mxu0  ;;  %v2292_v11 = vrot.slane %v7482_v41, 4  ;;  %v2131_v16 = vrot.slane %v7482_v41, 2 }
 0x26c   :  { %v1907_v30 = vsel %vm121_vm0, %v1904_v51, %v1906_v19  ;;  %v1908_v33 = vsel %vm121_vm0, %v1906_v19, %v7241_v32  ;;  %5811 = vrot.lane.b32.xlu0 %v5810_v20, %s6250_s1  ;;  %5816 = vrot.lane.b32.xlu1 %v5815_v21, %s6251_s4  ;;  %v1823_v47 = vmax.f32 %v1507_v27, %v1756_v28 }
 0x26d   :  { %v7484_v10 = vmax.f32 %v2019_v25, 0.0  ;;  %v1983_v38 = vmax.f32 %v1821_v2, %v1907_v30  ;;  %v1984_v45 = vmax.f32 %v1822_v9, %v1908_v33  ;;  %v1509_v36 = vpop.f32.mrf.mxu1  ;;  %v1758_v46 = vpop.f32.mrf.mxu0  ;;  %v5830_v9 = vpack.i.bf16 %v2453_v50, %v2452_v42 }
 0x26e   :  { %v1909_v12 = vrot.slane %v1823_v47, 1  ;;  %v2454_v42 = vrot.slane %v7482_v41, 6 }
 0x26f   :  { %v2020_v51 = vadd.f32 %v7237_v26, %v1983_v38  ;;  %v2021_v52 = vadd.f32 %v7237_v26, %v1984_v45  ;;  %v1510_v53 = vpop.f32.mrf.mxu1  ;;  %v1759_v59 = vpop.f32.mrf.mxu0  ;;  %v2293_v61 = vrot.slane %v7484_v10, 4  ;;  %v2132_v2 = vrot.slane %v7484_v10, 2 }
 0x270   :  { %v1824_v62 = vmax.f32 %v1510_v53, %v1759_v59  ;;  %5826 = vrot.lane.b32.xlu0 %v5825_v39, %s6248_s3  ;;  %5821 = vrot.lane.b32.xlu1 %v5820_v49, %s6249_s13  ;;  %v5835_v15 = vpack.i.bf16 %v7484_v10, %v7444_v4  ;;  %v2455_v17 = vrot.slane %v7484_v10, 6 }
 0x271   :  { %v7495_v5 = vmax.f32 %v2020_v51, 0.0  ;;  %v7497_v40 = vmax.f32 %v2021_v52, 0.0  ;;  %v1512_v8 = vpop.f32.mrf.mxu1  ;;  %v1761_v7 = vpop.f32.mrf.mxu0  ;;  %v2294_v19 = vsel %vm628_vm4, %v2292_v11, %v2293_v61  ;;  %v2133_v28 = vsel %vm290_vm2, %v2131_v16, %v2132_v2 }
 0x272   :  { %v1910_v0 = vrot.slane %v1824_v62, 1 }
 0x273   :  { %v1515_v6 = vpop.f32.mrf.mxu1  ;;  %v1764_v14 = vpop.f32.mrf.mxu0  ;;  %v2295_v20 = vrot.slane %v7495_v5, 4  ;;  %v2134_v21 = vrot.slane %v7495_v5, 2  ;;  %v2457_v24 = vrot.slane %v7495_v5, 6  ;;  %v2297_v45 = vrot.slane %v7497_v40, 4 }
 0x274   :  { %v1911_v25 = vsel %vm121_vm0, %v1909_v12, %v1910_v0  ;;  %v1825_v27 = vmax.f32 %v1515_v6, %v1764_v14  ;;  %5831 = vrot.lane.b32.xlu1 %v5830_v9, %s6251_s4  ;;  %5836 = vrot.lane.b32.xlu0 %v5835_v15, %s6250_s1  ;;  %v2136_v53 = vrot.slane %v7497_v40, 2  ;;  %v2459_v6 = vrot.slane %v7497_v40, 6 }
 0x275   :  { %v1985_v29 = vmax.f32 %v1823_v47, %v1911_v25  ;;  %v1517_v30 = vpop.f32.mrf.mxu1  ;;  %v1766_v33 = vpop.f32.mrf.mxu0  ;;  %v2296_v39 = vsel %vm628_vm4, %v2293_v61, %v2295_v20  ;;  %v2135_v38 = vsel %vm290_vm2, %v2132_v2, %v2134_v21  ;;  %v2458_v52 = vsel %vm2420_vm8, %v2455_v17, %v2457_v24 }
 0x276   :  { %v1912_v36 = vrot.slane %v1825_v27, 1  ;;  %v5845_v46 = vpack.i.bf16 %v2296_v39, %v2294_v19  ;;  %v5840_v49 = vpack.i.bf16 %v2135_v38, %v2133_v28  ;;  %v2456_v61 = vsel %vm2420_vm8, %v2454_v42, %v2455_v17 }
 0x277   :  { %v1518_v50 = vpop.f32.mrf.mxu1  ;;  %v1767_v51 = vpop.f32.mrf.mxu0  ;;  %v2022_v2 = vadd.f32 %v7237_v26, %v1985_v29  ;;  %v2298_v11 = vsel %vm628_vm4, %v2295_v20, %v2297_v45  ;;  %v2299_v12 = vsel %vm628_vm4, %v2297_v45, %v7271_v63  ;;  %v5855_v16 = vpack.i.bf16 %v2458_v52, %v2456_v61 }
 0x278   :  { %v1913_v47 = vsel %vm121_vm0, %v1910_v0, %v1912_v36  ;;  %v1826_v59 = vmax.f32 %v1518_v50, %v1767_v51  ;;  %5846 = vrot.lane.b32.xlu0 %v5845_v46, %s6248_s3  ;;  %5841 = vrot.lane.b32.xlu1 %v5840_v49, %s6249_s13  ;;  %v5850_v0 = vpack.i.bf16 %v7497_v40, %v7495_v5 }
 0x279   :  { %v1986_v8 = vmax.f32 %v1824_v62, %v1913_v47  ;;  %v1520_v7 = vpop.f32.mrf.mxu1  ;;  %v1769_v9 = vpop.f32.mrf.mxu0  ;;  %v2137_v62 = vsel %vm290_vm2, %v2134_v21, %v2136_v53  ;;  %v2138_v28 = vsel %vm290_vm2, %v2136_v53, %v7292_v34  ;;  %v5865_v29 = vpack.i.bf16 %v2299_v12, %v2298_v11 }
 0x27a   :  { %v1914_v15 = vrot.slane %v1826_v59, 1  ;;  %v7538_v30 = vmax.f32 %v2022_v2, 0.0  ;;  %v5860_v49 = vpack.i.bf16 %v2138_v28, %v2137_v62  ;;  %v2461_v42 = vsel %vm2420_vm8, %v2459_v6, %v7298_v37 }
 0x27b   :  { %v2023_v14 = vadd.f32 %v7237_v26, %v1986_v8  ;;  %v1523_v19 = vpop.f32.mrf.mxu1  ;;  %v1772_v25 = vpop.f32.mrf.mxu0 }
 0x27c   :  { %v1915_v20 = vsel %vm121_vm0, %v1912_v36, %v1914_v15  ;;  %v1916_v17 = vsel %vm121_vm0, %v1914_v15, %v7241_v32  ;;  %5851 = vrot.lane.b32.xlu0 %v5850_v0, %s6250_s1  ;;  %5856 = vrot.lane.b32.xlu1 %v5855_v16, %s6251_s4  ;;  %v1827_v46 = vmax.f32 %v1523_v19, %v1772_v25  ;;  %v2300_v12 = vrot.slane %v7538_v30, 4 }
 0x27d   :  { %v7540_v33 = vmax.f32 %v2023_v14, 0.0  ;;  %v1987_v39 = vmax.f32 %v1825_v27, %v1915_v20  ;;  %v1988_v38 = vmax.f32 %v1826_v59, %v1916_v17  ;;  %v1525_v21 = vpop.f32.mrf.mxu1  ;;  %v1774_v45 = vpop.f32.mrf.mxu0  ;;  %v2460_v36 = vsel %vm2420_vm8, %v2457_v24, %v2459_v6 }
 0x27e   :  { %v5870_v2 = vpack.i.bf16 %v2461_v42, %v2460_v36  ;;  %v1917_v9 = vrot.slane %v1827_v46, 1  ;;  %v2139_v6 = vrot.slane %v7538_v30, 2 }
 0x27f   :  { %v2024_v50 = vadd.f32 %v7237_v26, %v1987_v39  ;;  %v2025_v51 = vadd.f32 %v7237_v26, %v1988_v38  ;;  %v1526_v52 = vpop.f32.mrf.mxu1  ;;  %v1775_v53 = vpop.f32.mrf.mxu0  ;;  %v2301_v27 = vrot.slane %v7540_v33, 4  ;;  %v2140_v8 = vrot.slane %v7540_v33, 2 }
 0x280   :  { %v1828_v47 = vmax.f32 %v1526_v52, %v1775_v53  ;;  %5866 = vrot.lane.b32.xlu0 %v5865_v29, %s6248_s3  ;;  %5861 = vrot.lane.b32.xlu1 %v5860_v49, %s6249_s13  ;;  %v2463_v20 = vrot.slane %v7540_v33, 6  ;;  %v2462_v53 = vrot.slane %v7538_v30, 6 }
 0x281   :  { %v7550_v59 = vmax.f32 %v2024_v50, 0.0  ;;  %v1528_v61 = vpop.f32.mrf.mxu1  ;;  %v1777_v24 = vpop.f32.mrf.mxu0  ;;  %v7553_v7 = vmax.f32 %v2025_v51, 0.0  ;;  %v2302_v28 = vsel %vm628_vm4, %v2300_v12, %v2301_v27  ;;  %v2141_v21 = vsel %vm290_vm2, %v2139_v6, %v2140_v8 }
 0x282   :  { %v1918_v11 = vrot.slane %v1828_v47, 1 }
 0x283   :  { %v1531_v15 = vpop.f32.mrf.mxu1  ;;  %v1780_v0 = vpop.f32.mrf.mxu0  ;;  %v2303_v16 = vrot.slane %v7550_v59, 4  ;;  %v2142_v14 = vrot.slane %v7550_v59, 2  ;;  %v2465_v19 = vrot.slane %v7550_v59, 6  ;;  %v2305_v50 = vrot.slane %v7553_v7, 4 }
 0x284   :  { %v1919_v25 = vsel %vm121_vm0, %v1917_v9, %v1918_v11  ;;  %v1829_v62 = vmax.f32 %v1531_v15, %v1780_v0  ;;  %5871 = vrot.lane.b32.xlu1 %v5870_v2, %s6251_s4  ;;  %v2464_v0 = vsel %vm2420_vm8, %v2462_v53, %v2463_v20 }
 0x285   :  { %v1989_v17 = vmax.f32 %v1827_v46, %v1919_v25  ;;  %v1533_v29 = vpop.f32.mrf.mxu1  ;;  %v1782_v39 = vpop.f32.mrf.mxu0  ;;  %v2304_v38 = vsel %vm628_vm4, %v2301_v27, %v2303_v16  ;;  %v2143_v45 = vsel %vm290_vm2, %v2140_v8, %v2142_v14  ;;  %v2466_v61 = vsel %vm2420_vm8, %v2463_v20, %v2465_v19 }
 0x286   :  { %v1920_v49 = vrot.slane %v1829_v62, 1  ;;  %v5880_v36 = vpack.i.bf16 %v2304_v38, %v2302_v28  ;;  %v5875_v42 = vpack.i.bf16 %v2143_v45, %v2141_v21  ;;  %v2144_v46 = vrot.slane %v7553_v7, 2 }
 0x287   :  { %v1534_v51 = vpop.f32.mrf.mxu1  ;;  %v1783_v52 = vpop.f32.mrf.mxu0  ;;  %v2026_v24 = vadd.f32 %v7237_v26, %v1989_v17  ;;  %v2467_v8 = vrot.slane %v7553_v7, 6  ;;  %v5885_v25 = vpack.i.bf16 %v7550_v59, %v7540_v33  ;;  %v5890_v28 = vpack.i.bf16 %v2466_v61, %v2464_v0 }
 0x288   :  { %v1921_v27 = vsel %vm121_vm0, %v1918_v11, %v1920_v49  ;;  %v1830_v2 = vmax.f32 %v1534_v51, %v1783_v52  ;;  %5881 = vrot.lane.b32.xlu1 %v5880_v36, %s6248_s3  ;;  %5876 = vrot.lane.b32.xlu0 %v5875_v42, %s6249_s13  ;;  %v2306_v17 = vsel %vm628_vm4, %v2303_v16, %v2305_v50 }
 0x289   :  { %v1990_v9 = vmax.f32 %v1828_v47, %v1921_v27  ;;  %v1536_v12 = vpop.f32.mrf.mxu1  ;;  %v1785_v15 = vpop.f32.mrf.mxu0  ;;  %v2307_v38 = vsel %vm628_vm4, %v2305_v50, %v7271_v63  ;;  %v2145_v47 = vsel %vm290_vm2, %v2142_v14, %v2144_v46  ;;  %v2146_v21 = vsel %vm290_vm2, %v2144_v46, %v7292_v34 }
 0x28a   :  { %v1922_v6 = vrot.slane %v1830_v2, 1  ;;  %v7586_v20 = vmax.f32 %v2026_v24, 0.0  ;;  %v2468_v16 = vsel %vm2420_vm8, %v2465_v19, %v2467_v8  ;;  %v2469_v53 = vsel %vm2420_vm8, %v2467_v8, %v7298_v37 }
 0x28b   :  { %v2027_v11 = vadd.f32 %v7237_v26, %v1990_v9  ;;  %v1539_v29 = vpop.f32.mrf.mxu1  ;;  %v1788_v39 = vpop.f32.mrf.mxu0  ;;  %v5895_v46 = vpack.i.bf16 %v2146_v21, %v2145_v47 }
 0x28c   :  { %v1923_v45 = vsel %vm121_vm0, %v1920_v49, %v1922_v6  ;;  %v1924_v36 = vsel %vm121_vm0, %v1922_v6, %v7241_v32  ;;  %5886 = vrot.lane.b32.xlu1 %v5885_v25, %s6250_s1  ;;  %5891 = vrot.lane.b32.xlu0 %v5890_v28, %s6251_s4  ;;  %v1831_v61 = vmax.f32 %v1539_v29, %v1788_v39  ;;  %v2147_v28 = vrot.slane %v7586_v20, 2 }
 0x28d   :  { %v7594_v42 = vmax.f32 %v2027_v11, 0.0  ;;  %v1991_v50 = vmax.f32 %v1829_v62, %v1923_v45  ;;  %v1992_v14 = vmax.f32 %v1830_v2, %v1924_v36  ;;  %v1541_v51 = vpop.f32.mrf.mxu1  ;;  %v1790_v52 = vpop.f32.mrf.mxu0  ;;  %v5900_v49 = vpack.i.bf16 %v2307_v38, %v2306_v17 }
 0x28e   :  { %v5905_v62 = vpack.i.bf16 %v2469_v53, %v2468_v16  ;;  %v1925_v17 = vrot.slane %v1831_v61, 1  ;;  %v2470_v39 = vrot.slane %v7586_v20, 6 }
 0x28f   :  { %v2028_v24 = vadd.f32 %v7237_v26, %v1991_v50  ;;  %v2029_v27 = vadd.f32 %v7237_v26, %v1992_v14  ;;  %v1542_v9 = vpop.f32.mrf.mxu1  ;;  %v1791_v12 = vpop.f32.mrf.mxu0  ;;  %v2309_v19 = vrot.slane %v7594_v42, 4  ;;  %v2148_v2 = vrot.slane %v7594_v42, 2 }
 0x290   :  { %v1832_v15 = vmax.f32 %v1542_v9, %v1791_v12  ;;  %5901 = vrot.lane.b32.xlu1 %v5900_v49, %s6248_s3  ;;  %5896 = vrot.lane.b32.xlu0 %v5895_v46, %s6249_s13  ;;  %v2308_v26 = vrot.slane %v7586_v20, 4  ;;  %v5910_v29 = vpack.i.bf16 %v7594_v42, %v7553_v7  ;;  %v2471_v52 = vrot.slane %v7594_v42, 6 }
 0x291   :  { %v7604_v8 = vmax.f32 %v2028_v24, 0.0  ;;  %v7606_v0 = vmax.f32 %v2029_v27, 0.0  ;;  %v1544_v6 = vpop.f32.mrf.mxu1  ;;  %v1793_v25 = vpop.f32.mrf.mxu0  ;;  %v2149_v51 = vsel %vm290_vm2, %v2147_v28, %v2148_v2 }
 0x292   :  { %v1926_v11 = vrot.slane %v1832_v15, 1  ;;  %v2310_v21 = vsel %vm628_vm4, %v2308_v26, %v2309_v19 }
 0x293   :  { %v1547_v38 = vpop.f32.mrf.mxu1  ;;  %v1796_v47 = vpop.f32.mrf.mxu0  ;;  %v2311_v45 = vrot.slane %v7604_v8, 4  ;;  %v2150_v36 = vrot.slane %v7604_v8, 2  ;;  %v2473_v16 = vrot.slane %v7604_v8, 6  ;;  %v2313_v9 = vrot.slane %v7606_v0, 4 }
 0x294   :  { %v1927_v50 = vsel %vm121_vm0, %v1925_v17, %v1926_v11  ;;  %v1833_v14 = vmax.f32 %v1547_v38, %v1796_v47  ;;  %5906 = vrot.lane.b32.xlu0 %v5905_v62, %s6251_s4  ;;  %5911 = vrot.lane.b32.xlu1 %v5910_v29, %s6250_s1  ;;  %v2152_v28 = vrot.slane %v7606_v0, 2 }
 0x295   :  { %v1993_v53 = vmax.f32 %v1831_v61, %v1927_v50  ;;  %v1549_v49 = vpop.f32.mrf.mxu1  ;;  %v1798_v46 = vpop.f32.mrf.mxu0  ;;  %v2312_v24 = vsel %vm628_vm4, %v2309_v19, %v2311_v45  ;;  %v2151_v27 = vsel %vm290_vm2, %v2148_v2, %v2150_v36  ;;  %v2474_v62 = vsel %vm2420_vm8, %v2471_v52, %v2473_v16 }
 0x296   :  { %v1928_v12 = vrot.slane %v1833_v14, 1  ;;  %v5920_v6 = vpack.i.bf16 %v2312_v24, %v2310_v21  ;;  %v5915_v25 = vpack.i.bf16 %v2151_v27, %v2149_v51  ;;  %v2472_v19 = vsel %vm2420_vm8, %v2470_v39, %v2471_v52  ;;  %v6218_v51 = vld [vmem:[%s8432_s6] ss:$0 sm:$0xff] }
 0x297   :  { %v1550_v26 = vpop.f32.mrf.mxu1  ;;  %v1799_v17 = vpop.f32.mrf.mxu0  ;;  %v5925_v21 = vpack.i.bf16 %v7606_v0, %v7604_v8  ;;  %v5930_v50 = vpack.i.bf16 %v2474_v62, %v2472_v19  ;;  %v2030_v49 = vadd.f32 %v6218_v51, %v1993_v53  ;;  %v2314_v46 = vsel %vm628_vm4, %v2311_v45, %v2313_v9 }
 0x298   :  { %v1929_v29 = vsel %vm121_vm0, %v1926_v11, %v1928_v12  ;;  %v1834_v61 = vmax.f32 %v1550_v26, %v1799_v17  ;;  %5921 = vrot.lane.b32.xlu1 %v5920_v6, %s6248_s3  ;;  %5916 = vrot.lane.b32.xlu0 %v5915_v25, %s6249_s13  ;;  %v2315_v24 = vsel %vm628_vm4, %v2313_v9, %v7271_v63  ;;  %v2475_v52 = vrot.slane %v7606_v0, 6 }
 0x299   :  { %v1994_v2 = vmax.f32 %v1832_v15, %v1929_v29  ;;  %v1552_v38 = vpop.f32.mrf.mxu1  ;;  %v1801_v47 = vpop.f32.mrf.mxu0  ;;  %v2153_v15 = vsel %vm290_vm2, %v2150_v36, %v2152_v28  ;;  %v2154_v39 = vsel %vm290_vm2, %v2152_v28, %v7292_v34  ;;  %v7650_v62 = vmax.f32 %v2030_v49, 0.0 }
 0x29a   :  { %v1930_v11 = vrot.slane %v1834_v61, 1  ;;  %v5940_v36 = vpack.i.bf16 %v2315_v24, %v2314_v46  ;;  %v5935_v26 = vpack.i.bf16 %v2154_v39, %v2153_v15  ;;  %v2476_v29 = vsel %vm2420_vm8, %v2473_v16, %v2475_v52 }
 0x29b   :  { %v2031_v27 = vadd.f32 %v6218_v51, %v1994_v2  ;;  %v2316_v2 = vrot.slane %v7650_v62, 4  ;;  %v2155_v38 = vrot.slane %v7650_v62, 2  ;;  %v2478_v39 = vrot.slane %v7650_v62, 6 }
 0x29c   :  { %v1931_v6 = vsel %vm121_vm0, %v1928_v12, %v1930_v11  ;;  %v1932_v25 = vsel %vm121_vm0, %v1930_v11, %v7241_v32  ;;  %5926 = vrot.lane.b32.xlu1 %v5925_v21, %s6250_s1  ;;  %5931 = vrot.lane.b32.xlu0 %v5930_v50, %s6251_s4  ;;  %v2477_v12 = vsel %vm2420_vm8, %v2475_v52, %v7298_v37  ;;  %vm4457_vm0 = vcmask 1044484  }
 0x29d   :  { %v7648_v45 = vmax.f32 %v2031_v27, 0.0  ;;  %v1995_v53 = vmax.f32 %v1833_v14, %v1931_v6  ;;  %v1996_v9 = vmax.f32 %v1834_v61, %v1932_v25  ;;  %v5945_v19 = vpack.i.bf16 %v2477_v12, %v2476_v29 }
 0x29f   :  { %v2032_v17 = vadd.f32 %v6218_v51, %v1995_v53  ;;  %v2033_v28 = vadd.f32 %v6218_v51, %v1996_v9  ;;  %v2317_v14 = vrot.slane %v7648_v45, 4  ;;  %v2156_v61 = vrot.slane %v7648_v45, 2 }
 0x2a0   :  { %5941 = vrot.lane.b32.xlu1 %v5940_v36, %s6248_s3  ;;  %5936 = vrot.lane.b32.xlu0 %v5935_v26, %s6249_s13  ;;  %v2479_v51 = vrot.slane %v7648_v45, 6 }
 0x2a1   :  { %v7657_v32 = vmax.f32 %v2032_v17, 0.0  ;;  %v7663_v47 = vmax.f32 %v2033_v28, 0.0  ;;  %v2318_v49 = vsel %vm628_vm4, %v2316_v2, %v2317_v14  ;;  %v2157_v46 = vsel %vm290_vm2, %v2155_v38, %v2156_v61 }
 0x2a2   :  { %v2480_v53 = vsel %vm2420_vm8, %v2478_v39, %v2479_v51 }
 0x2a3   :  { %v2319_v16 = vrot.slane %v7657_v32, 4  ;;  %v2158_v21 = vrot.slane %v7657_v32, 2  ;;  %v2481_v50 = vrot.slane %v7657_v32, 6  ;;  %v2321_v6 = vrot.slane %v7663_v47, 4 }
 0x2a4   :  { %5946 = vrot.lane.b32.xlu0 %v5945_v19, %s6251_s4  ;;  %v2160_v25 = vrot.slane %v7663_v47, 2  ;;  %v5960_v26 = vpack.i.bf16 %v7657_v32, %v7648_v45  ;;  %v2483_v28 = vrot.slane %v7663_v47, 6 }
 0x2a5   :  { %v2320_v11 = vsel %vm628_vm4, %v2317_v14, %v2319_v16  ;;  %v2159_v24 = vsel %vm290_vm2, %v2156_v61, %v2158_v21  ;;  %v2482_v52 = vsel %vm2420_vm8, %v2479_v51, %v2481_v50  ;;  %v2322_v29 = vsel %vm628_vm4, %v2319_v16, %v2321_v6 }
 0x2a6   :  { %v5955_v27 = vpack.i.bf16 %v2320_v11, %v2318_v49  ;;  %v5950_v15 = vpack.i.bf16 %v2159_v24, %v2157_v46  ;;  %v5965_v17 = vpack.i.bf16 %v2482_v52, %v2480_v53  ;;  %v2323_v12 = vsel %vm628_vm4, %v2321_v6, %v7271_v63 }
 0x2a7   :  { %v2161_v14 = vsel %vm290_vm2, %v2158_v21, %v2160_v25  ;;  %v2162_v61 = vsel %vm290_vm2, %v2160_v25, %v7292_v34  ;;  %v5975_v11 = vpack.i.bf16 %v2323_v12, %v2322_v29  ;;  %v2484_v63 = vsel %vm2420_vm8, %v2481_v50, %v2483_v28 }
 0x2a8   :  { %5956 = vrot.lane.b32.xlu0 %v5955_v27, %s6248_s3  ;;  %5951 = vrot.lane.b32.xlu1 %v5950_v15, %s6249_s13  ;;  %v5970_v46 = vpack.i.bf16 %v2162_v61, %v2161_v14  ;;  %v2485_v52 = vsel %vm2420_vm8, %v2483_v28, %v7298_v37  ;;  %vm4466_vm4 = vcmask 1047559  }
 0x2a9   :  { %v5980_v37 = vpack.i.bf16 %v2485_v52, %v2484_v63 }
 0x2aa   :  { %v5692_v9 = vpop.permute.xlu1 %5691  ;;  %v5687_v36 = vpop.permute.xlu0 %5686 }
 0x2ab   :  { %v5694_v19 = vunpack.i.h.bf16 %v5692_v9  ;;  %v5693_v2 = vunpack.i.l.bf16 %v5692_v9  ;;  %v5689_v38 = vunpack.i.h.bf16 %v5687_v36  ;;  %v5688_v51 = vunpack.i.l.bf16 %v5687_v36 }
 0x2ac   :  { %5961 = vrot.lane.b32.xlu0 %v5960_v26, %s6250_s1  ;;  %5966 = vrot.lane.b32.xlu1 %v5965_v17, %s6251_s4 }
 0x2ad   :  { %v2691_v15 = vsel %vm1341_vm7, %v5689_v38, %v5694_v19  ;;  %v2690_v39 = vsel %vm1341_vm7, %v5688_v51, %v5693_v2  ;;  %v2659_v9 = vsel %vm2657_vm9, %v7254_v43, %v5689_v38  ;;  %v2658_v36 = vsel %vm2657_vm9, %v7256_v48, %v5688_v51  ;;  %v6117_v43 = vld [vmem:[#allocation2 + $0x38] sm:$0xff]  }
 0x2ae   :  { %v5697_v49 = vpop.permute.xlu1 %5696  ;;  %v5702_v16 = vpop.permute.xlu0 %5701  ;;  %v2788_v38 = vpack.c.bf16 %v2659_v9, %v2658_v36 }
 0x2af   :  { %v5699_v21 = vunpack.i.h.bf16 %v5697_v49  ;;  %v5698_v24 = vunpack.i.l.bf16 %v5697_v49  ;;  %v5704_v34 = vunpack.i.h.bf16 %v5702_v16  ;;  %v5703_v27 = vunpack.i.l.bf16 %v5702_v16 }
 0x2b0   :  { %5976 = vrot.lane.b32.xlu0 %v5975_v11, %s6248_s3  ;;  %5971 = vrot.lane.b32.xlu1 %v5970_v46, %s6249_s13 }
 0x2b1   :  { %v2791_v6 = vpack.c.bf16 %v5699_v21, %v5698_v24  ;;  %v2757_v25 = vsel %vm2755_vm10, %v5704_v34, %v5699_v21  ;;  %v2756_v50 = vsel %vm2755_vm10, %v5703_v27, %v5698_v24  ;;  %v2723_v53 = vsel %vm2722_vm11, %v2690_v39, %v5703_v27  ;;  %v6118_v24 = vld [vmem:[#allocation2 + $0x30] sm:$0xff]  }
 0x2b2   :  { %v2790_v26 = vpack.c.bf16 %v2757_v25, %v2756_v50  ;;  %v5712_v17 = vpop.permute.xlu1 %5711  ;;  %v5707_v29 = vpop.permute.xlu0 %5706  ;;  %v2724_v12 = vsel %vm2722_vm11, %v2691_v15, %v5704_v34 }
 0x2b3   :  { %v5714_v14 = vunpack.i.h.bf16 %v5712_v17  ;;  %5246 = vmatprep.mubr.msk.bf16.mxu0 %vm3170_vm12, %v2791_v6  ;;  %v5713_v28 = vunpack.i.l.bf16 %v5712_v17  ;;  %v5709_v61 = vunpack.i.h.bf16 %v5707_v29  ;;  %v5708_v19 = vunpack.i.l.bf16 %v5707_v29 }
 0x2b4   :  { %v2789_v2 = vpack.c.bf16 %v2724_v12, %v2723_v53  ;;  %3451 = vmatmul.mubr.bf16.vlgmr.msra.gmra.mxu0 %v2790_v26  ;;  %2630 = vrot.lane.b32.xlu0 %v7663_v47, %s6250_s1 }
 0x2b5   :  { %5981 = vrot.lane.b32.xlu1 %v5980_v37, %s6251_s4  ;;  %v2693_v63 = vsel %vm1341_vm7, %v5709_v61, %v5714_v14  ;;  %v2692_v21 = vsel %vm1341_vm7, %v5708_v19, %v5713_v28  ;;  %v2660_v53 = vsel %vm2657_vm9, %v7267_v58, %v5708_v19  ;;  %v2661_v9 = vsel %vm2657_vm9, %v7273_v3, %v5709_v61  ;;  %v6119_v14 = vld [vmem:[#allocation2 + $0x28] sm:$0xff]  }
 0x2b6   :  { %3257 = vmatprep.mubr.bf16.mxu1 %v2789_v2  ;;  %v5717_v48 = vpop.permute.xlu1 %5716  ;;  %v5722_v51 = vpop.permute.xlu0 %5721  ;;  %v2792_v37 = vpack.c.bf16 %v2661_v9, %v2660_v53  ;;  %v6121_v53 = vld [vmem:[#allocation2 + $0x18] sm:$0xff]  }
 0x2b7   :  { %3258 = vmatmul.mubr.bf16.vlgmr.msra.gmra.mxu1 %v2788_v38  ;;  %v7711_v49 = vunpack.i.h.bf16 %v5717_v48  ;;  %v5718_v16 = vunpack.i.l.bf16 %v5717_v48  ;;  %v5724_v11 = vunpack.i.h.bf16 %v5722_v51  ;;  %v5723_v46 = vunpack.i.l.bf16 %v5722_v51  ;;  %v6120_v48 = vld [vmem:[#allocation2 + $0x20] sm:$0xff]  }
 0x2b8   :  { %4024 = vmatpush1.bf16.msra.mxu1 %v6117_v43 }
 0x2b9   :  { %v2795_v34 = vpack.c.bf16 %v7711_v49, %v5718_v16  ;;  %v2759_v27 = vsel %vm2755_vm10, %v5724_v11, %v7711_v49  ;;  %v2758_v15 = vsel %vm2755_vm10, %v5723_v46, %v5718_v16  ;;  %v2725_v39 = vsel %vm2722_vm11, %v2692_v21, %v5723_v46  ;;  %4025 = vmatprep.subr.bf16.mxu1 %v6246_v60 }
 0x2ba   :  { %v2794_v52 = vpack.c.bf16 %v2759_v27, %v2758_v15  ;;  %v5732_v6 = vpop.permute.xlu1 %5731  ;;  %v5727_v25 = vpop.permute.xlu0 %5726  ;;  %v2726_v50 = vsel %vm2722_vm11, %v2693_v63, %v5724_v11 }
 0x2bb   :  { %v5734_v36 = vunpack.i.h.bf16 %v5732_v6  ;;  %5247 = vmatprep.mubr.msk.bf16.mxu0 %vm3170_vm12, %v2795_v34  ;;  %v5733_v26 = vunpack.i.l.bf16 %v5732_v6  ;;  %v5729_v17 = vunpack.i.h.bf16 %v5727_v25  ;;  %v5728_v29 = vunpack.i.l.bf16 %v5727_v25 }
 0x2bc   :  { %v2793_v12 = vpack.c.bf16 %v2726_v50, %v2725_v39  ;;  %3461 = vmatmul.mubr.bf16.gmra.mxu0 %v2794_v52  ;;  %4026 = vmatpush1.bf16.msra.mxu1 %v6118_v24 }
 0x2bd   :  { %4027 = vmatprep.subr.bf16.mxu1 %v6246_v60  ;;  %v2695_v43 = vsel %vm1341_vm7, %v5729_v17, %v5734_v36  ;;  %v2694_v38 = vsel %vm1341_vm7, %v5728_v29, %v5733_v26  ;;  %v2662_v27 = vsel %vm2657_vm9, %v7317_v56, %v5728_v29  ;;  %v2663_v15 = vsel %vm2657_vm9, %v7319_v57, %v5729_v17 }
 0x2be   :  { %3267 = vmatprep.mubr.bf16.mxu1 %v2793_v12  ;;  %v5737_v28 = vpop.permute.xlu1 %5736  ;;  %v5742_v2 = vpop.permute.xlu0 %5741  ;;  %v2796_v9 = vpack.c.bf16 %v2663_v15, %v2662_v27 }
 0x2bf   :  { %3268 = vmatmul.mubr.bf16.gmra.mxu1 %v2792_v37  ;;  %v5739_v58 = vunpack.i.h.bf16 %v5737_v28  ;;  %v5738_v19 = vunpack.i.l.bf16 %v5737_v28  ;;  %v5744_v3 = vunpack.i.h.bf16 %v5742_v2  ;;  %v5743_v61 = vunpack.i.l.bf16 %v5742_v2 }
 0x2c0   :  { %4028 = vmatpush1.bf16.msra.mxu1 %v6119_v14  ;;  %v6122_v14 = vld [vmem:[#allocation2 + $0x10] sm:$0xff]  }
 0x2c1   :  { %v2799_v51 = vpack.c.bf16 %v5739_v58, %v5738_v19  ;;  %v2761_v16 = vsel %vm2755_vm10, %v5744_v3, %v5739_v58  ;;  %v2760_v11 = vsel %vm2755_vm10, %v5743_v61, %v5738_v19  ;;  %v2727_v46 = vsel %vm2722_vm11, %v2694_v38, %v5743_v61  ;;  %4029 = vmatprep.subr.bf16.mxu1 %v6246_v60 }
 0x2c2   :  { %v2798_v63 = vpack.c.bf16 %v2761_v16, %v2760_v11  ;;  %v5752_v21 = vpop.permute.xlu1 %5751  ;;  %v5747_v24 = vpop.permute.xlu0 %5746  ;;  %v2728_v34 = vsel %vm2722_vm11, %v2695_v43, %v5744_v3 }
 0x2c3   :  { %v5754_v39 = vunpack.i.h.bf16 %v5752_v21  ;;  %5248 = vmatprep.mubr.msk.bf16.mxu0 %vm3170_vm12, %v2799_v51  ;;  %v5753_v52 = vunpack.i.l.bf16 %v5752_v21  ;;  %v5749_v6 = vunpack.i.h.bf16 %v5747_v24  ;;  %v5748_v25 = vunpack.i.l.bf16 %v5747_v24  ;;  %v6123_v21 = vld [vmem:[#allocation2 + $0x8] sm:$0xff]  }
 0x2c4   :  { %v2797_v50 = vpack.c.bf16 %v2728_v34, %v2727_v46  ;;  %3471 = vmatmul.mubr.bf16.gmra.mxu0 %v2798_v63  ;;  %4030 = vmatpush1.bf16.msra.mxu1 %v6120_v48 }
 0x2c5   :  { %4031 = vmatprep.subr.bf16.mxu1 %v6246_v60  ;;  %v2697_v17 = vsel %vm1341_vm7, %v5749_v6, %v5754_v39  ;;  %v2696_v12 = vsel %vm1341_vm7, %v5748_v25, %v5753_v52  ;;  %v2664_v38 = vsel %vm2657_vm9, %v7330_v1, %v5748_v25  ;;  %v2665_v48 = vsel %vm2657_vm9, %v7332_v13, %v5749_v6 }
 0x2c6   :  { %3277 = vmatprep.mubr.bf16.mxu1 %v2797_v50  ;;  %v5757_v36 = vpop.permute.xlu0 %5756  ;;  %v5762_v26 = vpop.permute.xlu1 %5761  ;;  %v2800_v24 = vpack.c.bf16 %v2665_v48, %v2664_v38 }
 0x2c7   :  { %3278 = vmatmul.mubr.bf16.gmra.mxu1 %v2796_v9  ;;  %v5759_v56 = vunpack.i.h.bf16 %v5757_v36  ;;  %v5758_v29 = vunpack.i.l.bf16 %v5757_v36  ;;  %v5763_v57 = vunpack.i.l.bf16 %v5762_v26  ;;  %v5764_v34 = vunpack.i.h.bf16 %v5762_v26 }
 0x2c8   :  { %4032 = vmatpush1.bf16.msra.mxu1 %v6121_v53 }
 0x2c9   :  { %v2763_v37 = vsel %vm2755_vm10, %v5759_v56, %v7711_v49  ;;  %v2762_v28 = vsel %vm2755_vm10, %v5758_v29, %v5763_v57  ;;  %v2803_v2 = vpack.c.bf16 %v7711_v49, %v5763_v57  ;;  %v2729_v58 = vsel %vm2722_vm11, %v2696_v12, %v5758_v29  ;;  %4033 = vmatprep.subr.bf16.mxu1 %v6246_v60 }
 0x2ca   :  { %v2802_v19 = vpack.c.bf16 %v2763_v37, %v2762_v28  ;;  %v5772_v3 = vpop.permute.xlu1 %5771  ;;  %v5767_v61 = vpop.permute.xlu0 %5766  ;;  %v2730_v43 = vsel %vm2722_vm11, %v2697_v17, %v5759_v56 }
 0x2cb   :  { %v5774_v51 = vunpack.i.h.bf16 %v5772_v3  ;;  %5249 = vmatprep.mubr.msk.bf16.mxu0 %vm3170_vm12, %v2803_v2  ;;  %v5773_v16 = vunpack.i.l.bf16 %v5772_v3  ;;  %v5769_v11 = vunpack.i.h.bf16 %v5767_v61  ;;  %v5768_v46 = vunpack.i.l.bf16 %v5767_v61 }
 0x2cc   :  { %v2801_v63 = vpack.c.bf16 %v2730_v43, %v2729_v58  ;;  %3481 = vmatmul.mubr.bf16.gmra.mxu0 %v2802_v19  ;;  %4034 = vmatpush1.bf16.msra.mxu1 %v6122_v14 }
 0x2cd   :  { %4035 = vmatprep.subr.bf16.mxu1 %v6246_v60  ;;  %v2699_v6 = vsel %vm1341_vm7, %v5769_v11, %v5774_v51  ;;  %v2698_v25 = vsel %vm1341_vm7, %v5768_v46, %v5773_v16  ;;  %v2666_v36 = vsel %vm2657_vm9, %v7373_v22, %v5768_v46  ;;  %v2667_v12 = vsel %vm2657_vm9, %v7375_v23, %v5769_v11 }
 0x2ce   :  { %3287 = vmatprep.mubr.bf16.mxu1 %v2801_v63  ;;  %v5777_v27 = vpop.permute.xlu1 %5776  ;;  %v5782_v1 = vpop.permute.xlu0 %5781  ;;  %v2804_v19 = vpack.c.bf16 %v2667_v12, %v2666_v36 }
 0x2cf   :  { %3288 = vmatmul.mubr.bf16.gmra.mxu1 %v2800_v24  ;;  %v5779_v15 = vunpack.i.h.bf16 %v5777_v27  ;;  %v5778_v13 = vunpack.i.l.bf16 %v5777_v27  ;;  %v5784_v39 = vunpack.i.h.bf16 %v5782_v1  ;;  %v5783_v52 = vunpack.i.l.bf16 %v5782_v1 }
 0x2d0   :  { %4036 = vmatpush1.bf16.msra.mxu1 %v6123_v21 }
 0x2d1   :  { %v2807_v50 = vpack.c.bf16 %v5778_v13, %v5764_v34  ;;  %v2765_v53 = vsel %vm2755_vm10, %v5784_v39, %v5778_v13  ;;  %v2764_v9 = vsel %vm2755_vm10, %v5783_v52, %v5764_v34  ;;  %4037 = vmatprep.subr.bf16.mxu1 %v6246_v60  ;;  %v2731_v57 = vsel %vm2722_vm11, %v2698_v25, %v5783_v52 }
 0x2d2   :  { %v2806_v26 = vpack.c.bf16 %v2765_v53, %v2764_v9  ;;  %v5792_v56 = vpop.permute.xlu1 %5791  ;;  %v5787_v29 = vpop.permute.xlu0 %5786  ;;  %v2732_v17 = vsel %vm2722_vm11, %v2699_v6, %v5784_v39  ;;  %v2811_v14 = vpack.c.bf16 %v7711_v49, %v5779_v15 }
 0x2d3   :  { %v5794_v37 = vunpack.i.h.bf16 %v5792_v56  ;;  %5250 = vmatprep.mubr.msk.bf16.mxu0 %vm3170_vm12, %v2807_v50  ;;  %v5793_v28 = vunpack.i.l.bf16 %v5792_v56  ;;  %v5789_v2 = vunpack.i.h.bf16 %v5787_v29  ;;  %v5788_v22 = vunpack.i.l.bf16 %v5787_v29 }
 0x2d4   :  { %v2805_v58 = vpack.c.bf16 %v2732_v17, %v2731_v57  ;;  %3491 = vmatmul.mubr.bf16.gmra.mxu0 %v2806_v26 }
 0x2d5   :  { %5251 = vmatprep.mubr.msk.bf16.mxu0 %vm3170_vm12, %v2811_v14  ;;  %v2701_v23 = vsel %vm1341_vm7, %v5789_v2, %v5794_v37  ;;  %v2700_v38 = vsel %vm1341_vm7, %v5788_v22, %v5793_v28  ;;  %v2668_v34 = vsel %vm2657_vm9, %v7386_v44, %v5788_v22  ;;  %v2669_v27 = vsel %vm2657_vm9, %v7388_v35, %v5789_v2 }
 0x2d6   :  { %3297 = vmatprep.mubr.bf16.mxu1 %v2805_v58  ;;  %v5797_v3 = vpop.permute.xlu0 %5796 }
 0x2d7   :  { %3298 = vmatmul.mubr.bf16.gmra.mxu1 %v2804_v19  ;;  %v5799_v61 = vunpack.i.h.bf16 %v5797_v3  ;;  %v5798_v43 = vunpack.i.l.bf16 %v5797_v3 }
 0x2d9   :  { %v2767_v48 = vsel %vm2755_vm10, %v5799_v61, %v7711_v49  ;;  %v2766_v51 = vsel %vm2755_vm10, %v5798_v43, %v5779_v15  ;;  %v2733_v16 = vsel %vm2722_vm11, %v2700_v38, %v5798_v43  ;;  %v2734_v11 = vsel %vm2722_vm11, %v2701_v23, %v5799_v61 }
 0x2da   :  { %v2810_v46 = vpack.c.bf16 %v2767_v48, %v2766_v51  ;;  %v5807_v63 = vpop.permute.xlu0 %5806  ;;  %v5802_v21 = vpop.permute.xlu1 %5801  ;;  %v2809_v24 = vpack.c.bf16 %v2734_v11, %v2733_v16  ;;  %v2808_v15 = vpack.c.bf16 %v2669_v27, %v2668_v34 }
 0x2db   :  { %v5809_v1 = vunpack.i.h.bf16 %v5807_v63  ;;  %v5808_v13 = vunpack.i.l.bf16 %v5807_v63  ;;  %v5804_v39 = vunpack.i.h.bf16 %v5802_v21  ;;  %v5803_v52 = vunpack.i.l.bf16 %v5802_v21 }
 0x2dc   :  { %3307 = vmatprep.mubr.bf16.mxu1 %v2809_v24  ;;  %3501 = vmatmul.mubr.bf16.gmra.mxu0 %v2810_v46 }
 0x2dd   :  { %v2703_v26 = vsel %vm1341_vm7, %v5804_v39, %v5809_v1  ;;  %v2702_v44 = vsel %vm1341_vm7, %v5803_v52, %v5808_v13  ;;  %v2670_v28 = vsel %vm2657_vm9, %v7429_v54, %v5803_v52  ;;  %v2671_v2 = vsel %vm2657_vm9, %v7431_v55, %v5804_v39 }
 0x2de   :  { %v5812_v6 = vpop.permute.xlu0 %5811  ;;  %v5817_v25 = vpop.permute.xlu1 %5816  ;;  %v2812_v43 = vpack.c.bf16 %v2671_v2, %v2670_v28 }
 0x2df   :  { %3308 = vmatmul.mubr.bf16.gmra.mxu1 %v2808_v15  ;;  %v5814_v50 = vunpack.i.h.bf16 %v5812_v6  ;;  %v5813_v53 = vunpack.i.l.bf16 %v5812_v6  ;;  %v5819_v9 = vunpack.i.h.bf16 %v5817_v25  ;;  %v5818_v36 = vunpack.i.l.bf16 %v5817_v25 }
 0x2e1   :  { %v2815_v56 = vpack.c.bf16 %v5814_v50, %v5813_v53  ;;  %v2769_v35 = vsel %vm2755_vm10, %v5819_v9, %v5814_v50  ;;  %v2768_v29 = vsel %vm2755_vm10, %v5818_v36, %v5813_v53  ;;  %v2735_v57 = vsel %vm2722_vm11, %v2702_v44, %v5818_v36 }
 0x2e2   :  { %v2814_v17 = vpack.c.bf16 %v2769_v35, %v2768_v29  ;;  %v5827_v12 = vpop.permute.xlu0 %5826  ;;  %v5822_v14 = vpop.permute.xlu1 %5821  ;;  %v2736_v37 = vsel %vm2722_vm11, %v2703_v26, %v5819_v9 }
 0x2e3   :  { %v5829_v22 = vunpack.i.h.bf16 %v5827_v12  ;;  %5252 = vmatprep.mubr.msk.bf16.mxu0 %vm3170_vm12, %v2815_v56  ;;  %v5828_v58 = vunpack.i.l.bf16 %v5827_v12  ;;  %v5824_v19 = vunpack.i.h.bf16 %v5822_v14  ;;  %v5823_v3 = vunpack.i.l.bf16 %v5822_v14 }
 0x2e4   :  { %v2813_v61 = vpack.c.bf16 %v2736_v37, %v2735_v57  ;;  %3511 = vmatmul.mubr.bf16.gmra.mxu0 %v2814_v17 }
 0x2e5   :  { %v2705_v54 = vsel %vm1341_vm7, %v5824_v19, %v5829_v22  ;;  %v2704_v55 = vsel %vm1341_vm7, %v5823_v3, %v5828_v58  ;;  %v2672_v13 = vsel %vm2657_vm9, %v7442_v18, %v5823_v3  ;;  %v2673_v39 = vsel %vm2657_vm9, %v7444_v4, %v5824_v19 }
 0x2e6   :  { %3317 = vmatprep.mubr.bf16.mxu1 %v2813_v61  ;;  %v5832_v23 = vpop.permute.xlu1 %5831  ;;  %v5837_v38 = vpop.permute.xlu0 %5836  ;;  %v2816_v53 = vpack.c.bf16 %v2673_v39, %v2672_v13 }
 0x2e7   :  { %3318 = vmatmul.mubr.bf16.gmra.mxu1 %v2812_v43  ;;  %v5834_v48 = vunpack.i.h.bf16 %v5832_v23  ;;  %v5833_v51 = vunpack.i.l.bf16 %v5832_v23  ;;  %v5838_v16 = vunpack.i.l.bf16 %v5837_v38  ;;  %v5839_v9 = vunpack.i.h.bf16 %v5837_v38 }
 0x2e9   :  { %v2771_v11 = vsel %vm2755_vm10, %v5834_v48, %v7711_v49  ;;  %v2770_v46 = vsel %vm2755_vm10, %v5833_v51, %v5838_v16  ;;  %v2819_v63 = vpack.c.bf16 %v7711_v49, %v5838_v16  ;;  %v2737_v21 = vsel %vm2722_vm11, %v2704_v55, %v5833_v51 }
 0x2ea   :  { %v2818_v24 = vpack.c.bf16 %v2771_v11, %v2770_v46  ;;  %v5847_v34 = vpop.permute.xlu0 %5846  ;;  %v5842_v27 = vpop.permute.xlu1 %5841  ;;  %v2738_v1 = vsel %vm2722_vm11, %v2705_v54, %v5834_v48 }
 0x2eb   :  { %v5849_v52 = vunpack.i.h.bf16 %v5847_v34  ;;  %5253 = vmatprep.mubr.msk.bf16.mxu0 %vm3170_vm12, %v2819_v63  ;;  %v5848_v15 = vunpack.i.l.bf16 %v5847_v34  ;;  %v5844_v6 = vunpack.i.h.bf16 %v5842_v27  ;;  %v5843_v25 = vunpack.i.l.bf16 %v5842_v27 }
 0x2ec   :  { %v2817_v50 = vpack.c.bf16 %v2738_v1, %v2737_v21  ;;  %3521 = vmatmul.mubr.bf16.gmra.mxu0 %v2818_v24 }
 0x2ed   :  { %v2707_v4 = vsel %vm1341_vm7, %v5844_v6, %v5849_v52  ;;  %v2706_v29 = vsel %vm1341_vm7, %v5843_v25, %v5848_v15  ;;  %v2674_v14 = vsel %vm2657_vm9, %v7482_v41, %v5843_v25  ;;  %v2675_v19 = vsel %vm2657_vm9, %v7484_v10, %v5844_v6 }
 0x2ee   :  { %3327 = vmatprep.mubr.bf16.mxu1 %v2817_v50  ;;  %v5852_v36 = vpop.permute.xlu0 %5851  ;;  %v5857_v26 = vpop.permute.xlu1 %5856  ;;  %v2820_v41 = vpack.c.bf16 %v2675_v19, %v2674_v14 }
 0x2ef   :  { %3328 = vmatmul.mubr.bf16.gmra.mxu1 %v2816_v53  ;;  %v5854_v44 = vunpack.i.h.bf16 %v5852_v36  ;;  %v5853_v56 = vunpack.i.l.bf16 %v5852_v36  ;;  %v5859_v18 = vunpack.i.h.bf16 %v5857_v26  ;;  %v5858_v35 = vunpack.i.l.bf16 %v5857_v26 }
 0x2f1   :  { %v2823_v57 = vpack.c.bf16 %v5853_v56, %v5839_v9  ;;  %v2773_v17 = vsel %vm2755_vm10, %v5859_v18, %v5853_v56  ;;  %v2772_v12 = vsel %vm2755_vm10, %v5858_v35, %v5839_v9  ;;  %v2739_v22 = vsel %vm2722_vm11, %v2706_v29, %v5858_v35 }
 0x2f2   :  { %v2822_v37 = vpack.c.bf16 %v2773_v17, %v2772_v12  ;;  %v5867_v28 = vpop.permute.xlu0 %5866  ;;  %v5862_v2 = vpop.permute.xlu1 %5861  ;;  %v2740_v58 = vsel %vm2722_vm11, %v2707_v4, %v5859_v18  ;;  %v2827_v3 = vpack.c.bf16 %v7711_v49, %v5854_v44 }
 0x2f3   :  { %v5869_v61 = vunpack.i.h.bf16 %v5867_v28  ;;  %5254 = vmatprep.mubr.msk.bf16.mxu0 %vm3170_vm12, %v2823_v57  ;;  %v5868_v43 = vunpack.i.l.bf16 %v5867_v28  ;;  %v5864_v23 = vunpack.i.h.bf16 %v5862_v2  ;;  %v5863_v38 = vunpack.i.l.bf16 %v5862_v2 }
 0x2f4   :  { %v2821_v48 = vpack.c.bf16 %v2740_v58, %v2739_v22  ;;  %3531 = vmatmul.mubr.bf16.gmra.mxu0 %v2822_v37  ;;  %v6124_v22 = vld [vmem:[#allocation2] sm:$0xff]  }
 0x2f5   :  { %5255 = vmatprep.mubr.msk.bf16.mxu0 %vm3170_vm12, %v2827_v3  ;;  %v2709_v10 = vsel %vm1341_vm7, %v5864_v23, %v5869_v61  ;;  %v2708_v55 = vsel %vm1341_vm7, %v5863_v38, %v5868_v43  ;;  %v2676_v13 = vsel %vm2657_vm9, %v7495_v5, %v5863_v38  ;;  %v2677_v39 = vsel %vm2657_vm9, %v7497_v40, %v5864_v23 }
 0x2f6   :  { %3337 = vmatprep.mubr.bf16.mxu1 %v2821_v48  ;;  %v5872_v51 = vpop.permute.xlu1 %5871  ;;  %v2824_v50 = vpack.c.bf16 %v2677_v39, %v2676_v13  ;;  %4038 = vmatpush1.bf16.msra.mxu1 %v6124_v22 }
 0x2f7   :  { %3338 = vmatmul.mubr.bf16.gmra.mxu1 %v2820_v41  ;;  %v5874_v16 = vunpack.i.h.bf16 %v5872_v51  ;;  %v5873_v54 = vunpack.i.l.bf16 %v5872_v51  ;;  %4051 = vmatprep.subr.bf16.mxu1 %v6246_v60  ;;  %v6125_v41 = vld [vmem:[#allocation2 + $0x48] sm:$0xff]  }
 0x2f9   :  { %v2775_v11 = vsel %vm2755_vm10, %v5874_v16, %v7711_v49  ;;  %v2774_v46 = vsel %vm2755_vm10, %v5873_v54, %v5854_v44  ;;  %v2741_v63 = vsel %vm2722_vm11, %v2708_v55, %v5873_v54  ;;  %v2742_v21 = vsel %vm2722_vm11, %v2709_v10, %v5874_v16 }
 0x2fa   :  { %v2826_v24 = vpack.c.bf16 %v2775_v11, %v2774_v46  ;;  %v5882_v34 = vpop.permute.xlu1 %5881  ;;  %v5877_v27 = vpop.permute.xlu0 %5876  ;;  %v2825_v1 = vpack.c.bf16 %v2742_v21, %v2741_v63  ;;  %4052 = vmatpush2.bf16.msra.mxu1 %v6125_v41 }
 0x2fb   :  { %v5884_v52 = vunpack.i.h.bf16 %v5882_v34  ;;  %v5883_v15 = vunpack.i.l.bf16 %v5882_v34  ;;  %v5879_v6 = vunpack.i.h.bf16 %v5877_v27  ;;  %v5878_v25 = vunpack.i.l.bf16 %v5877_v27  ;;  %4053 = vmatprep.subr.bf16.mxu1 %v6246_v60 }
 0x2fc   :  { %3347 = vmatprep.mubr.bf16.mxu1 %v2825_v1  ;;  %3541 = vmatmul.mubr.bf16.gmra.mxu0 %v2826_v24  ;;  %v6126_v1 = vld [vmem:[#allocation2 + $0x40] sm:$0xff]  }
 0x2fd   :  { %v2711_v18 = vsel %vm1341_vm7, %v5879_v6, %v5884_v52  ;;  %v2710_v5 = vsel %vm1341_vm7, %v5878_v25, %v5883_v15  ;;  %v2678_v37 = vsel %vm2657_vm9, %v7538_v30, %v5878_v25  ;;  %v2679_v28 = vsel %vm2657_vm9, %v7540_v33, %v5879_v6 }
 0x2fe   :  { %v5887_v53 = vpop.permute.xlu1 %5886  ;;  %v5892_v9 = vpop.permute.xlu0 %5891  ;;  %v2828_v43 = vpack.c.bf16 %v2679_v28, %v2678_v37  ;;  %4054 = vmatpush2.bf16.msra.mxu1 %v6126_v1 }
 0x2ff   :  { %3348 = vmatmul.mubr.bf16.gmra.mxu1 %v2824_v50  ;;  %v5889_v36 = vunpack.i.h.bf16 %v5887_v53  ;;  %v5888_v26 = vunpack.i.l.bf16 %v5887_v53  ;;  %v5894_v44 = vunpack.i.h.bf16 %v5892_v9  ;;  %v5893_v56 = vunpack.i.l.bf16 %v5892_v9  ;;  %4233 = vmatprep.subr.bf16.mxu1 %v6246_v60 }
 0x301   :  { %v2831_v35 = vpack.c.bf16 %v5889_v36, %v5888_v26  ;;  %v2777_v40 = vsel %vm2755_vm10, %v5894_v44, %v5889_v36  ;;  %v2776_v4 = vsel %vm2755_vm10, %v5893_v56, %v5888_v26  ;;  %v2743_v29 = vsel %vm2722_vm11, %v2710_v5, %v5893_v56 }
 0x302   :  { %v2830_v57 = vpack.c.bf16 %v2777_v40, %v2776_v4  ;;  %v5902_v17 = vpop.permute.xlu1 %5901  ;;  %v5897_v12 = vpop.permute.xlu0 %5896  ;;  %v2744_v14 = vsel %vm2722_vm11, %v2711_v18, %v5894_v44 }
 0x303   :  { %v5904_v2 = vunpack.i.h.bf16 %v5902_v17  ;;  %5256 = vmatprep.mubr.msk.bf16.mxu0 %vm3170_vm12, %v2831_v35  ;;  %v5903_v58 = vunpack.i.l.bf16 %v5902_v17  ;;  %v5899_v19 = vunpack.i.h.bf16 %v5897_v12  ;;  %v5898_v3 = vunpack.i.l.bf16 %v5897_v12 }
 0x304   :  { %v2829_v61 = vpack.c.bf16 %v2744_v14, %v2743_v29  ;;  %3551 = vmatmul.mubr.bf16.gmra.mxu0 %v2830_v57 }
 0x305   :  { %v2713_v51 = vsel %vm1341_vm7, %v5899_v19, %v5904_v2  ;;  %v2712_v16 = vsel %vm1341_vm7, %v5898_v3, %v5903_v58  ;;  %v2680_v34 = vsel %vm2657_vm9, %v7550_v59, %v5898_v3  ;;  %v2681_v27 = vsel %vm2657_vm9, %v7553_v7, %v5899_v19 }
 0x306   :  { %3357 = vmatprep.mubr.bf16.mxu1 %v2829_v61  ;;  %v5907_v23 = vpop.permute.xlu0 %5906  ;;  %v5912_v38 = vpop.permute.xlu1 %5911  ;;  %v2832_v25 = vpack.c.bf16 %v2681_v27, %v2680_v34 }
 0x307   :  { %3358 = vmatmul.mubr.bf16.gmra.mxu1 %v2828_v43  ;;  %v5909_v30 = vunpack.i.h.bf16 %v5907_v23  ;;  %v5908_v48 = vunpack.i.l.bf16 %v5907_v23  ;;  %v5913_v33 = vunpack.i.l.bf16 %v5912_v38  ;;  %v5914_v50 = vunpack.i.h.bf16 %v5912_v38 }
 0x309   :  { %v2779_v54 = vsel %vm2755_vm10, %v5909_v30, %v7711_v49  ;;  %v2778_v10 = vsel %vm2755_vm10, %v5908_v48, %v5913_v33  ;;  %v2835_v55 = vpack.c.bf16 %v7711_v49, %v5913_v33  ;;  %v2745_v11 = vsel %vm2722_vm11, %v2712_v16, %v5908_v48 }
 0x30a   :  { %v2834_v46 = vpack.c.bf16 %v2779_v54, %v2778_v10  ;;  %v5922_v63 = vpop.permute.xlu1 %5921  ;;  %v5917_v21 = vpop.permute.xlu0 %5916  ;;  %v2746_v24 = vsel %vm2722_vm11, %v2713_v51, %v5909_v30 }
 0x30b   :  { %5257 = vmatprep.mubr.msk.bf16.mxu0 %vm3170_vm12, %v2835_v55  ;;  %v5924_v13 = vunpack.i.h.bf16 %v5922_v63  ;;  %v5919_v39 = vunpack.i.h.bf16 %v5917_v21  ;;  %v2833_v52 = vpack.c.bf16 %v2746_v24, %v2745_v11  ;;  %v5923_v15 = vunpack.i.l.bf16 %v5922_v63 }
 0x30c   :  { %3561 = vmatmul.mubr.bf16.gmra.mxu0 %v2834_v46  ;;  %v5918_v6 = vunpack.i.l.bf16 %v5917_v21 }
 0x30d   :  { %3367 = vmatprep.mubr.bf16.mxu1 %v2833_v52  ;;  %v2683_v44 = vsel %vm2657_vm9, %v7594_v42, %v5919_v39  ;;  %v2715_v56 = vsel %vm1341_vm7, %v5919_v39, %v5924_v13 }
 0x30e   :  { %v5927_v53 = vpop.permute.xlu1 %5926  ;;  %v5932_v59 = vpop.permute.xlu0 %5931  ;;  %v2714_v18 = vsel %vm1341_vm7, %v5918_v6, %v5923_v15  ;;  %v2682_v4 = vsel %vm2657_vm9, %v7586_v20, %v5918_v6 }
 0x30f   :  { %3368 = vmatmul.mubr.bf16.gmra.mxu1 %v2832_v25  ;;  %v5929_v7 = vunpack.i.h.bf16 %v5927_v53  ;;  %v5928_v9 = vunpack.i.l.bf16 %v5927_v53  ;;  %v5934_v36 = vunpack.i.h.bf16 %v5932_v59  ;;  %v5933_v26 = vunpack.i.l.bf16 %v5932_v59 }
 0x310   :  { %v2836_v19 = vpack.c.bf16 %v2683_v44, %v2682_v4 }
 0x311   :  { %v2839_v5 = vpack.c.bf16 %v5928_v9, %v5914_v50  ;;  %v2781_v35 = vsel %vm2755_vm10, %v5934_v36, %v5928_v9  ;;  %v2780_v40 = vsel %vm2755_vm10, %v5933_v26, %v5914_v50  ;;  %v2747_v12 = vsel %vm2722_vm11, %v2714_v18, %v5933_v26 }
 0x312   :  { %v2838_v29 = vpack.c.bf16 %v2781_v35, %v2780_v40  ;;  %v5942_v57 = vpop.permute.xlu1 %5941  ;;  %v5937_v17 = vpop.permute.xlu0 %5936  ;;  %v2748_v14 = vsel %vm2722_vm11, %v2715_v56, %v5934_v36  ;;  %v2843_v42 = vpack.c.bf16 %v7711_v49, %v5929_v7 }
 0x313   :  { %v5944_v37 = vunpack.i.h.bf16 %v5942_v57  ;;  %5258 = vmatprep.mubr.msk.bf16.mxu0 %vm3170_vm12, %v2839_v5  ;;  %v5943_v28 = vunpack.i.l.bf16 %v5942_v57  ;;  %v5939_v2 = vunpack.i.h.bf16 %v5937_v17  ;;  %v5938_v22 = vunpack.i.l.bf16 %v5937_v17 }
 0x314   :  { %v2837_v58 = vpack.c.bf16 %v2748_v14, %v2747_v12  ;;  %3571 = vmatmul.mubr.bf16.gmra.mxu0 %v2838_v29 }
 0x315   :  { %5259 = vmatprep.mubr.msk.bf16.mxu0 %vm3170_vm12, %v2843_v42  ;;  %v2717_v43 = vsel %vm1341_vm7, %v5939_v2, %v5944_v37  ;;  %v2716_v23 = vsel %vm1341_vm7, %v5938_v22, %v5943_v28  ;;  %v2685_v41 = vsel %vm2657_vm9, %v7606_v0, %v5939_v2  ;;  %v2684_v51 = vsel %vm2657_vm9, %v7604_v8, %v5938_v22 }
 0x316   :  { %3377 = vmatprep.mubr.bf16.mxu1 %v2837_v58  ;;  %v5947_v20 = vpop.permute.xlu0 %5946  ;;  %v2840_v24 = vpack.c.bf16 %v2685_v41, %v2684_v51 }
 0x317   :  { %3378 = vmatmul.mubr.bf16.gmra.mxu1 %v2836_v19  ;;  %v5949_v3 = vunpack.i.h.bf16 %v5947_v20  ;;  %v5948_v61 = vunpack.i.l.bf16 %v5947_v20 }
 0x319   :  { %v2783_v38 = vsel %vm2755_vm10, %v5949_v3, %v7711_v49  ;;  %v2782_v30 = vsel %vm2755_vm10, %v5948_v61, %v5929_v7  ;;  %v2749_v48 = vsel %vm2722_vm11, %v2716_v23, %v5948_v61  ;;  %v2750_v33 = vsel %vm2722_vm11, %v2717_v43, %v5949_v3 }
 0x31a   :  { %v2842_v16 = vpack.c.bf16 %v2783_v38, %v2782_v30  ;;  %v5957_v54 = vpop.permute.xlu0 %5956  ;;  %v5952_v10 = vpop.permute.xlu1 %5951  ;;  %v2841_v55 = vpack.c.bf16 %v2750_v33, %v2749_v48 }
 0x31b   :  { %v5959_v11 = vunpack.i.h.bf16 %v5957_v54  ;;  %v5958_v46 = vunpack.i.l.bf16 %v5957_v54  ;;  %v5954_v63 = vunpack.i.h.bf16 %v5952_v10  ;;  %v5953_v21 = vunpack.i.l.bf16 %v5952_v10 }
 0x31c   :  { %3387 = vmatprep.mubr.bf16.mxu1 %v2841_v55  ;;  %3581 = vmatmul.mubr.bf16.gmra.mxu0 %v2842_v16 }
 0x31d   :  { %v2687_v8 = vsel %vm2657_vm9, %v7648_v45, %v5954_v63  ;;  %v2719_v52 = vsel %vm1341_vm7, %v5954_v63, %v5959_v11  ;;  %v2686_v15 = vsel %vm2657_vm9, %v7650_v62, %v5953_v21  ;;  %v2718_v6 = vsel %vm1341_vm7, %v5953_v21, %v5958_v46 }
 0x31e   :  { %v5962_v34 = vpop.permute.xlu0 %5961  ;;  %v5967_v27 = vpop.permute.xlu1 %5966  ;;  %v2844_v45 = vpack.c.bf16 %v2687_v8, %v2686_v15 }
 0x31f   :  { %3388 = vmatmul.mubr.bf16.gmra.mxu1 %v2840_v24  ;;  %v5964_v1 = vunpack.i.h.bf16 %v5962_v34  ;;  %v5963_v13 = vunpack.i.l.bf16 %v5962_v34  ;;  %v5969_v0 = vunpack.i.h.bf16 %v5967_v27  ;;  %v5968_v39 = vunpack.i.l.bf16 %v5967_v27 }
 0x321   :  { %v2847_v25 = vpack.c.bf16 %v5964_v1, %v5963_v13  ;;  %v2785_v50 = vsel %vm2755_vm10, %v5969_v0, %v5964_v1  ;;  %v2784_v53 = vsel %vm2755_vm10, %v5968_v39, %v5963_v13  ;;  %v2751_v59 = vsel %vm2722_vm11, %v2718_v6, %v5968_v39 }
 0x322   :  { %v2846_v7 = vpack.c.bf16 %v2785_v50, %v2784_v53  ;;  %v5977_v9 = vpop.permute.xlu0 %5976  ;;  %v5972_v36 = vpop.permute.xlu1 %5971  ;;  %v2752_v26 = vsel %vm2722_vm11, %v2719_v52, %v5969_v0 }
 0x323   :  { %5260 = vmatprep.mubr.msk.bf16.mxu0 %vm3170_vm12, %v2847_v25  ;;  %v2845_v44 = vpack.c.bf16 %v2752_v26, %v2751_v59  ;;  %v5979_v62 = vunpack.i.h.bf16 %v5977_v9  ;;  %v5978_v56 = vunpack.i.l.bf16 %v5977_v9  ;;  %v5974_v18 = vunpack.i.h.bf16 %v5972_v36 }
 0x324   :  { %3591 = vmatmul.mubr.bf16.gmra.mxu0 %v2846_v7  ;;  %v5973_v5 = vunpack.i.l.bf16 %v5972_v36 }
 0x325   :  { %3397 = vmatprep.mubr.bf16.mxu1 %v2845_v44  ;;  %v2689_v17 = vsel %vm2657_vm9, %v7663_v47, %v5974_v18  ;;  %v2721_v12 = vsel %vm1341_vm7, %v5974_v18, %v5979_v62  ;;  %v6127_v18 = vld [vmem:[#allocation2 + $0x88] sm:$0xff]  }
 0x326   :  { %v2631_v35 = vpop.permute.xlu0 %2630  ;;  %v2688_v14 = vsel %vm2657_vm9, %v7657_v32, %v5973_v5  ;;  %v2720_v42 = vsel %vm1341_vm7, %v5973_v5, %v5978_v56  ;;  %vm4767_vm7 = vcmask 130048  }
 0x327   :  { %3398 = vmatmul.mubr.bf16.gmra.mxu1 %v2844_v45  ;;  %v2851_v40 = vpack.c.bf16 %v7711_v49, %v2631_v35  ;;  %v5982_v4 = vpop.permute.xlu1 %5981  ;;  %v2848_v19 = vpack.c.bf16 %v2689_v17, %v2688_v14 }
 0x328   :  { %v5984_v29 = vunpack.i.h.bf16 %v5982_v4  ;;  %v5983_v57 = vunpack.i.l.bf16 %v5982_v4 }
 0x329   :  { %5261 = vmatprep.mubr.msk.bf16.mxu0 %vm3170_vm12, %v2851_v40 }
 0x32a   :  { %v2787_v37 = vsel %vm2755_vm10, %v5984_v29, %v7711_v49  ;;  %v2786_v28 = vsel %vm2755_vm10, %v5983_v57, %v2631_v35  ;;  %v2753_v2 = vsel %vm2722_vm11, %v2720_v42, %v5983_v57  ;;  %v2754_v22 = vsel %vm2722_vm11, %v2721_v12, %v5984_v29 }
 0x32b   :  { %v2850_v58 = vpack.c.bf16 %v2787_v37, %v2786_v28  ;;  %v2849_v47 = vpack.c.bf16 %v2754_v22, %v2753_v2  ;;  %v6128_v37 = vld [vmem:[#allocation2 + $0x80] sm:$0xff]  }
 0x32d   :  { %3407 = vmatprep.mubr.bf16.mxu1 %v2849_v47  ;;  %3601 = vmatmul.mubr.bf16.gmra.mxu0 %v2850_v58 }
 0x32f   :  { %3408 = vmatmul.mubr.bf16.gmra.mxu1 %v2848_v19 }
 0x374   :  { %v3452_v32 = vpop.f32.mrf.mxu0 }
 0x376   :  { %v3454_v20 = vpop.f32.mrf.mxu0 }
 0x377   :  { %v3259_v3 = vpop.f32.mrf.mxu1 }
 0x378   :  { %v3456_v61 = vpop.f32.mrf.mxu0  ;;  %v3453_v16 = vadd.f32 %v3452_v32, %v3259_v3 }
 0x379   :  { %v3261_v43 = vpop.f32.mrf.mxu1 }
 0x37a   :  { %v3458_v23 = vpop.f32.mrf.mxu0  ;;  %v3455_v33 = vadd.f32 %v3454_v20, %v3261_v43  ;;  %v3675_v1 = vrot.slane %v3453_v16, 2 }
 0x37b   :  { %v3263_v38 = vpop.f32.mrf.mxu1 }
 0x37c   :  { %v3462_v49 = vpop.f32.mrf.mxu0  ;;  %v3457_v30 = vadd.f32 %v3456_v61, %v3263_v38  ;;  %v3678_v21 = vrot.slane %v3455_v33, 2 }
 0x37d   :  { %v3265_v48 = vpop.f32.mrf.mxu1 }
 0x37e   :  { %v3459_v41 = vadd.f32 %v3458_v23, %v3265_v48  ;;  %v3464_v51 = vpop.f32.mrf.mxu0  ;;  %v3676_v46 = vrot.slane %v3457_v30, 2 }
 0x37f   :  { %v3269_v54 = vpop.f32.mrf.mxu1 }
 0x380   :  { %v3679_v10 = vrot.slane %v3459_v41, 2  ;;  %v7904_v55 = vadd.f32 %v3462_v49, %v3269_v54  ;;  %v3466_v11 = vpop.f32.mrf.mxu0  ;;  %v3677_v15 = vsel %vm290_vm2, %v3675_v1, %v3676_v46  ;;  %v6129_v49 = vld [vmem:[#allocation2 + $0x78] sm:$0xff]   ;;  %v6130_v1 = vld [vmem:[#allocation2 + $0x70] sm:$0xff]  }
 0x381   :  { %v3271_v63 = vpop.f32.mrf.mxu1  ;;  %v3835_v36 = vmax.f32 %v3453_v16, %v3677_v15 }
 0x382   :  { %v3681_v24 = vrot.slane %v7904_v55, 2  ;;  %v7907_v34 = vadd.f32 %v3464_v51, %v3271_v63  ;;  %v3468_v27 = vpop.f32.mrf.mxu0  ;;  %v3680_v0 = vsel %vm290_vm2, %v3678_v21, %v3679_v10 }
 0x383   :  { %v3273_v13 = vpop.f32.mrf.mxu1  ;;  %v3836_v59 = vmax.f32 %v3455_v33, %v3680_v0 }
 0x384   :  { %v3682_v39 = vsel %vm290_vm2, %v3676_v46, %v3681_v24  ;;  %v3683_v8 = vrot.slane %v7907_v34, 2  ;;  %v3472_v52 = vpop.f32.mrf.mxu0  ;;  %v3467_v44 = vadd.f32 %v3466_v11, %v3273_v13 }
 0x385   :  { %v3275_v6 = vpop.f32.mrf.mxu1  ;;  %v3837_v25 = vmax.f32 %v3457_v30, %v3682_v39 }
 0x386   :  { %v3684_v50 = vsel %vm290_vm2, %v3679_v10, %v3683_v8  ;;  %v3474_v53 = vpop.f32.mrf.mxu0  ;;  %v3469_v26 = vadd.f32 %v3468_v27, %v3275_v6  ;;  %v3685_v14 = vrot.slane %v3467_v44, 2 }
 0x387   :  { %v3838_v7 = vmax.f32 %v3459_v41, %v3684_v50  ;;  %v3279_v9 = vpop.f32.mrf.mxu1  ;;  %v7916_v5 = vpack.c.bf16 %v3837_v25, %v3835_v36 }
 0x388   :  { %v3476_v45 = vpop.f32.mrf.mxu0  ;;  %v3473_v35 = vadd.f32 %v3472_v52, %v3279_v9  ;;  %v3687_v29 = vrot.slane %v3469_v26, 2  ;;  %v3686_v43 = vsel %vm290_vm2, %v3681_v24, %v3685_v14 }
 0x389   :  { %v3281_v62 = vpop.f32.mrf.mxu1  ;;  %v7914_v56 = vpack.c.bf16 %v3838_v7, %v3836_v59  ;;  %v3839_v10 = vmax.f32 %v7904_v55, %v3686_v43 }
 0x38a   :  { %v3478_v40 = vpop.f32.mrf.mxu0  ;;  %v3475_v57 = vadd.f32 %v3474_v53, %v3281_v62  ;;  %v3689_v28 = vrot.slane %v3473_v35, 2  ;;  %v3688_v19 = vsel %vm290_vm2, %v3683_v8, %v3687_v29  ;;  %v6131_v53 = vld [vmem:[#allocation2 + $0x68] sm:$0xff]  }
 0x38b   :  { %v3283_v4 = vpop.f32.mrf.mxu1  ;;  %5272 = vmatprep.mubr.msk.bf16.mxu1 %vm733_vm3, %v7914_v56  ;;  %v3840_v51 = vmax.f32 %v7907_v34, %v3688_v19 }
 0x38c   :  { %v7920_v17 = vadd.f32 %v3476_v45, %v3283_v4  ;;  %4056 = vmatmul.mubr.bf16.vlgmr.msra.gmra.mxu1 %v7916_v5  ;;  %v3482_v12 = vpop.f32.mrf.mxu0  ;;  %v3692_v32 = vrot.slane %v3475_v57, 2  ;;  %v6132_v4 = vld [vmem:[#allocation2 + $0x60] sm:$0xff]  }
 0x38d   :  { %v3285_v42 = vpop.f32.mrf.mxu1  ;;  %4234 = vmatpush1.bf16.msra.mxu1 %v6127_v18 }
 0x38e   :  { %v3690_v2 = vrot.slane %v7920_v17, 2  ;;  %v3479_v22 = vadd.f32 %v3478_v40, %v3285_v42  ;;  %v3484_v58 = vpop.f32.mrf.mxu0  ;;  %4235 = vmatprep.subr.bf16.mxu1 %v6246_v60 }
 0x38f   :  { %v3289_v47 = vpop.f32.mrf.mxu1 }
 0x390   :  { %v3691_v20 = vsel %vm290_vm2, %v3689_v28, %v3690_v2  ;;  %v3693_v3 = vrot.slane %v3479_v22, 2  ;;  %v3486_v61 = vpop.f32.mrf.mxu0  ;;  %v3483_v23 = vadd.f32 %v3482_v12, %v3289_v47  ;;  %v6133_v47 = vld [vmem:[#allocation2 + $0x58] sm:$0xff]  }
 0x391   :  { %v3291_v38 = vpop.f32.mrf.mxu1  ;;  %4236 = vmatpush1.bf16.msra.mxu1 %v6128_v37  ;;  %v3841_v30 = vmax.f32 %v3473_v35, %v3691_v20 }
 0x392   :  { %v3694_v48 = vsel %vm290_vm2, %v3692_v32, %v3693_v3  ;;  %v3485_v33 = vadd.f32 %v3484_v58, %v3291_v38  ;;  %v3488_v41 = vpop.f32.mrf.mxu0  ;;  %4237 = vmatprep.subr.bf16.mxu1 %v6246_v60  ;;  %v3695_v21 = vrot.slane %v3483_v23, 2 }
 0x393   :  { %v3842_v16 = vmax.f32 %v3475_v57, %v3694_v48  ;;  %v3293_v54 = vpop.f32.mrf.mxu1  ;;  %v7934_v8 = vpack.c.bf16 %v3841_v30, %v3839_v10 }
 0x394   :  { %v3697_v11 = vrot.slane %v3485_v33, 2  ;;  %v3487_v46 = vadd.f32 %v3486_v61, %v3293_v54  ;;  %v3492_v63 = vpop.f32.mrf.mxu0  ;;  %v3696_v25 = vsel %vm290_vm2, %v3690_v2, %v3695_v21 }
 0x395   :  { %v3295_v24 = vpop.f32.mrf.mxu1  ;;  %v7932_v27 = vpack.c.bf16 %v3842_v16, %v3840_v51  ;;  %4238 = vmatpush1.bf16.msra.mxu1 %v6129_v49  ;;  %v3843_v44 = vmax.f32 %v7920_v17, %v3696_v25 }
 0x396   :  { %v3699_v13 = vrot.slane %v3487_v46, 2  ;;  %v3489_v0 = vadd.f32 %v3488_v41, %v3295_v24  ;;  %v3494_v39 = vpop.f32.mrf.mxu0  ;;  %4239 = vmatprep.subr.bf16.mxu1 %v6246_v60  ;;  %v3698_v55 = vsel %vm290_vm2, %v3693_v3, %v3697_v11  ;;  %v6134_v41 = vld [vmem:[#allocation2 + $0x50] sm:$0xff]  }
 0x397   :  { %v3299_v34 = vpop.f32.mrf.mxu1  ;;  %5273 = vmatprep.mubr.msk.bf16.mxu1 %vm733_vm3, %v7932_v27  ;;  %v3844_v36 = vmax.f32 %v3479_v22, %v3698_v55 }
 0x398   :  { %v3700_v52 = vsel %vm290_vm2, %v3695_v21, %v3699_v13  ;;  %v3701_v15 = vrot.slane %v3489_v0, 2  ;;  %4064 = vmatmul.mubr.bf16.gmra.mxu1 %v7934_v8  ;;  %v3496_v6 = vpop.f32.mrf.mxu0  ;;  %v3493_v42 = vadd.f32 %v3492_v63, %v3299_v34 }
 0x399   :  { %v3301_v50 = vpop.f32.mrf.mxu1  ;;  %4240 = vmatpush1.bf16.msra.mxu1 %v6130_v1  ;;  %v3845_v59 = vmax.f32 %v3483_v23, %v3700_v52 }
 0x39a   :  { %v3702_v7 = vsel %vm290_vm2, %v3697_v11, %v3701_v15  ;;  %v3498_v9 = vpop.f32.mrf.mxu0  ;;  %4241 = vmatprep.subr.bf16.mxu1 %v6246_v60  ;;  %v3495_v29 = vadd.f32 %v3494_v39, %v3301_v50  ;;  %v3703_v61 = vrot.slane %v3493_v42, 2  ;;  %v6135_v39 = vld [vmem:[#allocation2 + $0x98] sm:$0xff]  }
 0x39b   :  { %v3846_v26 = vmax.f32 %v3485_v33, %v3702_v7  ;;  %v3303_v45 = vpop.f32.mrf.mxu1  ;;  %v7948_v14 = vpack.c.bf16 %v3845_v59, %v3843_v44 }
 0x39c   :  { %v3502_v62 = vpop.f32.mrf.mxu0  ;;  %v3497_v18 = vadd.f32 %v3496_v6, %v3303_v45  ;;  %v3706_v19 = vrot.slane %v3495_v29, 2 }
 0x39d   :  { %v3305_v35 = vpop.f32.mrf.mxu1  ;;  %v7946_v40 = vpack.c.bf16 %v3846_v26, %v3844_v36  ;;  %4242 = vmatpush1.bf16.msra.mxu1 %v6131_v53 }
 0x39e   :  { %v3499_v57 = vadd.f32 %v3498_v9, %v3305_v35  ;;  %v3504_v12 = vpop.f32.mrf.mxu0  ;;  %4243 = vmatprep.subr.bf16.mxu1 %v6246_v60  ;;  %v3704_v22 = vrot.slane %v3497_v18, 2  ;;  %v6136_v9 = vld [vmem:[#allocation2 + $0x90] sm:$0xff]  }
 0x39f   :  { %v3309_v37 = vpop.f32.mrf.mxu1  ;;  %5274 = vmatprep.mubr.msk.bf16.mxu1 %vm733_vm3, %v7946_v40 }
 0x3a0   :  { %v3707_v17 = vrot.slane %v3499_v57, 2  ;;  %v7953_v28 = vadd.f32 %v3502_v62, %v3309_v37  ;;  %4072 = vmatmul.mubr.bf16.gmra.mxu1 %v7948_v14  ;;  %v3506_v2 = vpop.f32.mrf.mxu0  ;;  %v3705_v48 = vsel %vm290_vm2, %v3703_v61, %v3704_v22 }
 0x3a1   :  { %v3311_v58 = vpop.f32.mrf.mxu1  ;;  %4244 = vmatpush1.bf16.msra.mxu1 %v6132_v4  ;;  %v3847_v63 = vmax.f32 %v3493_v42, %v3705_v48 }
 0x3a2   :  { %v3709_v32 = vrot.slane %v7953_v28, 2  ;;  %v7957_v20 = vadd.f32 %v3504_v12, %v3311_v58  ;;  %v3508_v3 = vpop.f32.mrf.mxu0  ;;  %4245 = vmatprep.subr.bf16.mxu1 %v6246_v60  ;;  %v3708_v23 = vsel %vm290_vm2, %v3706_v19, %v3707_v17 }
 0x3a3   :  { %v3313_v43 = vpop.f32.mrf.mxu1  ;;  %v3848_v10 = vmax.f32 %v3495_v29, %v3708_v23 }
 0x3a4   :  { %v3710_v38 = vsel %vm290_vm2, %v3704_v22, %v3709_v32  ;;  %v3711_v49 = vrot.slane %v7957_v20, 2  ;;  %v3512_v30 = vpop.f32.mrf.mxu0  ;;  %v3507_v1 = vadd.f32 %v3506_v2, %v3313_v43 }
 0x3a5   :  { %v3315_v33 = vpop.f32.mrf.mxu1  ;;  %4246 = vmatpush1.bf16.msra.mxu1 %v6133_v47  ;;  %v3849_v51 = vmax.f32 %v3497_v18, %v3710_v38 }
 0x3a6   :  { %v3712_v16 = vsel %vm290_vm2, %v3707_v17, %v3711_v49  ;;  %v3514_v54 = vpop.f32.mrf.mxu0  ;;  %4247 = vmatprep.subr.bf16.mxu1 %v6246_v60  ;;  %v3509_v21 = vadd.f32 %v3508_v3, %v3315_v33  ;;  %v3713_v59 = vrot.slane %v3507_v1, 2 }
 0x3a7   :  { %v3850_v11 = vmax.f32 %v3499_v57, %v3712_v16  ;;  %v3319_v46 = vpop.f32.mrf.mxu1  ;;  %v7968_v52 = vpack.c.bf16 %v3849_v51, %v3847_v63 }
 0x3a8   :  { %v3516_v24 = vpop.f32.mrf.mxu0  ;;  %v3513_v34 = vadd.f32 %v3512_v30, %v3319_v46  ;;  %v3715_v6 = vrot.slane %v3509_v21, 2  ;;  %v3714_v12 = vsel %vm290_vm2, %v3709_v32, %v3713_v59 }
 0x3a9   :  { %v3321_v13 = vpop.f32.mrf.mxu1  ;;  %v7966_v0 = vpack.c.bf16 %v3850_v11, %v3848_v10  ;;  %4248 = vmatpush1.bf16.msra.mxu1 %v6134_v41  ;;  %v3851_v61 = vmax.f32 %v7953_v28, %v3714_v12 }
 0x3aa   :  { %v3518_v55 = vpop.f32.mrf.mxu0  ;;  %4261 = vmatprep.subr.bf16.mxu1 %v6246_v60  ;;  %v3515_v25 = vadd.f32 %v3514_v54, %v3321_v13  ;;  %v3717_v36 = vrot.slane %v3513_v34, 2  ;;  %v3716_v18 = vsel %vm290_vm2, %v3711_v49, %v3715_v6 }
 0x3ab   :  { %v3323_v15 = vpop.f32.mrf.mxu1  ;;  %5275 = vmatprep.mubr.msk.bf16.mxu1 %vm733_vm3, %v7966_v0  ;;  %v3852_v47 = vmax.f32 %v7957_v20, %v3716_v18 }
 0x3ac   :  { %v7973_v50 = vadd.f32 %v3516_v24, %v3323_v15  ;;  %4080 = vmatmul.mubr.bf16.gmra.mxu1 %v7968_v52  ;;  %v3522_v53 = vpop.f32.mrf.mxu0  ;;  %v3720_v35 = vrot.slane %v3515_v25, 2 }
 0x3ad   :  { %v3325_v7 = vpop.f32.mrf.mxu1  ;;  %4262 = vmatpush2.bf16.msra.mxu1 %v6135_v39 }
 0x3ae   :  { %v3718_v26 = vrot.slane %v7973_v50, 2  ;;  %v3519_v45 = vadd.f32 %v3518_v55, %v3325_v7  ;;  %v3524_v44 = vpop.f32.mrf.mxu0  ;;  %4263 = vmatprep.subr.bf16.mxu1 %v6246_v60 }
 0x3af   :  { %v3329_v62 = vpop.f32.mrf.mxu1 }
 0x3b0   :  { %v3719_v4 = vsel %vm290_vm2, %v3717_v36, %v3718_v26  ;;  %v3721_v29 = vrot.slane %v3519_v45, 2  ;;  %v3526_v57 = vpop.f32.mrf.mxu0  ;;  %v3523_v42 = vadd.f32 %v3522_v53, %v3329_v62 }
 0x3b1   :  { %v3331_v37 = vpop.f32.mrf.mxu1  ;;  %4264 = vmatpush2.bf16.msra.mxu1 %v6136_v9  ;;  %v3853_v17 = vmax.f32 %v3513_v34, %v3719_v4 }
 0x3b2   :  { %v3722_v2 = vsel %vm290_vm2, %v3720_v35, %v3721_v29  ;;  %v3525_v22 = vadd.f32 %v3524_v44, %v3331_v37  ;;  %v3528_v58 = vpop.f32.mrf.mxu0  ;;  %5412 = vmatprep.subr.bf16.mxu1 %v6247_v31  ;;  %v3723_v32 = vrot.slane %v3523_v42, 2 }
 0x3b3   :  { %v3854_v19 = vmax.f32 %v3515_v25, %v3722_v2  ;;  %v3333_v3 = vpop.f32.mrf.mxu1  ;;  %v7987_v51 = vpack.c.bf16 %v3853_v17, %v3851_v61 }
 0x3b4   :  { %v3725_v43 = vrot.slane %v3525_v22, 2  ;;  %v3527_v23 = vadd.f32 %v3526_v57, %v3333_v3  ;;  %v3532_v38 = vpop.f32.mrf.mxu0  ;;  %v3724_v11 = vsel %vm290_vm2, %v3718_v26, %v3723_v32 }
 0x3b5   :  { %v3335_v49 = vpop.f32.mrf.mxu1  ;;  %v7985_v30 = vpack.c.bf16 %v3854_v19, %v3852_v47  ;;  %v3855_v34 = vmax.f32 %v7973_v50, %v3724_v11 }
 0x3b6   :  { %v3727_v48 = vrot.slane %v3527_v23, 2  ;;  %v3529_v33 = vadd.f32 %v3528_v58, %v3335_v49  ;;  %v3534_v41 = vpop.f32.mrf.mxu0  ;;  %v3726_v20 = vsel %vm290_vm2, %v3721_v29, %v3725_v43 }
 0x3b7   :  { %v3339_v16 = vpop.f32.mrf.mxu1  ;;  %5276 = vmatprep.mubr.msk.bf16.mxu1 %vm733_vm3, %v7985_v30  ;;  %v3856_v1 = vmax.f32 %v3519_v45, %v3726_v20 }
 0x3b8   :  { %v3728_v28 = vsel %vm290_vm2, %v3723_v32, %v3727_v48  ;;  %v3729_v54 = vrot.slane %v3529_v33, 2  ;;  %4088 = vmatmul.mubr.bf16.gmra.mxu1 %v7987_v51  ;;  %v3536_v10 = vpop.f32.mrf.mxu0  ;;  %v3533_v36 = vadd.f32 %v3532_v38, %v3339_v16 }
 0x3b9   :  { %v3341_v46 = vpop.f32.mrf.mxu1  ;;  %v3857_v63 = vmax.f32 %v3523_v42, %v3728_v28 }
 0x3ba   :  { %v3730_v21 = vsel %vm290_vm2, %v3725_v43, %v3729_v54  ;;  %v3538_v24 = vpop.f32.mrf.mxu0  ;;  %v3535_v53 = vadd.f32 %v3534_v41, %v3341_v46  ;;  %v3731_v12 = vrot.slane %v3533_v36, 2 }
 0x3bb   :  { %v3858_v13 = vmax.f32 %v3525_v22, %v3730_v21  ;;  %v3343_v39 = vpop.f32.mrf.mxu1  ;;  %v7999_v9 = vpack.c.bf16 %v3857_v63, %v3855_v34 }
 0x3bc   :  { %v3542_v55 = vpop.f32.mrf.mxu0  ;;  %v3537_v15 = vadd.f32 %v3536_v10, %v3343_v39  ;;  %v3734_v35 = vrot.slane %v3535_v53, 2 }
 0x3bd   :  { %v3345_v6 = vpop.f32.mrf.mxu1  ;;  %v7997_v25 = vpack.c.bf16 %v3858_v13, %v3856_v1 }
 0x3be   :  { %v3539_v59 = vadd.f32 %v3538_v24, %v3345_v6  ;;  %v3544_v7 = vpop.f32.mrf.mxu0  ;;  %v3732_v62 = vrot.slane %v3537_v15, 2 }
 0x3bf   :  { %v3349_v26 = vpop.f32.mrf.mxu1  ;;  %5277 = vmatprep.mubr.msk.bf16.mxu1 %vm733_vm3, %v7997_v25 }
 0x3c0   :  { %v3735_v45 = vrot.slane %v3539_v59, 2  ;;  %v8003_v44 = vadd.f32 %v3542_v55, %v3349_v26  ;;  %4096 = vmatmul.mubr.bf16.gmra.mxu1 %v7999_v9  ;;  %v3546_v50 = vpop.f32.mrf.mxu0  ;;  %v3733_v58 = vsel %vm290_vm2, %v3731_v12, %v3732_v62 }
 0x3c1   :  { %v3351_v18 = vpop.f32.mrf.mxu1  ;;  %v3859_v32 = vmax.f32 %v3533_v36, %v3733_v58 }
 0x3c2   :  { %v3737_v4 = vrot.slane %v8003_v44, 2  ;;  %v3545_v29 = vadd.f32 %v3544_v7, %v3351_v18  ;;  %v3548_v57 = vpop.f32.mrf.mxu0  ;;  %v3736_v37 = vsel %vm290_vm2, %v3734_v35, %v3735_v45 }
 0x3c3   :  { %v3353_v42 = vpop.f32.mrf.mxu1  ;;  %v3860_v43 = vmax.f32 %v3535_v53, %v3736_v37 }
 0x3c4   :  { %v3738_v17 = vsel %vm290_vm2, %v3732_v62, %v3737_v4  ;;  %v3739_v2 = vrot.slane %v3545_v29, 2  ;;  %v3552_v22 = vpop.f32.mrf.mxu0  ;;  %v3547_v33 = vadd.f32 %v3546_v50, %v3353_v42 }
 0x3c5   :  { %v3355_v47 = vpop.f32.mrf.mxu1  ;;  %v3861_v19 = vmax.f32 %v3537_v15, %v3738_v17 }
 0x3c6   :  { %v3740_v3 = vsel %vm290_vm2, %v3735_v45, %v3739_v2  ;;  %v3554_v61 = vpop.f32.mrf.mxu0  ;;  %v3549_v49 = vadd.f32 %v3548_v57, %v3355_v47  ;;  %v3741_v24 = vrot.slane %v3547_v33, 2 }
 0x3c7   :  { %v3862_v23 = vmax.f32 %v3539_v59, %v3740_v3  ;;  %v3359_v38 = vpop.f32.mrf.mxu1  ;;  %v8013_v54 = vpack.c.bf16 %v3861_v19, %v3859_v32 }
 0x3c8   :  { %v3556_v48 = vpop.f32.mrf.mxu0  ;;  %v3553_v20 = vadd.f32 %v3552_v22, %v3359_v38  ;;  %v3743_v11 = vrot.slane %v3549_v49, 2  ;;  %v3742_v26 = vsel %vm290_vm2, %v3737_v4, %v3741_v24 }
 0x3c9   :  { %v3361_v41 = vpop.f32.mrf.mxu1  ;;  %v8011_v16 = vpack.c.bf16 %v3862_v23, %v3860_v43  ;;  %v3863_v17 = vmax.f32 %v8003_v44, %v3742_v26 }
 0x3ca   :  { %v3558_v28 = vpop.f32.mrf.mxu0  ;;  %v3555_v46 = vadd.f32 %v3554_v61, %v3361_v41  ;;  %v3745_v13 = vrot.slane %v3553_v20, 2  ;;  %v3744_v6 = vsel %vm290_vm2, %v3739_v2, %v3743_v11 }
 0x3cb   :  { %v3363_v10 = vpop.f32.mrf.mxu1  ;;  %5278 = vmatprep.mubr.msk.bf16.mxu1 %vm733_vm3, %v8011_v16  ;;  %v3864_v12 = vmax.f32 %v3545_v29, %v3744_v6 }
 0x3cc   :  { %v3557_v63 = vadd.f32 %v3556_v48, %v3363_v10  ;;  %4104 = vmatmul.mubr.bf16.gmra.mxu1 %v8013_v54  ;;  %v3562_v21 = vpop.f32.mrf.mxu0  ;;  %v3748_v53 = vrot.slane %v3555_v46, 2 }
 0x3cd   :  { %v3365_v1 = vpop.f32.mrf.mxu1 }
 0x3ce   :  { %v3746_v39 = vrot.slane %v3557_v63, 2  ;;  %v3559_v34 = vadd.f32 %v3558_v28, %v3365_v1  ;;  %v3564_v55 = vpop.f32.mrf.mxu0 }
 0x3cf   :  { %v3369_v15 = vpop.f32.mrf.mxu1 }
 0x3d0   :  { %v3747_v59 = vsel %vm290_vm2, %v3745_v13, %v3746_v39  ;;  %v3749_v7 = vrot.slane %v3559_v34, 2  ;;  %v3566_v36 = vpop.f32.mrf.mxu0  ;;  %v3563_v45 = vadd.f32 %v3562_v21, %v3369_v15 }
 0x3d1   :  { %v3371_v50 = vpop.f32.mrf.mxu1  ;;  %v3865_v62 = vmax.f32 %v3553_v20, %v3747_v59 }
 0x3d2   :  { %v3750_v18 = vsel %vm290_vm2, %v3748_v53, %v3749_v7  ;;  %v3565_v35 = vadd.f32 %v3564_v55, %v3371_v50  ;;  %v3568_v57 = vpop.f32.mrf.mxu0  ;;  %v3751_v47 = vrot.slane %v3563_v45, 2 }
 0x3d3   :  { %v3866_v42 = vmax.f32 %v3555_v46, %v3750_v18  ;;  %v3373_v37 = vpop.f32.mrf.mxu1  ;;  %v8025_v23 = vpack.c.bf16 %v3865_v62, %v3863_v17 }
 0x3d4   :  { %v3753_v2 = vrot.slane %v3565_v35, 2  ;;  %v3567_v22 = vadd.f32 %v3566_v36, %v3373_v37  ;;  %v3572_v58 = vpop.f32.mrf.mxu0  ;;  %v3752_v48 = vsel %vm290_vm2, %v3746_v39, %v3751_v47 }
 0x3d5   :  { %v3375_v19 = vpop.f32.mrf.mxu1  ;;  %v8023_v3 = vpack.c.bf16 %v3866_v42, %v3864_v12  ;;  %v3867_v21 = vmax.f32 %v3557_v63, %v3752_v48 }
 0x3d6   :  { %v3755_v4 = vrot.slane %v3567_v22, 2  ;;  %v3569_v61 = vadd.f32 %v3568_v57, %v3375_v19  ;;  %v3574_v43 = vpop.f32.mrf.mxu0  ;;  %v3754_v29 = vsel %vm290_vm2, %v3749_v7, %v3753_v2 }
 0x3d7   :  { %v3379_v38 = vpop.f32.mrf.mxu1  ;;  %5279 = vmatprep.mubr.msk.bf16.mxu1 %vm733_vm3, %v8023_v3  ;;  %v3868_v10 = vmax.f32 %v3559_v34, %v3754_v29 }
 0x3d8   :  { %v3756_v44 = vsel %vm290_vm2, %v3751_v47, %v3755_v4  ;;  %v3757_v32 = vrot.slane %v3569_v61, 2  ;;  %4112 = vmatmul.mubr.bf16.gmra.mxu1 %v8025_v23  ;;  %v3576_v49 = vpop.f32.mrf.mxu0  ;;  %v3573_v39 = vadd.f32 %v3572_v58, %v3379_v38 }
 0x3d9   :  { %v3381_v33 = vpop.f32.mrf.mxu1  ;;  %v3869_v41 = vmax.f32 %v3563_v45, %v3756_v44 }
 0x3da   :  { %v3758_v20 = vsel %vm290_vm2, %v3753_v2, %v3757_v32  ;;  %v3578_v28 = vpop.f32.mrf.mxu0  ;;  %v3575_v15 = vadd.f32 %v3574_v43, %v3381_v33  ;;  %v3759_v57 = vrot.slane %v3573_v39, 2 }
 0x3db   :  { %v3870_v11 = vmax.f32 %v3565_v35, %v3758_v20  ;;  %v3383_v46 = vpop.f32.mrf.mxu1  ;;  %v8036_v59 = vpack.c.bf16 %v3869_v41, %v3867_v21 }
 0x3dc   :  { %v3582_v24 = vpop.f32.mrf.mxu0  ;;  %v3577_v1 = vadd.f32 %v3576_v49, %v3383_v46  ;;  %v3762_v50 = vrot.slane %v3575_v15, 2 }
 0x3dd   :  { %v3385_v13 = vpop.f32.mrf.mxu1  ;;  %v8034_v55 = vpack.c.bf16 %v3870_v11, %v3868_v10 }
 0x3de   :  { %v3579_v6 = vadd.f32 %v3578_v28, %v3385_v13  ;;  %v3584_v53 = vpop.f32.mrf.mxu0  ;;  %v3760_v26 = vrot.slane %v3577_v1, 2 }
 0x3df   :  { %v3389_v7 = vpop.f32.mrf.mxu1  ;;  %5280 = vmatprep.mubr.msk.bf16.mxu1 %vm733_vm3, %v8034_v55 }
 0x3e0   :  { %v3763_v36 = vrot.slane %v3579_v6, 2  ;;  %v8040_v34 = vadd.f32 %v3582_v24, %v3389_v7  ;;  %4120 = vmatmul.mubr.bf16.gmra.mxu1 %v8036_v59  ;;  %v3586_v63 = vpop.f32.mrf.mxu0  ;;  %v3761_v22 = vsel %vm290_vm2, %v3759_v57, %v3760_v26 }
 0x3e1   :  { %v3391_v45 = vpop.f32.mrf.mxu1  ;;  %v3871_v29 = vmax.f32 %v3573_v39, %v3761_v22 }
 0x3e2   :  { %v3765_v62 = vrot.slane %v8040_v34, 2  ;;  %v3585_v18 = vadd.f32 %v3584_v53, %v3391_v45  ;;  %v3588_v35 = vpop.f32.mrf.mxu0  ;;  %v3764_v42 = vsel %vm290_vm2, %v3762_v50, %v3763_v36 }
 0x3e3   :  { %v3393_v12 = vpop.f32.mrf.mxu1  ;;  %v3872_v61 = vmax.f32 %v3575_v15, %v3764_v42 }
 0x3e4   :  { %v3766_v37 = vsel %vm290_vm2, %v3760_v26, %v3765_v62  ;;  %v3767_v17 = vrot.slane %v3585_v18, 2  ;;  %v3592_v2 = vpop.f32.mrf.mxu0  ;;  %v3587_v49 = vadd.f32 %v3586_v63, %v3393_v12 }
 0x3e5   :  { %v3395_v58 = vpop.f32.mrf.mxu1  ;;  %v3873_v47 = vmax.f32 %v3577_v1, %v3766_v37 }
 0x3e6   :  { %v3768_v19 = vsel %vm290_vm2, %v3763_v36, %v3767_v17  ;;  %v3594_v4 = vpop.f32.mrf.mxu0  ;;  %v3589_v44 = vadd.f32 %v3588_v35, %v3395_v58  ;;  %v3769_v24 = vrot.slane %v3587_v49, 2 }
 0x3e7   :  { %v3874_v43 = vmax.f32 %v3579_v6, %v3768_v19  ;;  %v3399_v38 = vpop.f32.mrf.mxu1  ;;  %v8050_v28 = vpack.c.bf16 %v3873_v47, %v3871_v29 }
 0x3e8   :  { %v3596_v32 = vpop.f32.mrf.mxu0  ;;  %v3593_v41 = vadd.f32 %v3592_v2, %v3399_v38  ;;  %v3771_v11 = vrot.slane %v3589_v44, 2  ;;  %v3770_v50 = vsel %vm290_vm2, %v3765_v62, %v3769_v24 }
 0x3e9   :  { %v3401_v48 = vpop.f32.mrf.mxu1  ;;  %v8048_v33 = vpack.c.bf16 %v3874_v43, %v3872_v61 }
 0x3ea   :  { %v3598_v20 = vpop.f32.mrf.mxu0  ;;  %v3595_v46 = vadd.f32 %v3594_v4, %v3401_v48  ;;  %v3773_v15 = vrot.slane %v3593_v41, 2  ;;  %v3772_v36 = vsel %vm290_vm2, %v3767_v17, %v3771_v11  ;;  %v3875_v4 = vmax.f32 %v8040_v34, %v3770_v50 }
 0x3eb   :  { %v3403_v10 = vpop.f32.mrf.mxu1  ;;  %5281 = vmatprep.mubr.msk.bf16.mxu1 %vm733_vm3, %v8048_v33  ;;  %v3876_v22 = vmax.f32 %v3585_v18, %v3772_v36 }
 0x3ec   :  { %v3597_v21 = vadd.f32 %v3596_v32, %v3403_v10  ;;  %4128 = vmatmul.mubr.bf16.gmra.mxu1 %v8050_v28  ;;  %v3776_v63 = vrot.slane %v3595_v46, 2 }
 0x3ed   :  { %v3405_v1 = vpop.f32.mrf.mxu1  ;;  %v3602_v13 = vpop.f32.mrf.mxu0 }
 0x3ee   :  { %v3774_v6 = vrot.slane %v3597_v21, 2  ;;  %v3599_v53 = vadd.f32 %v3598_v20, %v3405_v1 }
 0x3ef   :  { %v3409_v39 = vpop.f32.mrf.mxu1  ;;  %v3604_v7 = vpop.f32.mrf.mxu0 }
 0x3f0   :  { %v3775_v26 = vsel %vm290_vm2, %v3773_v15, %v3774_v6  ;;  %v3777_v45 = vrot.slane %v3599_v53, 2  ;;  %v3603_v35 = vadd.f32 %v3602_v13, %v3409_v39 }
 0x3f1   :  { %v3411_v57 = vpop.f32.mrf.mxu1  ;;  %v3606_v12 = vpop.f32.mrf.mxu0  ;;  %v3877_v42 = vmax.f32 %v3593_v41, %v3775_v26 }
 0x3f2   :  { %v3778_v37 = vsel %vm290_vm2, %v3776_v63, %v3777_v45  ;;  %v3605_v2 = vadd.f32 %v3604_v7, %v3411_v57  ;;  %v3779_v43 = vrot.slane %v3603_v35, 2 }
 0x3f3   :  { %v3878_v58 = vmax.f32 %v3595_v46, %v3778_v37  ;;  %v3413_v47 = vpop.f32.mrf.mxu1  ;;  %v3608_v19 = vpop.f32.mrf.mxu0  ;;  %v3903_v32 = vpack.c.bf16 %v3877_v42, %v3875_v4  ;;  %v6137_v37 = vld [vmem:[%s8431_s5 + $0x78] sm:$0xff]   ;;  %v6141_v4 = vld [vmem:[%s8431_s5 + $0x68] sm:$0xff]  }
 0x3f4   :  { %v3781_v17 = vrot.slane %v3605_v2, 2  ;;  %v3607_v61 = vadd.f32 %v3606_v12, %v3413_v47  ;;  %v3780_v41 = vsel %vm290_vm2, %v3774_v6, %v3779_v43  ;;  %5352 = vmatprep.subr.bf16.mxu0 %v6137_v37  ;;  %v6139_v47 = vld [vmem:[%s8431_s5 + $0x70] sm:$0xff]  }
 0x3f5   :  { %v3415_v38 = vpop.f32.mrf.mxu1  ;;  %v3904_v29 = vpack.c.bf16 %v3878_v58, %v3876_v22  ;;  %v3879_v46 = vmax.f32 %v3597_v21, %v3780_v41  ;;  %v6148_v41 = vld [vmem:[%s8431_s5 + $0x10] sm:$0xff]  }
 0x3f6   :  { %v3783_v44 = vrot.slane %v3607_v61, 2  ;;  %v3609_v62 = vadd.f32 %v3608_v19, %v3415_v38  ;;  %v3782_v49 = vsel %vm290_vm2, %v3777_v45, %v3781_v17  ;;  %v6140_v19 = vld [vmem:[%s8431_s5 + $0x30] sm:$0xff]   ;;  %v6142_v61 = vld [vmem:[%s8431_s5 + $0x28] sm:$0xff]   ;;  %v6143_v38 = vld [vmem:[%s8431_s5 + $0x60] sm:$0xff]  }
 0x3f7   :  { %5282 = vmatprep.mubr.msk.bf16.mxu1 %vm733_vm3, %v3904_v29  ;;  %v3880_v10 = vmax.f32 %v3599_v53, %v3782_v49 }
 0x3f8   :  { %v3784_v48 = vsel %vm290_vm2, %v3779_v43, %v3783_v44  ;;  %v3785_v18 = vrot.slane %v3609_v62, 2  ;;  %4136 = vmatmul.mubr.bf16.gmra.mxu1 %v3903_v32  ;;  %v6145_v44 = vld [vmem:[%s8431_s5 + $0x58] sm:$0xff]  }
 0x3f9   :  { %v3881_v20 = vmax.f32 %v3603_v35, %v3784_v48  ;;  %v6147_v48 = vld [vmem:[%s8431_s5 + $0x50] sm:$0xff]  }
 0x3fa   :  { %v3786_v34 = vsel %vm290_vm2, %v3781_v17, %v3785_v18  ;;  %vm4463_vm2 = vcmask 1046534  }
 0x3fb   :  { %v3882_v11 = vmax.f32 %v3605_v2, %v3786_v34  ;;  %v3905_v1 = vpack.c.bf16 %v3881_v20, %v3879_v46  ;;  %v6138_v2 = vld [vmem:[%s8431_s5 + $0x38] sm:$0xff]   ;;  %v6149_v34 = vld [vmem:[%s8431_s5 + $0x48] sm:$0xff]  }
 0x3fc   :  { %5353 = vmatpush3.bf16.msra.mxu0 %v6138_v2 }
 0x3fd   :  { %v3906_v24 = vpack.c.bf16 %v3882_v11, %v3880_v10  ;;  %5354 = vmatprep.subr.bf16.mxu0 %v6139_v47  ;;  %v6150_v11 = vld [vmem:[%s8431_s5 + $0x8] sm:$0xff]  }
 0x3ff   :  { %5283 = vmatprep.mubr.msk.bf16.mxu1 %vm733_vm3, %v3906_v24 }
 0x400   :  { %4144 = vmatmul.mubr.bf16.gmra.mxu1 %v3905_v1  ;;  %5355 = vmatpush3.bf16.msra.mxu0 %v6140_v19 }
 0x401   :  { %5294 = vmatprep.mubr.msk.bf16.mxu1 %vm733_vm3, %v7914_v56  ;;  %5356 = vmatprep.subr.bf16.mxu0 %v6141_v4 }
 0x404   :  { %5357 = vmatpush3.bf16.msra.mxu0 %v6142_v61 }
 0x405   :  { %5358 = vmatprep.subr.bf16.mxu0 %v6143_v38 }
 0x408   :  { %4266 = vmatmul.mubr.bf16.vlgmr.msra.gmra.mxu1 %v7916_v5 }
 0x409   :  { %5295 = vmatprep.mubr.msk.bf16.mxu1 %vm733_vm3, %v7932_v27 }
 0x410   :  { %4274 = vmatmul.mubr.bf16.gmra.mxu1 %v7934_v8 }
 0x411   :  { %5296 = vmatprep.mubr.msk.bf16.mxu1 %vm733_vm3, %v7946_v40 }
 0x418   :  { %4282 = vmatmul.mubr.bf16.gmra.mxu1 %v7948_v14 }
 0x419   :  { %5297 = vmatprep.mubr.msk.bf16.mxu1 %vm733_vm3, %v7966_v0 }
 0x420   :  { %4290 = vmatmul.mubr.bf16.gmra.mxu1 %v7968_v52 }
 0x421   :  { %5298 = vmatprep.mubr.msk.bf16.mxu1 %vm733_vm3, %v7985_v30 }
 0x428   :  { %4298 = vmatmul.mubr.bf16.gmra.mxu1 %v7987_v51 }
 0x429   :  { %5299 = vmatprep.mubr.msk.bf16.mxu1 %vm733_vm3, %v7997_v25 }
 0x430   :  { %4306 = vmatmul.mubr.bf16.gmra.mxu1 %v7999_v9 }
 0x431   :  { %5300 = vmatprep.mubr.msk.bf16.mxu1 %vm733_vm3, %v8011_v16 }
 0x438   :  { %4314 = vmatmul.mubr.bf16.gmra.mxu1 %v8013_v54 }
 0x439   :  { %5301 = vmatprep.mubr.msk.bf16.mxu1 %vm733_vm3, %v8023_v3 }
 0x440   :  { %4322 = vmatmul.mubr.bf16.gmra.mxu1 %v8025_v23 }
 0x441   :  { %5302 = vmatprep.mubr.msk.bf16.mxu1 %vm733_vm3, %v8034_v55 }
 0x448   :  { %4330 = vmatmul.mubr.bf16.gmra.mxu1 %v8036_v59 }
 0x449   :  { %5303 = vmatprep.mubr.msk.bf16.mxu1 %vm733_vm3, %v8048_v33 }
 0x44c   :  { %v8095_v56 = vpop.f32.mrf.mxu1 }
 0x44e   :  { %v4059_v5 = vpop.f32.mrf.mxu1 }
 0x44f   :  { %v6152_v5 = vld [vmem:[%s8431_s5] sm:$0xff]  }
 0x450   :  { %v8097_v27 = vpop.f32.mrf.mxu1  ;;  %4338 = vmatmul.mubr.bf16.gmra.mxu1 %v8050_v28 }
 0x451   :  { %5304 = vmatprep.mubr.msk.bf16.mxu1 %vm733_vm3, %v3904_v29  ;;  %v6144_v29 = vld [vmem:[%s8431_s5 + $0x20] sm:$0xff]  }
 0x452   :  { %v4062_v8 = vpop.f32.mrf.mxu1  ;;  %5359 = vmatpush3.bf16.msra.mxu0 %v6144_v29 }
 0x453   :  { %5360 = vmatprep.subr.bf16.mxu0 %v6145_v44 }
 0x458   :  { %v8101_v40 = vpop.f32.mrf.mxu1  ;;  %4346 = vmatmul.mubr.bf16.gmra.mxu1 %v3903_v32  ;;  %v6146_v32 = vld [vmem:[%s8431_s5 + $0x18] sm:$0xff]  }
 0x459   :  { %5305 = vmatprep.mubr.msk.bf16.mxu1 %vm733_vm3, %v3906_v24  ;;  %5361 = vmatpush3.bf16.msra.mxu0 %v6146_v32  ;;  %v6151_v24 = vld [vmem:[%s8431_s5 + $0x40] sm:$0xff]  }
 0x45a   :  { %v4067_v14 = vpop.f32.mrf.mxu1  ;;  %5362 = vmatprep.subr.bf16.mxu0 %v6147_v48 }
 0x45c   :  { %v8104_v0 = vpop.f32.mrf.mxu1 }
 0x45d   :  { %5363 = vmatpush3.bf16.msra.mxu0 %v6148_v41 }
 0x45e   :  { %v4070_v52 = vpop.f32.mrf.mxu1  ;;  %5364 = vmatprep.subr.bf16.mxu0 %v6149_v34 }
 0x460   :  { %v8106_v30 = vpop.f32.mrf.mxu1  ;;  %4354 = vmatmul.mubr.bf16.gmra.mxu1 %v3905_v1 }
 0x461   :  { %5365 = vmatpush3.bf16.msra.mxu0 %v6150_v11 }
 0x462   :  { %v4075_v51 = vpop.f32.mrf.mxu1  ;;  %5366 = vmatprep.subr.bf16.mxu0 %v6151_v24 }
 0x464   :  { %v8108_v25 = vpop.f32.mrf.mxu1 }
 0x465   :  { %5367 = vmatpush3.bf16.msra.mxu0 %v6152_v5 }
 0x466   :  { %v4078_v9 = vpop.f32.mrf.mxu1  ;;  %4811 = vmatprep.subr.bf16.mxu0 %v6246_v60 }
 0x46c   :  { %v8110_v16 = vpop.f32.mrf.mxu1 }
 0x46e   :  { %v4083_v54 = vpop.f32.mrf.mxu1 }
 0x470   :  { %v8112_v3 = vpop.f32.mrf.mxu1 }
 0x472   :  { %v4086_v23 = vpop.f32.mrf.mxu1 }
 0x473   :  { %v8199_v23 = vld [vmem:[%s8432_s6 + $0x1] ss:$0 sm:$0xff] }
 0x478   :  { %v8114_v55 = vpop.f32.mrf.mxu1 }
 0x47a   :  { %v4091_v59 = vpop.f32.mrf.mxu1 }
 0x47c   :  { %v8116_v33 = vpop.f32.mrf.mxu1 }
 0x47e   :  { %v4094_v28 = vpop.f32.mrf.mxu1 }
 0x480   :  { %v8118_v21 = vpop.f32.mrf.mxu1 }
 0x482   :  { %v4099_v13 = vpop.f32.mrf.mxu1 }
 0x484   :  { %v8120_v15 = vpop.f32.mrf.mxu1 }
 0x486   :  { %v4102_v6 = vpop.f32.mrf.mxu1 }
 0x48c   :  { %v8122_v53 = vpop.f32.mrf.mxu1 }
 0x48e   :  { %v4107_v39 = vpop.f32.mrf.mxu1 }
 0x490   :  { %v8124_v7 = vpop.f32.mrf.mxu1 }
 0x492   :  { %v4110_v36 = vpop.f32.mrf.mxu1 }
 0x498   :  { %v8126_v63 = vpop.f32.mrf.mxu1 }
 0x49a   :  { %v4115_v26 = vpop.f32.mrf.mxu1 }
 0x49c   :  { %v8128_v45 = vpop.f32.mrf.mxu1 }
 0x49e   :  { %v4118_v50 = vpop.f32.mrf.mxu1 }
 0x4a0   :  { %v8130_v35 = vpop.f32.mrf.mxu1 }
 0x4a2   :  { %v4123_v57 = vpop.f32.mrf.mxu1 }
 0x4a4   :  { %v8132_v12 = vpop.f32.mrf.mxu1 }
 0x4a6   :  { %v4126_v42 = vpop.f32.mrf.mxu1 }
 0x4ac   :  { %v8140_v22 = vpop.f32.mrf.mxu1 }
 0x4ae   :  { %v4131_v58 = vpop.f32.mrf.mxu1 }
 0x4b0   :  { %v8151_v17 = vpop.f32.mrf.mxu1 }
 0x4b2   :  { %v4134_v43 = vpop.f32.mrf.mxu1 }
 0x4b8   :  { %v8165_v62 = vpop.f32.mrf.mxu1 }
 0x4ba   :  { %v4139_v49 = vpop.f32.mrf.mxu1 }
 0x4bc   :  { %v8173_v18 = vpop.f32.mrf.mxu1 }
 0x4be   :  { %v4142_v20 = vpop.f32.mrf.mxu1 }
 0x4c0   :  { %v8181_v10 = vpop.f32.mrf.mxu1 }
 0x4c2   :  { %v4147_v46 = vpop.f32.mrf.mxu1 }
 0x4c4   :  { %v8189_v1 = vpop.f32.mrf.mxu1 }
 0x4c6   :  { %v4150_v8 = vpop.f32.mrf.mxu1 }
 0x4c8   :  { %v4267_v14 = vpop.f32.mrf.mxu1 }
 0x4c9   :  { %v4362_v9 = vmax.f32 %v8095_v56, %v4267_v14 }
 0x4ca   :  { %v4269_v52 = vpop.f32.mrf.mxu1 }
 0x4cb   :  { %v4391_v28 = vadd.f32 %v8199_v23, %v4362_v9 }
 0x4cc   :  { %v4270_v51 = vpop.f32.mrf.mxu1 }
 0x4cd   :  { %v4363_v13 = vmax.f32 %v8097_v27, %v4270_v51  ;;  %v4415_v26 = vmax.f32 %v4391_v28, 0.0 }
 0x4ce   :  { %v4272_v54 = vpop.f32.mrf.mxu1 }
 0x4cf   :  { %v4392_v50 = vadd.f32 %v8199_v23, %v4363_v13  ;;  %v4469_v58 = vrot.slane %v4415_v26, 4 }
 0x4d0   :  { %v4275_v59 = vpop.f32.mrf.mxu1 }
 0x4d1   :  { %v4416_v47 = vmax.f32 %v4392_v50, 0.0  ;;  %v4364_v27 = vmax.f32 %v8101_v40, %v4275_v59 }
 0x4d2   :  { %v4277_v6 = vpop.f32.mrf.mxu1 }
 0x4d3   :  { %v4393_v48 = vadd.f32 %v8199_v23, %v4364_v27 }
 0x4d4   :  { %v4278_v39 = vpop.f32.mrf.mxu1 }
 0x4d5   :  { %v4365_v36 = vmax.f32 %v8104_v0, %v4278_v39 }
 0x4d6   :  { %v4280_v57 = vpop.f32.mrf.mxu1 }
 0x4d7   :  { %v4394_v56 = vadd.f32 %v8199_v23, %v4365_v36 }
 0x4d8   :  { %v4283_v42 = vpop.f32.mrf.mxu1 }
 0x4d9   :  { %v4418_v37 = vmax.f32 %v4394_v56, 0.0  ;;  %v4366_v2 = vmax.f32 %v8106_v30, %v4283_v42  ;;  %v4511_v30 = vrot.slane %v4416_v47, 4 }
 0x4da   :  { %v4285_v19 = vpop.f32.mrf.mxu1 }
 0x4db   :  { %v4447_v4 = vrot.slane %v4418_v37, 7  ;;  %v4470_v61 = vrot.slane %v4418_v37, 3  ;;  %v4395_v0 = vadd.f32 %v8199_v23, %v4366_v2 }
 0x4dc   :  { %v4286_v43 = vpop.f32.mrf.mxu1 }
 0x4dd   :  { %v4449_v38 = vsel %vm4448_vm13, %v4447_v4, %v4415_v26  ;;  %v8211_v29 = vsel %vm4448_vm13, %v4470_v61, %v4469_v58  ;;  %v4419_v44 = vmax.f32 %v4395_v0, 0.0  ;;  %v4367_v32 = vmax.f32 %v8108_v25, %v4286_v43 }
 0x4de   :  { %v4288_v49 = vpop.f32.mrf.mxu1  ;;  %v4417_v25 = vmax.f32 %v4393_v48, 0.0 }
 0x4df   :  { %v4494_v41 = vrot.slane %v4419_v44, 7  ;;  %v4512_v20 = vrot.slane %v4419_v44, 3  ;;  %v4396_v40 = vadd.f32 %v8199_v23, %v4367_v32 }
 0x4e0   :  { %v4291_v34 = vpop.f32.mrf.mxu1 }
 0x4e1   :  { %v8217_v11 = vsel %vm4448_vm13, %v4494_v41, %v4416_v47  ;;  %v8220_v46 = vsel %vm4448_vm13, %v4512_v20, %v4511_v30  ;;  %v4420_v24 = vmax.f32 %v4396_v40, 0.0  ;;  %v4368_v5 = vmax.f32 %v8110_v16, %v4291_v34 }
 0x4e2   :  { %v4293_v8 = vpop.f32.mrf.mxu1 }
 0x4e3   :  { %v4536_v14 = vrot.slane %v4420_v24, 7  ;;  %v8224_v52 = vadd.f32 %v8199_v23, %v4368_v5 }
 0x4e4   :  { %v4294_v51 = vpop.f32.mrf.mxu1 }
 0x4e5   :  { %v8227_v9 = vsel %vm4448_vm13, %v4536_v14, %v4417_v25  ;;  %v4421_v54 = vmax.f32 %v8224_v52, 0.0  ;;  %v4369_v5 = vmax.f32 %v8112_v3, %v4294_v51 }
 0x4e6   :  { %v4296_v59 = vpop.f32.mrf.mxu1 }
 0x4e7   :  { %v4450_v28 = vrot.slane %v4421_v54, 6  ;;  %v4398_v59 = vadd.f32 %v8199_v23, %v4369_v5 }
 0x4e8   :  { %v4299_v13 = vpop.f32.mrf.mxu1 }
 0x4e9   :  { %v4452_v6 = vsel %vm4451_vm14, %v4450_v28, %v4449_v38 }
 0x4ea   :  { %v4301_v39 = vpop.f32.mrf.mxu1 }
 0x4ec   :  { %v4302_v16 = vpop.f32.mrf.mxu1 }
 0x4ed   :  { %v4371_v36 = vmax.f32 %v8116_v33, %v4302_v16 }
 0x4ee   :  { %v4304_v26 = vpop.f32.mrf.mxu1 }
 0x4ef   :  { %v4400_v50 = vadd.f32 %v8199_v23, %v4371_v36  ;;  %v4422_v26 = vmax.f32 %v4398_v59, 0.0 }
 0x4f0   :  { %v4307_v57 = vpop.f32.mrf.mxu1 }
 0x4f1   :  { %v4424_v56 = vmax.f32 %v4400_v50, 0.0  ;;  %v4372_v14 = vmax.f32 %v8118_v21, %v4307_v57 }
 0x4f2   :  { %v4309_v42 = vpop.f32.mrf.mxu1 }
 0x4f3   :  { %v4453_v37 = vrot.slane %v4424_v56, 5  ;;  %v4401_v16 = vadd.f32 %v8199_v23, %v4372_v14 }
 0x4f4   :  { %v4310_v2 = vpop.f32.mrf.mxu1 }
 0x4f5   :  { %v4455_v58 = vsel %vm4454_vm15, %v4453_v37, %v4452_v6  ;;  %v4373_v3 = vmax.f32 %v8120_v15, %v4310_v2  ;;  %v4425_v37 = vmax.f32 %v4401_v16, 0.0  ;;  %v4514_v15 = vrot.slane %v4422_v26, 2 }
 0x4f6   :  { %v4312_v47 = vpop.f32.mrf.mxu1 }
 0x4f7   :  { %v4496_v47 = vrot.slane %v4422_v26, 6 }
 0x4f8   :  { %v4315_v19 = vpop.f32.mrf.mxu1 }
 0x4f9   :  { %v4374_v27 = vmax.f32 %v8122_v53, %v4315_v19 }
 0x4fa   :  { %v4317_v4 = vpop.f32.mrf.mxu1 }
 0x4fb   :  { %v8236_v61 = vadd.f32 %v8199_v23, %v4374_v27  ;;  %v4474_v4 = vrot.slane %v4424_v56, 1  ;;  %v4497_v56 = vsel %vm4451_vm14, %v4496_v47, %v8217_v11 }
 0x4fc   :  { %v4318_v33 = vpop.f32.mrf.mxu1 }
 0x4fd   :  { %v4427_v0 = vmax.f32 %v8236_v61, 0.0  ;;  %v4375_v6 = vmax.f32 %v8124_v7, %v4318_v33 }
 0x4fe   :  { %v4320_v43 = vpop.f32.mrf.mxu1 }
 0x4ff   :  { %v4456_v38 = vrot.slane %v4427_v0, 4  ;;  %v4404_v57 = vadd.f32 %v8199_v23, %v4375_v6 }
 0x500   :  { %v8241_v44 = vpop.f32.mrf.mxu1 }
 0x501   :  { %v4458_v32 = vsel %vm4457_vm0, %v4456_v38, %v4455_v58  ;;  %v4428_v33 = vmax.f32 %v4404_v57, 0.0  ;;  %v4498_v38 = vrot.slane %v4425_v37, 5 }
 0x502   :  { %v4325_v30 = vpop.f32.mrf.mxu1 }
 0x503   :  { %v4499_v5 = vsel %vm4454_vm15, %v4498_v38, %v4497_v56 }
 0x504   :  { %v4326_v49 = vpop.f32.mrf.mxu1 }
 0x505   :  { %v4377_v53 = vmax.f32 %v8128_v45, %v4326_v49  ;;  %v4370_v45 = vmax.f32 %v8114_v55, %v4299_v13  ;;  %v4402_v13 = vadd.f32 %v8199_v23, %v4373_v3  ;;  %v4516_v49 = vrot.slane %v4425_v37, 1 }
 0x506   :  { %v4328_v48 = vpop.f32.mrf.mxu1 }
 0x507   :  { %v4406_v41 = vadd.f32 %v8199_v23, %v4377_v53  ;;  %v4399_v21 = vadd.f32 %v8199_v23, %v4370_v45  ;;  %v4426_v53 = vmax.f32 %v4402_v13, 0.0  ;;  %v4515_v48 = vsel %vm4451_vm14, %v4514_v15, %v8220_v46 }
 0x508   :  { %v4331_v20 = vpop.f32.mrf.mxu1  ;;  %v4517_v46 = vsel %vm4454_vm15, %v4516_v49, %v4515_v48 }
 0x509   :  { %v4430_v40 = vmax.f32 %v4406_v41, 0.0  ;;  %v4378_v55 = vmax.f32 %v8130_v35, %v4331_v20  ;;  %v4423_v27 = vmax.f32 %v4399_v21, 0.0  ;;  %v4376_v35 = vmax.f32 %v8126_v63, %v8241_v44 }
 0x50a   :  { %v4333_v34 = vpop.f32.mrf.mxu1  ;;  %v4540_v14 = vrot.slane %v4426_v53, 5 }
 0x50b   :  { %v4459_v24 = vrot.slane %v4430_v40, 3  ;;  %v4538_v20 = vrot.slane %v4423_v27, 6 }
 0x50c   :  { %v4334_v8 = vpop.f32.mrf.mxu1 }
 0x50d   :  { %v4461_v25 = vsel %vm4460_vm1, %v4459_v24, %v4458_v32  ;;  %v4407_v32 = vadd.f32 %v8199_v23, %v4378_v55  ;;  %v4500_v24 = vrot.slane %v4428_v33, 4 }
 0x50e   :  { %v4336_v52 = vpop.f32.mrf.mxu1 }
 0x50f   :  { %v4431_v11 = vmax.f32 %v4407_v32, 0.0 }
 0x510   :  { %v4339_v28 = vpop.f32.mrf.mxu1 }
 0x511   :  { %v4380_v39 = vmax.f32 %v8140_v22, %v4339_v28  ;;  %v4472_v22 = vrot.slane %v4421_v54, 2  ;;  %v4519_v26 = vrot.slane %v4431_v11, 7 }
 0x512   :  { %v4341_v36 = vpop.f32.mrf.mxu1 }
 0x513   :  { %v4409_v51 = vadd.f32 %v8199_v23, %v4380_v39  ;;  %v4473_v30 = vsel %vm4451_vm14, %v4472_v22, %v8211_v29  ;;  %v4518_v39 = vsel %vm4457_vm0, %v4428_v33, %v4517_v46 }
 0x514   :  { %v4342_v50 = vpop.f32.mrf.mxu1  ;;  %v4475_v34 = vsel %vm4454_vm15, %v4474_v4, %v4473_v30  ;;  %v4520_v27 = vsel %vm4460_vm1, %v4519_v26, %v4518_v39  ;;  %v6167_v26 = vld [vmem:[%s8431_s5 + $0xd8] sm:$0xff]  }
 0x515   :  { %v4433_v42 = vmax.f32 %v4409_v51, 0.0  ;;  %v4381_v2 = vmax.f32 %v8151_v17, %v4342_v50  ;;  %v4379_v17 = vmax.f32 %v8132_v12, %v4334_v8  ;;  %v4405_v12 = vadd.f32 %v8199_v23, %v4376_v35 }
 0x516   :  { %v4344_v7 = vpop.f32.mrf.mxu1  ;;  %v4477_v8 = vrot.slane %v4430_v40, 7  ;;  %v4476_v59 = vsel %vm4457_vm0, %v4427_v0, %v4475_v34  ;;  %v4501_v40 = vsel %vm4457_vm0, %v4500_v24, %v4499_v5  ;;  %v4502_v51 = vrot.slane %v4431_v11, 3 }
 0x517   :  { %v4462_v58 = vrot.slane %v4433_v42, 2  ;;  %v4410_v41 = vadd.f32 %v8199_v23, %v4381_v2  ;;  %v4408_v52 = vadd.f32 %v8199_v23, %v4379_v17  ;;  %v4479_v28 = vrot.slane %v4433_v42, 6 }
 0x518   :  { %v4347_v19 = vpop.f32.mrf.mxu1  ;;  %v4429_v3 = vmax.f32 %v4405_v12, 0.0  ;;  %v4478_v61 = vsel %vm4460_vm1, %v4477_v8, %v4476_v59  ;;  %v4503_v4 = vsel %vm4460_vm1, %v4502_v51, %v4501_v40  ;;  %v6153_v8 = vld [vmem:[%s8431_s5 + $0xb8] sm:$0xff]   ;;  %v6166_v51 = vld [vmem:[%s8431_s5 + $0xe0] sm:$0xff]  }
 0x519   :  { %v4464_v43 = vsel %vm4463_vm2, %v4462_v58, %v4461_v25  ;;  %v4382_v63 = vmax.f32 %v8165_v62, %v4347_v19  ;;  %v4432_v21 = vmax.f32 %v4408_v52, 0.0  ;;  %v4480_v13 = vsel %vm4463_vm2, %v4479_v28, %v4478_v61  ;;  %v6155_v52 = vld [vmem:[%s8431_s5 + $0xa8] sm:$0xff]   ;;  %v6157_v59 = vld [vmem:[%s8431_s5 + $0x98] sm:$0xff]   ;;  %v6158_v28 = vld [vmem:[%s8431_s5 + $0x90] sm:$0xff]  }
 0x51a   :  { %v4349_v54 = vpop.f32.mrf.mxu1  ;;  %v4542_v2 = vrot.slane %v4429_v3, 4  ;;  %v6165_v3 = vld [vmem:[%s8431_s5 + $0xe8] sm:$0xff]  }
 0x51b   :  { %v4411_v45 = vadd.f32 %v8199_v23, %v4382_v63  ;;  %v4544_v33 = vrot.slane %v4432_v21, 3  ;;  %v6169_v61 = vld [vmem:[%s8431_s5 + $0xc8] sm:$0xff]   ;;  %v6170_v21 = vld [vmem:[%s8431_s5 + $0x140] sm:$0xff]  }
 0x51c   :  { %v4350_v44 = vpop.f32.mrf.mxu1  ;;  %5413 = vmatpush3.bf16.msra.mxu1 %v6170_v21 }
 0x51d   :  { %v4383_v29 = vmax.f32 %v8173_v18, %v4350_v44  ;;  %v4434_v18 = vmax.f32 %v4410_v41, 0.0  ;;  %v4435_v7 = vmax.f32 %v4411_v45, 0.0  ;;  %v6160_v45 = vld [vmem:[%s8431_s5 + $0x80] sm:$0xff]   ;;  %5414 = vmatprep.subr.bf16.mxu1 %v6247_v31 }
 0x51e   :  { %v4352_v25 = vpop.f32.mrf.mxu1 }
 0x51f   :  { %v4412_v62 = vadd.f32 %v8199_v23, %v4383_v29  ;;  %v4504_v37 = vrot.slane %v4434_v18, 2  ;;  %v4521_v55 = vrot.slane %v4434_v18, 6  ;;  %v4546_v54 = vrot.slane %v4435_v7, 2  ;;  %v6159_v18 = vld [vmem:[%s8431_s5 + $0x88] sm:$0xff]   ;;  %v6176_v7 = vld [vmem:[%s8431_s5 + $0x110] sm:$0xff]  }
 0x520   :  { %v4355_v6 = vpop.f32.mrf.mxu1 }
 0x521   :  { %v4436_v16 = vmax.f32 %v4412_v62, 0.0  ;;  %v4384_v36 = vmax.f32 %v8181_v10, %v4355_v6  ;;  %v4522_v30 = vsel %vm4463_vm2, %v4521_v55, %v4520_v27  ;;  %v6156_v62 = vld [vmem:[%s8431_s5 + $0xa0] sm:$0xff]   ;;  %v6175_v55 = vld [vmem:[%s8431_s5 + $0x118] sm:$0xff]  }
 0x522   :  { %v4357_v50 = vpop.f32.mrf.mxu1  ;;  %v6161_v6 = vld [vmem:[%s8431_s5 + $0xc0] sm:$0xff]  }
 0x523   :  { %v4465_v0 = vrot.slane %v4436_v16, 1  ;;  %v4481_v57 = vrot.slane %v4436_v16, 5  ;;  %v4413_v42 = vadd.f32 %v8199_v23, %v4384_v36  ;;  %v6162_v16 = vld [vmem:[%s8431_s5 + $0x100] sm:$0xff]   ;;  %v6163_v36 = vld [vmem:[%s8431_s5 + $0xf8] sm:$0xff]   ;;  %v6168_v50 = vld [vmem:[%s8431_s5 + $0xd0] sm:$0xff]  }
 0x524   :  { %v4358_v22 = vpop.f32.mrf.mxu1 }
 0x525   :  { %v4437_v58 = vmax.f32 %v4413_v42, 0.0  ;;  %v4385_v10 = vmax.f32 %v8189_v1, %v4358_v22  ;;  %v4482_v47 = vsel %vm4466_vm4, %v4481_v57, %v4480_v13  ;;  %v4467_v15 = vsel %vm4466_vm4, %v4465_v0, %v4464_v43  ;;  %v6171_v0 = vld [vmem:[%s8431_s5 + $0x138] sm:$0xff]   ;;  %v6172_v57 = vld [vmem:[%s8431_s5 + $0x130] sm:$0xff]   ;;  %v6173_v42 = vld [vmem:[%s8431_s5 + $0x128] sm:$0xff]  }
 0x526   :  { %4483 = vrot.lane.b32.xlu1 %v4482_v47, %s6250_s1  ;;  %v4360_v19 = vpop.f32.mrf.mxu1  ;;  %v4539_v1 = vsel %vm4451_vm14, %v4538_v20, %v8227_v9  ;;  %v4505_v43 = vsel %vm4463_vm2, %v4504_v37, %v4503_v4  ;;  %s6252_s1 = smov 112   ;;  %5415 = vmatpush3.bf16.msra.mxu1 %v6171_v0  ;;  %v6174_v37 = vld [vmem:[%s8431_s5 + $0x120] sm:$0xff]   ;;  %v6177_v22 = vld [vmem:[%s8431_s5 + $0x108] sm:$0xff]  }
 0x527   :  { %v4506_v38 = vrot.slane %v4437_v58, 1  ;;  %v4523_v35 = vrot.slane %v4437_v58, 5  ;;  %v4414_v32 = vadd.f32 %v8199_v23, %v4385_v10  ;;  %v4541_v49 = vsel %vm4454_vm15, %v4540_v14, %v4539_v1  ;;  %v6154_v14 = vld [vmem:[%s8431_s5 + $0xb0] sm:$0xff]   ;;  %5416 = vmatprep.subr.bf16.mxu1 %v6247_v31 }
 0x528   :  { %v4543_v48 = vsel %vm4457_vm0, %v4542_v2, %v4541_v49  ;;  %v5307_v2 = vld [vmem:[%s8432_s6 + $0x2] ss:$0 sm:$0xff] }
 0x529   :  { %v4438_v53 = vmax.f32 %v4414_v32, 0.0  ;;  %v4524_v17 = vsel %vm4466_vm4, %v4523_v35, %v4522_v30  ;;  %v4507_v56 = vsel %vm4466_vm4, %v4506_v38, %v4505_v43  ;;  %v4545_v9 = vsel %vm4460_vm1, %v4544_v33, %v4543_v48  ;;  %v5343_v48 = vld [vmem:[%s8432_s6 + $0x4] ss:$0 sm:$0xff] }
 0x52a   :  { %4525 = vrot.lane.b32.xlu1 %v4524_v17, %s6252_s1  ;;  %4508 = vrot.lane.b32.xlu0 %v4507_v56, %s6244_s21  ;;  %v4547_v41 = vsel %vm4463_vm2, %v4546_v54, %v4545_v9 }
 0x52b   :  { %v4548_v23 = vrot.slane %v4438_v53, 1  ;;  %5417 = vmatpush3.bf16.msra.mxu1 %v6172_v57 }
 0x52c   :  { %5418 = vmatprep.subr.bf16.mxu1 %v6247_v31 }
 0x52d   :  { %v4549_v63 = vsel %vm4466_vm4, %v4548_v23, %v4547_v41 }
 0x52e   :  { %4550 = vrot.lane.b32.xlu0 %v4549_v63, %s6242_s27 }
 0x52f   :  { %5419 = vmatpush3.bf16.msra.mxu1 %v6173_v42 }
 0x530   :  { %5420 = vmatprep.subr.bf16.mxu1 %v6247_v31 }
 0x533   :  { %5421 = vmatpush3.bf16.msra.mxu1 %v6174_v37 }
 0x534   :  { %5422 = vmatprep.subr.bf16.mxu1 %v6247_v31 }
 0x537   :  { %5423 = vmatpush3.bf16.msra.mxu1 %v6175_v55 }
 0x538   :  { %5424 = vmatprep.subr.bf16.mxu1 %v6247_v31 }
 0x53b   :  { %5425 = vmatpush3.bf16.msra.mxu1 %v6176_v7 }
 0x53c   :  { %5426 = vmatprep.subr.bf16.mxu1 %v6247_v31 }
 0x53f   :  { %5427 = vmatpush3.bf16.msra.mxu1 %v6177_v22 }
 0x598   :  { %v4484_v44 = vpop.permute.xlu1 %4483 }
 0x599   :  { %v4553_v24 = vsel %vm2755_vm10, %v4467_v15, %v4484_v44 }
 0x59a   :  { %v4558_v11 = vpack.c.bf16 %v4553_v24, %v4553_v24 }
 0x59c   :  { %v4526_v20 = vpop.permute.xlu1 %4525  ;;  %v4509_v34 = vpop.permute.xlu0 %4508 }
 0x59d   :  { %v4554_v29 = vsel %vm733_vm3, %v4484_v44, %v4509_v34  ;;  %vm6253_vm3 = vmmov 0  }
 0x59e   :  { %v4556_v5 = vsel %vm4555_vm6, %v4554_v29, %v4526_v20  ;;  %5428 = vmatprep.mubr.msk.bf16.mxu1 %vm6253_vm3, %v6247_v31 }
 0x59f   :  { %v4559_v12 = vpack.c.bf16 %v4556_v5, %v4556_v5 }
 0x5a0   :  { %v4551_v25 = vpop.permute.xlu0 %4550 }
 0x5a1   :  { %v4561_v46 = vpack.c.bf16 %v4551_v25, %v4551_v25  ;;  %4803 = vmatprep.mubr.bf16.mxu0 %v4559_v12  ;;  %v4557_v40 = vsel %vm766_vm5, %v4526_v20, %v4551_v25 }
 0x5a2   :  { %4804 = vmatmul.mubr.bf16.vlgmr.msra.gmra.mxu0 %v4558_v11  ;;  %v4560_v39 = vpack.c.bf16 %v4557_v40, %v4557_v40 }
 0x5a3   :  { %4812 = vmatpush1.bf16.msra.mxu0 %v6153_v8  ;;  %5333 = vmatprep.mubr.msk.bf16.mxu0 %vm4767_vm7, %v4561_v46 }
 0x5a4   :  { %4813 = vmatprep.subr.bf16.mxu0 %v6246_v60 }
 0x5a7   :  { %4814 = vmatpush1.bf16.msra.mxu0 %v6154_v14 }
 0x5a8   :  { %4815 = vmatprep.subr.bf16.mxu0 %v6246_v60 }
 0x5ab   :  { %4816 = vmatpush1.bf16.msra.mxu0 %v6155_v52 }
 0x5ac   :  { %4817 = vmatprep.subr.bf16.mxu0 %v6246_v60 }
 0x5af   :  { %4818 = vmatpush1.bf16.msra.mxu0 %v6156_v62 }
 0x5b0   :  { %4819 = vmatprep.subr.bf16.mxu0 %v6246_v60 }
 0x5b3   :  { %4820 = vmatpush1.bf16.msra.mxu0 %v6157_v59 }
 0x5b4   :  { %4821 = vmatprep.subr.bf16.mxu0 %v6246_v60 }
 0x5b7   :  { %4822 = vmatpush1.bf16.msra.mxu0 %v6158_v28 }
 0x5b8   :  { %4823 = vmatprep.subr.bf16.mxu0 %v6246_v60 }
 0x5bb   :  { %4824 = vmatpush1.bf16.msra.mxu0 %v6159_v18 }
 0x5bc   :  { %4825 = vmatprep.subr.bf16.mxu0 %v6246_v60 }
 0x5bf   :  { %4826 = vmatpush1.bf16.msra.mxu0 %v6160_v45 }
 0x5c0   :  { %4841 = vmatprep.subr.bf16.mxu0 %v6246_v60  ;;  %v6164_v60 = vld [vmem:[%s8431_s5 + $0xf0] sm:$0xff]  }
 0x5c3   :  { %4842 = vmatpush2.bf16.msra.mxu0 %v6161_v6 }
 0x5c4   :  { %5392 = vmatprep.subr.bf16.mxu0 %v6247_v31 }
 0x5c6   :  { %4844 = vmatmul.mubr.bf16.vlgmr.msra.gmra.mxu0 %v4560_v39 }
 0x5c7   :  { %5393 = vmatpush3.bf16.msra.mxu0 %v6162_v16  ;;  %5408 = vmatprep.mubr.msk.bf16.mxu0 %vm6253_vm3, %v6247_v31 }
 0x5c8   :  { %5394 = vmatprep.subr.bf16.mxu0 %v6247_v31 }
 0x5cb   :  { %5395 = vmatpush3.bf16.msra.mxu0 %v6163_v36 }
 0x5cc   :  { %5396 = vmatprep.subr.bf16.mxu0 %v6247_v31 }
 0x5cf   :  { %5397 = vmatpush3.bf16.msra.mxu0 %v6164_v60 }
 0x5d0   :  { %5398 = vmatprep.subr.bf16.mxu0 %v6247_v31 }
 0x5d3   :  { %5399 = vmatpush3.bf16.msra.mxu0 %v6165_v3 }
 0x5d4   :  { %5400 = vmatprep.subr.bf16.mxu0 %v6247_v31 }
 0x5d7   :  { %5401 = vmatpush3.bf16.msra.mxu0 %v6166_v51 }
 0x5d8   :  { %5402 = vmatprep.subr.bf16.mxu0 %v6247_v31 }
 0x5db   :  { %5403 = vmatpush3.bf16.msra.mxu0 %v6167_v26 }
 0x5dc   :  { %5404 = vmatprep.subr.bf16.mxu0 %v6247_v31 }
 0x5df   :  { %5405 = vmatpush3.bf16.msra.mxu0 %v6168_v50 }
 0x5e0   :  { %5406 = vmatprep.subr.bf16.mxu0 %v6247_v31  ;;  %v5334_v31 = vld [vmem:[%s8432_s6 + $0x3] ss:$0 sm:$0xff] }
 0x5e3   :  { %5407 = vmatpush3.bf16.msra.mxu0 %v6169_v61 }
 0x662   :  { %v5368_v13 = vpop.f32.mrf.mxu0 }
 0x664   :  { %v5369_v58 = vpop.f32.mrf.mxu0 }
 0x665   :  { %v5370_v15 = vadd.f32 %v5369_v58, %v5368_v13 }
 0x666   :  { %v5371_v10 = vpop.f32.mrf.mxu0 }
 0x667   :  { %v4806_v19 = vadd.f32 %v5370_v15, %v5307_v2 }
 0x668   :  { %v5372_v47 = vpop.f32.mrf.mxu0 }
 0x686   :  { %v4845_v27 = vpop.f32.mrf.mxu0 }
 0x687   :  { %v4846_v4 = vadd.f32 %v4845_v27, %v4806_v19 }
 0x688   :  { %v4847_v33 = vpop.f32.mrf.mxu0 }
 0x689   :  { %v4851_v38 = vmax.f32 %v4846_v4, 0.0 }
 0x68a   :  { %v4848_v35 = vpop.f32.mrf.mxu0 }
 0x68b   :  { %v4852_v32 = vpack.c.bf16 %v4851_v38, %v4851_v38 }
 0x68c   :  { %v4849_v1 = vpop.f32.mrf.mxu0 }
 0x68d   :  { %5409 = vmatmul.mubr.bf16.vlgmr.msra.gmra.mxu0 %v4852_v32 }
 0x74d   :  { %v4956_v54 = vpop.f32.mrf.mxu0 }
 0x74e   :  { %v4957_v30 = vadd.f32 %v5334_v31, %v4956_v54 }
 0x74f   :  { %v5410_v43 = vpop.f32.mrf.mxu0 }
 0x750   :  { %v4962_v49 = vmax.f32 %v4957_v30, 0.0 }
 0x751   :  { %v4959_v53 = vpop.f32.mrf.mxu0 }
 0x752   :  { %v4963_v17 = vpack.c.bf16 %v4962_v49, %v4962_v49 }
 0x753   :  { %v5411_v56 = vpop.f32.mrf.mxu0 }
 0x754   :  { %5429 = vmatmul.mubr.bf16.vlgmr.msra.gmra.mxu1 %v4963_v17 }
 0x814   :  { %v5067_v23 = vpop.f32.mrf.mxu1 }
 0x815   :  { %v5068_v9 = vadd.f32 %v5343_v48, %v5067_v23 }
 0x816   :  { %v5430_v41 = vpop.f32.mrf.mxu1 }
 0x817   :  { %5073 = vst [vmem:[%s8433_s7] sm:$0xff] %v5068_v9 }
 0x818   :  { %v5070_v63 = vpop.f32.mrf.mxu1 }
 0x81a   :  { %v5431_v44 = vpop.f32.mrf.mxu1 }
 0x81b   :  { %5078 = vsyncpa [#allocation3], 1 }

</bundles_post_ra>
